<compile_context>
chip_gen: v7x
topology: tpu7x:2x2x1
jax: 0.10.0
libtpu: 0.0.40
codegen_flags: <defaults>
</compile_context>

<pallas_src>
import jax
import jax.numpy as jnp
from jax.experimental import pallas as pl
from jax.experimental.pallas import tpu as pltpu

_LANES = 128           # vreg lane width (fixed on all TPU generations)
_TILE_ROWS = 4096      # (4096, 128) f32 = 2 MiB/block; 2x(in+out) = 8 MiB VMEM
_MIN_PALLAS_ELEMS = 32768  # below this, a fused XLA affine beats a kernel launch


def _affine_kernel(wb_ref, x_ref, o_ref):
    # wb_ref: (2,) f32 scalars in SMEM (scalar-prefetched): [weight, bias]
    # x_ref / o_ref: (tile_rows, 128) VMEM tiles (last grid block may be ragged)
    w = wb_ref[0]
    b = wb_ref[1]
    x = x_ref[...].astype(jnp.float32)
    o_ref[...] = (x * w + b).astype(o_ref.dtype)


def discriminator_forward(x, weight, bias, *, tile_rows=_TILE_ROWS):
    """x: (B, 1); weight: (1, 1); bias: (1,) -> (B, 1), same dtype as x."""
    B, F = x.shape
    assert F == 1, "Discriminator expects feature dim 1 (nn.Linear(1, 1))"

    w32 = weight.reshape(()).astype(jnp.float32)
    b32 = bias.reshape(()).astype(jnp.float32)

    # Tiny batch: launch + per-grid-step overhead dwarfs the 2 flops/elem of
    # work; use plain (fusable) XLA elementwise math.
    if B < _MIN_PALLAS_ELEMS:
        return (x.astype(jnp.float32) * w32 + b32).astype(x.dtype)

    wb = jnp.stack([w32, b32])  # (2,) f32 -> SMEM via scalar prefetch

    # Lane-dense slab: view the (B, 1) input as (rows, 128). Pad only to the
    # next multiple of 128 (<= 127 elements); zero-copy when B % 128 == 0.
    flat = x.reshape(-1)
    rows = pl.cdiv(B, _LANES)
    padded = rows * _LANES
    if padded != B:
        flat = jnp.pad(flat, (0, padded - B))
    slab = flat.reshape(rows, _LANES)

    # Block height: never exceed the slab (a full-extent block is always
    # legal); otherwise it stays the 2 MiB default. Ragged last block is
    # handled by the cdiv grid (masked writes, garbage sliced off below).
    tile_rows = min(tile_rows, rows)
    grid = pl.cdiv(rows, tile_rows)

    out_slab = pl.pallas_call(
        _affine_kernel,
        out_shape=jax.ShapeDtypeStruct((rows, _LANES), x.dtype),
        grid_spec=pltpu.PrefetchScalarGridSpec(
            num_scalar_prefetch=1,  # wb lands in SMEM before the grid runs
            grid=(grid,),
            in_specs=[
                pl.BlockSpec((tile_rows, _LANES), lambda i, _wb: (i, 0)),
            ],
            out_specs=pl.BlockSpec((tile_rows, _LANES), lambda i, _wb: (i, 0)),
        ),
        compiler_params=pltpu.CompilerParams(
            dimension_semantics=("parallel",),  # shard row tiles across TCs (v7x)
        ),
    )(wb, slab)

    out_flat = out_slab.reshape(-1)
    if padded != B:
        out_flat = out_flat[:B]  # drop the <=127 padded tail values
    return out_flat.reshape(B, 1)


if __name__ == "__main__":
    key = jax.random.PRNGKey(0)
    k_w, k_x = jax.random.split(key)

    # Deterministic parameter init matching the module's __init__:
    #   weight ~ Normal(mean=-0.5, std=0.1), shape (1, 1); bias = 3.0, shape (1,)
    weight = (-0.5 + 0.1 * jax.random.normal(k_w, (1, 1))).astype(jnp.float32)
    bias = jnp.full((1,), 3.0, dtype=jnp.float32)

    # Pallas path: 2 full (4096, 128) grid steps plus a ragged tail block,
    # which also exercises the <=127-element pad / trailing-slice logic.
    B = 2 * _TILE_ROWS * _LANES + 37
    x = jax.random.normal(k_x, (B, 1), dtype=jnp.float32)
    out = jax.block_until_ready(discriminator_forward(x, weight, bias))
    ref = x @ weight.T + bias
    assert out.shape == (B, 1)
    assert jnp.allclose(out, ref, atol=1e-6), "Pallas output mismatch vs reference"

    # 128-aligned fast path: no pad, no trailing slice (zero-copy wrapper).
    B2 = _TILE_ROWS * _LANES
    x2 = jax.random.normal(k_x, (B2, 1), dtype=jnp.float32)
    out2 = jax.block_until_ready(discriminator_forward(x2, weight, bias))
    assert jnp.allclose(out2, x2 @ weight.T + bias, atol=1e-6)

    # Tiny batch: plain fused XLA affine (no kernel launch).
    x3 = x[:8]
    out3 = jax.block_until_ready(discriminator_forward(x3, weight, bias))
    assert jnp.allclose(out3, x3 @ weight.T + bias, atol=1e-6)

    print("KERNEL_OK")
</pallas_src>

<mosaic_0001>
module attributes {stable_mosaic.version = 11 : i64} {
  func.func @_affine_kernel(%arg0: i32, %arg1: memref<2xf32, #tpu.memory_space<smem>>, %arg2: memref<4096x128xf32, #tpu.memory_space<vmem>>, %arg3: memref<4096x128xf32, #tpu.memory_space<vmem>>) attributes {dimension_semantics = [#tpu.dimension_semantics<parallel>], iteration_bounds = array<i64: 3>, scalar_prefetch = 1 : i64, scratch_operands = 0 : i64, tpu.core_type = #tpu.core_type<tc>, window_params = [{transform_indices = @transform_0, window_bounds = array<i64: 4096, 128>}, {transform_indices = @transform_1, window_bounds = array<i64: 4096, 128>}]} {
    %c0 = arith.constant 0 : index
    %0 = memref.load %arg1[%c0] : memref<2xf32, #tpu.memory_space<smem>>
    %c1 = arith.constant 1 : index
    %1 = memref.load %arg1[%c1] : memref<2xf32, #tpu.memory_space<smem>>
    %c0_0 = arith.constant 0 : index
    %c0_1 = arith.constant 0 : index
    %2 = vector.load %arg2[%c0_0, %c0_1] : memref<4096x128xf32, #tpu.memory_space<vmem>>, vector<4096x128xf32>
    %3 = vector.broadcast %0 : f32 to vector<4096x128xf32>
    %4 = arith.mulf %2, %3 : vector<4096x128xf32>
    %5 = vector.broadcast %1 : f32 to vector<4096x128xf32>
    %6 = arith.addf %4, %5 : vector<4096x128xf32>
    %c0_2 = arith.constant 0 : index
    %c0_3 = arith.constant 0 : index
    %7 = vector.load %arg3[%c0_2, %c0_3] : memref<4096x128xf32, #tpu.memory_space<vmem>>, vector<4096x128xf32>
    tpu.vector_store %arg3[%c0_2, %c0_3], %6 {strides = array<i32>} : memref<4096x128xf32, #tpu.memory_space<vmem>>, vector<4096x128xf32>,
    return
  }
  func.func @transform_0(%arg0: i32, %arg1: memref<2xf32, #tpu.memory_space<smem>>) -> (i32, i32) {
    %c0_i32 = arith.constant 0 : i32
    %c0_i32_0 = arith.constant 0 : i32
    return %arg0, %c0_i32 : i32, i32
  }
  func.func @transform_1(%arg0: i32, %arg1: memref<2xf32, #tpu.memory_space<smem>>) -> (i32, i32) {
    %c0_i32 = arith.constant 0 : i32
    %c0_i32_0 = arith.constant 0 : i32
    return %arg0, %c0_i32 : i32, i32
  }
}

</mosaic_0001>

<bundles_post_ra>
// kernel: tpu_custom_call.1
= control target key start
LH: loop header
LB: loop body
LE: loop exit
PB: predicated region body
PF: predicated region fallthrough
CT: control target
= control target key end

     0   :  { %s4740_s0 = inlined_call_operand.hbm [shape: f32[2], index: 0, kind: input, shape index: {}]   ;;  %s4741_s1 = inlined_call_operand.hbm [shape: f32[8193,128], index: 1, kind: input, shape index: {}]   ;;  %s4742_s2 = inlined_call_operand.hbm [shape: f32[8193,128], index: 2, kind: output, shape index: {}]  }
   0x1   :  { %s2370_s11 = scalar_lea.hbm %s4740_s0, 16 }
   0x2   :  { %p2371_p0 = scmp.ne.s32.totalorder %s4740_s0, %s2370_s11  ;;  %p2374_p1 = scmp.lt.u32.totalorder %s2370_s11, %s4740_s0 }
   0x4   :  { %p2376_p2 = pnand %p2374_p1, %p2371_p0 }
   0x6   :  { %2379 = shalt.err (!%p2376_p2)  }
   0x7   :  { %s2478_s16 = smov [#allocation3]  }
   0x8   :  { %8 = dma.hbm_to_smem %s4740_s0, 16, %s2478_s16, [#allocation2] }
   0x9   :  { %2452 = dma.done.wait [#allocation2], 16 }
   0xa   :  { %2453 = vsyncadd [#allocation2], 4294967280 }
   0xb   :  { %10 = sfence }
   0xc   :  { %11 = vsyncpa [#allocation5], 0 }
   0xd   :  { %13 = vsyncpa [#allocation5 + $0x1], 0 }
   0xe   :  { %14 = vsyncpa [#allocation6], 0 }
   0xf   :  { %16 = vsyncpa [#allocation6 + $0x1], 0  ;;  %s2512_s19 = smov 0   ;;  %s2514_s20 = smov 0  }
  0x10   :  { %s2516_s21 = smov 0   ;;  %s2518_s22 = smov 0  }
  0x11 LB: > { %s2533_s0 = sadd.s32 4294967295, %s2476_s22   ;;  %s2301_s23 = sadd.s32 4294967294, %s2476_s22   ;;  %s2476_s22 = sphi %s2518_s22, %s4750_s22   ;;  %s2472_s21 = sphi %s2516_s21, %s4749_s21   ;;  %s2468_s20 = sphi %s2514_s20, %s4748_s20   ;;  %s2464_s19 = sphi %s2512_s19, %s4747_s19  }
  0x12   : > { %s2537_s24 = sadd.s32 1, %s2476_s22   ;;  %s29_s25 = sadd.s32 1, %s2472_s21 }
  0x13   : > { %s26_s26 = ssub.s32 %s2476_s22, %s2537_s24  ;;  %p36_p3 = scmp.ne.s32.totalorder %s2472_s21, %s2468_s20 }
  0x14   : > { %p27_p4 = scmp.eq.s32.totalorder %s26_s26, 0  ;;  %p37_p5 = scmp.eq.s32.totalorder %s2476_s22, 0 }
  0x15   : > { %p42_p6 = scmp.ne.s32.totalorder %s2468_s20, %s2464_s19  ;;  %p43_p7 = scmp.eq.s32.totalorder %s2533_s0, 0 }
  0x16   : > { %s2549_s27 = scalar_select %p27_p4, %s2472_s21, %s29_s25  }
  0x17   : > { %p38_p8 = por %p37_p5, %p36_p3  ;;  %p2551_p9 = por %p43_p7, %p42_p6 }
  0x18   : > { %p66_p10 = scmp.eq.s32.totalorder %s2533_s0, 2  ;;  %p72_p11 = scmp.eq.s32.totalorder %s2301_s23, 2 }
  0x19   : > { %p2303_p0 = scmp.ge.s32.totalorder %s2476_s22, 3 }
  0x1a   : > { %p2556_p12 = por %p66_p10, %p36_p3  ;;  %p2560_p13 = por %p72_p11, %p42_p6 }
  0x1b   : > { %88 = sbr.rel (%p2303_p0) target bundleno = 69 (0x45), region = 16 }
  0x1c   : > { %s4745_s30 = scalar_select %p2560_p13, 1, 0 }
  0x22   : > { %91 = sbr.rel (!%p38_p8) target bundleno = 69 (0x45), region = 20  ;;  %s92_s3 = sand.u32 (%p38_p8), 1, %s2472_s21  }
  0x23   : > { %s2305_s4 = sshll.u32 (%p38_p8), %s2476_s22, 9  ;;  %s2304_s5 = sshll.u32 (%p38_p8), %s92_s3, 12 }
  0x24   : > { %s98_s6 = ssub.s32 (%p38_p8), 1025, %s2305_s4  ;;  %s2570_s9 = scalar_lea.sflag (%p38_p8), [#allocation5], %s92_s3 }
  0x25   : > { %p99_p1 = scmp.lt.s32.totalorder (%p38_p8), %s98_s6, 512  ;;  %s96_s10 = scalar_lea.vmem (%p38_p8), [#allocation4], %s2304_s5 }
  0x29   : > { %s4752_s6 = smov (!%p99_p1, %s98_s6), 512 }
  0x2a   : > { %s2567_s7 = sshll.u32 %s4752_s6, 7 }
  0x2b   : > { %s103_s8 = ssub.s32 65536, %s2567_s7 }
  0x2c   : > { %104 = vsyncadd %s2570_s9, %s103_s8  ;;  %p2307_p2 = scmp.ne.s32.totalorder %s2567_s7, 0  ;;  %s2324_s11 = sshll.u32 %s2476_s22, 16 }
  0x2d   : > { %s2578_s14 = scalar_lea.hbm %s4741_s1, %s2324_s11  ;;  %s109_s15 = sshll.u32 %s96_s10, 4  ;;  %s2580_s15 = int_to_ptr.vmem [resolvable:$true] %s109_s15 }
  0x2e   : > { %s2380_s16 = scalar_lea.hbm %s2578_s14, %s2567_s7  ;;  %s2384_s23 = scalar_lea.hbm %s4741_s1, 131200 }
  0x2f   : > { %p2381_p3 = scmp.ne.s32.totalorder %s2578_s14, %s2380_s16  ;;  %p2385_p6 = scmp.lt.u32.totalorder %s2578_s14, %s4741_s1 }
  0x30   : > { %p2386_p7 = scmp.lt.u32.totalorder %s2384_s23, %s2380_s16  ;;  %p2388_p10 = scmp.lt.u32.totalorder %s2380_s16, %s2578_s14 }
  0x31   : > { %p2382_p4 = pnand %p2381_p3, %p2307_p2 }
  0x32   : > { %p2387_p8 = por %p2386_p7, %p2385_p6 }
  0x33   : > { %p2383_p5 = pneg %p2382_p4 }
  0x34   : > { %p2389_p11 = por %p2388_p10, %p2387_p8 }
  0x36   : > { %p2390_p0 = pnand %p2389_p11, %p2383_p5 }
  0x38   : > { %2393 = shalt.err (!%p2390_p0)
}
  0x39   : > { %s2394_s3 = scalar_lea.vmem %s2580_s15, %s2567_s7  ;;  %s2479_s4 = smov [#allocation4]  }
  0x3a   : > { %p2395_p1 = scmp.ne.s32.totalorder %s2580_s15, %s2394_s3  ;;  %s2398_s5 = sshll.u32 %s2479_s4, 4  ;;  %s2399_s5 = int_to_ptr.vmem [resolvable:$false] %s2398_s5 }
  0x3b   : > { %s2400_s6 = scalar_lea.vmem %s2399_s5, 131072  ;;  %p2401_p13 = scmp.lt.s32.totalorder %s2580_s15, %s2399_s5 }
  0x3c   : > { %p2396_p3 = pnand %p2395_p1, %p2307_p2  ;;  %p2402_p6 = scmp.lt.s32.totalorder %s2400_s6, %s2394_s3 }
  0x3e   : > { %p2397_p4 = pneg %p2396_p3  ;;  %p2403_p7 = por %p2402_p6, %p2401_p13 }
  0x40   : > { %p2404_p8 = pnand %p2403_p7, %p2397_p4 }
  0x42   : > { %2407 = shalt.err (!%p2404_p8)
}
  0x43   : > { %s2480_s8 = smov 128   ;;  %s2481_s10 = smov 8  }
  0x44   : > { %115 = dma.hbm_to_vmem [thread:$0]  (%p2307_p2), %s2578_s14, %s2567_s7, %s2580_s15, %s2570_s9, %s2480_s8, %s2480_s8, %s2481_s10  }
  0x45 PF: > { %p2311_p5 = scmp.ge.s32.totalorder %s2476_s22, 1  ;;  %p117_p10 = scmp.lt.s32.totalorder %s2476_s22, 4 }
  0x47   : > { %p118_p11 = pnand %p2311_p5, %p117_p10 }
  0x48   : > { %s2610_s11 = sand.u32 (!%p118_p11), 1, %s2468_s20  }
  0x49   : > { %121 = sbr.rel (%p118_p11) target bundleno = 426 (0x1aa), region = 24  ;;  %s2312_s12 = sshll.u32 (!%p118_p11), %s2610_s11, 12 }
  0x4a   : > { %s124_s13 = scalar_lea.sflag (!%p118_p11), [#allocation5], %s2610_s11  ;;  %s2616_s16 = scalar_lea.vmem (!%p118_p11), [#allocation4], %s2312_s12 }
  0x50   : > { %2455 = dma.done.wait (%p2551_p9), %s124_s13, 65536  }
  0x51   : > { %2457 = vsyncadd (%p2551_p9), %s124_s13, 4294901760  ;;  %s156_s7 = sld [smem:[#allocation3]]  ;;  %s2314_s9 = sld [smem:[#allocation3 + $0x1]]  ;;  %v158_v0 = vld [vmem:[%s2616_s16] sm:$0xff]  ;;  %v159_v3 = vld [vmem:[%s2616_s16 + $0x8] sm:$0xff] }
  0x52   : > { %v160_v6 = vld [vmem:[%s2616_s16 + $0x10] sm:$0xff]  ;;  %v161_v7 = vld [vmem:[%s2616_s16 + $0x18] sm:$0xff]  ;;  %v162_v8 = vld [vmem:[%s2616_s16 + $0x20] sm:$0xff]  ;;  %s2655_s28 = scalar_lea.vmem [#allocation7], %s2312_s12  ;;  %s2209_s14 = scalar_lea.sflag [#allocation6], %s2610_s11 }
  0x53   : > { %v163_v12 = vld [vmem:[%s2616_s16 + $0x28] sm:$0xff]  ;;  %v164_v13 = vld [vmem:[%s2616_s16 + $0x30] sm:$0xff]  ;;  %v165_v14 = vld [vmem:[%s2616_s16 + $0x38] sm:$0xff]  ;;  %s2316_s15 = sshll.u32 (%p2556_p12), %s2533_s0, 9 }
  0x54   : > { %v166_v19 = vld [vmem:[%s2616_s16 + $0x40] sm:$0xff]  ;;  %v167_v20 = vld [vmem:[%s2616_s16 + $0x48] sm:$0xff]  ;;  %v168_v21 = vld [vmem:[%s2616_s16 + $0x50] sm:$0xff]  ;;  %s2217_s17 = ssub.s32 (%p2556_p12), 1025, %s2316_s15 }
  0x55   : > { %v169_v26 = vld [vmem:[%s2616_s16 + $0x58] sm:$0xff]  ;;  %v170_v27 = vld [vmem:[%s2616_s16 + $0x60] sm:$0xff]  ;;  %v171_v28 = vld [vmem:[%s2616_s16 + $0x68] sm:$0xff]  ;;  %p2218_p9 = scmp.lt.s32.totalorder (%p2556_p12), %s2217_s17, 512 }
  0x56   : > { %v172_v33 = vld [vmem:[%s2616_s16 + $0x70] sm:$0xff]  ;;  %v173_v34 = vld [vmem:[%s2616_s16 + $0x78] sm:$0xff]  ;;  %v174_v39 = vld [vmem:[%s2616_s16 + $0x80] sm:$0xff] }
  0x57   : > { %v2623_v1 = vstv %s156_s7  ;;  %v2625_v2 = vstv %s2314_s9  ;;  %v175_v40 = vld [vmem:[%s2616_s16 + $0x88] sm:$0xff]  ;;  %v176_v45 = vld [vmem:[%s2616_s16 + $0x90] sm:$0xff] }
  0x58   : > { %v671_v4 = vmul.f32 %v2623_v1, %v158_v0  ;;  %v672_v5 = vmul.f32 %v2623_v1, %v159_v3  ;;  %v673_v9 = vmul.f32 %v2623_v1, %v160_v6  ;;  %v674_v10 = vmul.f32 %v2623_v1, %v161_v7  ;;  %v177_v46 = vld [vmem:[%s2616_s16 + $0x98] sm:$0xff]  ;;  %v178_v47 = vld [vmem:[%s2616_s16 + $0xa0] sm:$0xff]  ;;  %v179_v52 = vld [vmem:[%s2616_s16 + $0xa8] sm:$0xff] }
  0x59   : > { %v675_v11 = vmul.f32 %v2623_v1, %v162_v8  ;;  %v676_v17 = vmul.f32 %v2623_v1, %v163_v12  ;;  %v677_v18 = vmul.f32 %v2623_v1, %v164_v13  ;;  %v678_v25 = vmul.f32 %v2623_v1, %v165_v14  ;;  %v180_v53 = vld [vmem:[%s2616_s16 + $0xb0] sm:$0xff]  ;;  %v181_v58 = vld [vmem:[%s2616_s16 + $0xb8] sm:$0xff]  ;;  %v182_v63 = vld [vmem:[%s2616_s16 + $0xc0] sm:$0xff] }
  0x5a   : > { %v1184_v15 = vadd.f32 %v2625_v2, %v671_v4  ;;  %v1185_v16 = vadd.f32 %v2625_v2, %v672_v5  ;;  %v1186_v22 = vadd.f32 %v2625_v2, %v673_v9  ;;  %v1187_v23 = vadd.f32 %v2625_v2, %v674_v10  ;;  %v183_v0 = vld [vmem:[%s2616_s16 + $0xc8] sm:$0xff]  ;;  %v184_v7 = vld [vmem:[%s2616_s16 + $0xd0] sm:$0xff]  ;;  %v185_v8 = vld [vmem:[%s2616_s16 + $0xd8] sm:$0xff] }
  0x5b   : > { %v1188_v24 = vadd.f32 %v2625_v2, %v675_v11  ;;  %v1189_v29 = vadd.f32 %v2625_v2, %v676_v17  ;;  %v1190_v30 = vadd.f32 %v2625_v2, %v677_v18  ;;  %v679_v31 = vmul.f32 %v2623_v1, %v166_v19  ;;  %v186_v9 = vld [vmem:[%s2616_s16 + $0xe0] sm:$0xff]  ;;  %v187_v14 = vld [vmem:[%s2616_s16 + $0xe8] sm:$0xff] }
  0x5c   : > { %1696 = vst [vmem:[%s2655_s28] sm:$0xff] %v1184_v15  ;;  %1697 = vst [vmem:[%s2655_s28 + $0x8] sm:$0xff] %v1185_v16  ;;  %v680_v32 = vmul.f32 %v2623_v1, %v167_v20  ;;  %v1191_v35 = vadd.f32 %v2625_v2, %v678_v25  ;;  %v681_v36 = vmul.f32 %v2623_v1, %v168_v21  ;;  %v188_v15 = vld [vmem:[%s2616_s16 + $0xf0] sm:$0xff]  ;;  %v189_v20 = vld [vmem:[%s2616_s16 + $0xf8] sm:$0xff] }
  0x5d   : > { %1698 = vst [vmem:[%s2655_s28 + $0x10] sm:$0xff] %v1186_v22  ;;  %1699 = vst [vmem:[%s2655_s28 + $0x18] sm:$0xff] %v1187_v23  ;;  %v682_v37 = vmul.f32 %v2623_v1, %v169_v26  ;;  %v683_v38 = vmul.f32 %v2623_v1, %v170_v27  ;;  %v1192_v41 = vadd.f32 %v2625_v2, %v679_v31  ;;  %v190_v25 = vld [vmem:[%s2616_s16 + $0x100] sm:$0xff]  ;;  %v191_v26 = vld [vmem:[%s2616_s16 + $0x108] sm:$0xff] }
  0x5e   : > { %1700 = vst [vmem:[%s2655_s28 + $0x20] sm:$0xff] %v1188_v24  ;;  %1701 = vst [vmem:[%s2655_s28 + $0x28] sm:$0xff] %v1189_v29  ;;  %v1193_v42 = vadd.f32 %v2625_v2, %v680_v32  ;;  %v684_v43 = vmul.f32 %v2623_v1, %v171_v28  ;;  %v685_v44 = vmul.f32 %v2623_v1, %v172_v33  ;;  %v192_v31 = vld [vmem:[%s2616_s16 + $0x110] sm:$0xff]  ;;  %v193_v32 = vld [vmem:[%s2616_s16 + $0x118] sm:$0xff] }
  0x5f   : > { %1702 = vst [vmem:[%s2655_s28 + $0x30] sm:$0xff] %v1190_v30  ;;  %1703 = vst [vmem:[%s2655_s28 + $0x38] sm:$0xff] %v1191_v35  ;;  %v1194_v48 = vadd.f32 %v2625_v2, %v681_v36  ;;  %v1195_v49 = vadd.f32 %v2625_v2, %v682_v37  ;;  %v1196_v50 = vadd.f32 %v2625_v2, %v683_v38  ;;  %v194_v33 = vld [vmem:[%s2616_s16 + $0x120] sm:$0xff]  ;;  %v195_v38 = vld [vmem:[%s2616_s16 + $0x128] sm:$0xff] }
  0x60   : > { %v686_v51 = vmul.f32 %v2623_v1, %v173_v34  ;;  %1704 = vst [vmem:[%s2655_s28 + $0x40] sm:$0xff] %v1192_v41  ;;  %1705 = vst [vmem:[%s2655_s28 + $0x48] sm:$0xff] %v1193_v42  ;;  %v1197_v54 = vadd.f32 %v2625_v2, %v684_v43  ;;  %v1198_v55 = vadd.f32 %v2625_v2, %v685_v44  ;;  %v197_v44 = vld [vmem:[%s2616_s16 + $0x138] sm:$0xff] }
  0x61   : > { %v687_v56 = vmul.f32 %v2623_v1, %v174_v39  ;;  %v688_v57 = vmul.f32 %v2623_v1, %v175_v40  ;;  %1706 = vst [vmem:[%s2655_s28 + $0x50] sm:$0xff] %v1194_v48  ;;  %1707 = vst [vmem:[%s2655_s28 + $0x58] sm:$0xff] %v1195_v49  ;;  %v689_v60 = vmul.f32 %v2623_v1, %v176_v45  ;;  %v196_v39 = vld [vmem:[%s2616_s16 + $0x130] sm:$0xff]  ;;  %v198_v49 = vld [vmem:[%s2616_s16 + $0x140] sm:$0xff] }
  0x62   : > { %1708 = vst [vmem:[%s2655_s28 + $0x60] sm:$0xff] %v1196_v50  ;;  %v1199_v59 = vadd.f32 %v2625_v2, %v686_v51  ;;  %v690_v61 = vmul.f32 %v2623_v1, %v177_v46  ;;  %v691_v62 = vmul.f32 %v2623_v1, %v178_v47  ;;  %1709 = vst [vmem:[%s2655_s28 + $0x68] sm:$0xff] %v1197_v54  ;;  %v199_v50 = vld [vmem:[%s2616_s16 + $0x148] sm:$0xff] }
  0x63   : > { %1710 = vst [vmem:[%s2655_s28 + $0x70] sm:$0xff] %v1198_v55  ;;  %v1200_v3 = vadd.f32 %v2625_v2, %v687_v56  ;;  %v1201_v4 = vadd.f32 %v2625_v2, %v688_v57  ;;  %v692_v5 = vmul.f32 %v2623_v1, %v179_v52  ;;  %v693_v6 = vmul.f32 %v2623_v1, %v180_v53  ;;  %v200_v55 = vld [vmem:[%s2616_s16 + $0x150] sm:$0xff]  ;;  %v201_v56 = vld [vmem:[%s2616_s16 + $0x158] sm:$0xff]  ;;  %v202_v57 = vld [vmem:[%s2616_s16 + $0x160] sm:$0xff] }
  0x64   : > { %1711 = vst [vmem:[%s2655_s28 + $0x78] sm:$0xff] %v1199_v59  ;;  %v1202_v10 = vadd.f32 %v2625_v2, %v689_v60  ;;  %v1203_v11 = vadd.f32 %v2625_v2, %v690_v61  ;;  %v1204_v12 = vadd.f32 %v2625_v2, %v691_v62  ;;  %v694_v13 = vmul.f32 %v2623_v1, %v181_v58  ;;  %v203_v62 = vld [vmem:[%s2616_s16 + $0x168] sm:$0xff] }
  0x65   : > { %1712 = vst [vmem:[%s2655_s28 + $0x80] sm:$0xff] %v1200_v3  ;;  %1713 = vst [vmem:[%s2655_s28 + $0x88] sm:$0xff] %v1201_v4  ;;  %v1205_v16 = vadd.f32 %v2625_v2, %v692_v5  ;;  %v1206_v17 = vadd.f32 %v2625_v2, %v693_v6  ;;  %v695_v18 = vmul.f32 %v2623_v1, %v182_v63  ;;  %v204_v63 = vld [vmem:[%s2616_s16 + $0x170] sm:$0xff]  ;;  %v205_v6 = vld [vmem:[%s2616_s16 + $0x178] sm:$0xff] }
  0x66   : > { %v696_v19 = vmul.f32 %v2623_v1, %v183_v0  ;;  %1714 = vst [vmem:[%s2655_s28 + $0x90] sm:$0xff] %v1202_v10  ;;  %1715 = vst [vmem:[%s2655_s28 + $0x98] sm:$0xff] %v1203_v11  ;;  %v1207_v21 = vadd.f32 %v2625_v2, %v694_v13  ;;  %v697_v22 = vmul.f32 %v2623_v1, %v184_v7  ;;  %v206_v11 = vld [vmem:[%s2616_s16 + $0x180] sm:$0xff] }
  0x67   : > { %1716 = vst [vmem:[%s2655_s28 + $0xa0] sm:$0xff] %v1204_v12  ;;  %v698_v23 = vmul.f32 %v2623_v1, %v185_v8  ;;  %v699_v24 = vmul.f32 %v2623_v1, %v186_v9  ;;  %1717 = vst [vmem:[%s2655_s28 + $0xa8] sm:$0xff] %v1205_v16  ;;  %v1208_v27 = vadd.f32 %v2625_v2, %v695_v18  ;;  %v207_v12 = vld [vmem:[%s2616_s16 + $0x188] sm:$0xff]  ;;  %v209_v18 = vld [vmem:[%s2616_s16 + $0x198] sm:$0xff] }
  0x68   : > { %1718 = vst [vmem:[%s2655_s28 + $0xb0] sm:$0xff] %v1206_v17  ;;  %v1209_v28 = vadd.f32 %v2625_v2, %v696_v19  ;;  %v700_v29 = vmul.f32 %v2623_v1, %v187_v14  ;;  %v701_v30 = vmul.f32 %v2623_v1, %v188_v15  ;;  %1719 = vst [vmem:[%s2655_s28 + $0xb8] sm:$0xff] %v1207_v21  ;;  %v208_v17 = vld [vmem:[%s2616_s16 + $0x190] sm:$0xff]  ;;  %v210_v19 = vld [vmem:[%s2616_s16 + $0x1a0] sm:$0xff] }
  0x69   : > { %v1210_v34 = vadd.f32 %v2625_v2, %v697_v22  ;;  %v1211_v35 = vadd.f32 %v2625_v2, %v698_v23  ;;  %v1212_v36 = vadd.f32 %v2625_v2, %v699_v24  ;;  %v702_v37 = vmul.f32 %v2623_v1, %v189_v20  ;;  %1720 = vst [vmem:[%s2655_s28 + $0xc0] sm:$0xff] %v1208_v27  ;;  %v211_v24 = vld [vmem:[%s2616_s16 + $0x1a8] sm:$0xff] }
  0x6a   : > { %1721 = vst [vmem:[%s2655_s28 + $0xc8] sm:$0xff] %v1209_v28  ;;  %v1213_v40 = vadd.f32 %v2625_v2, %v700_v29  ;;  %v1214_v41 = vadd.f32 %v2625_v2, %v701_v30  ;;  %v703_v42 = vmul.f32 %v2623_v1, %v190_v25  ;;  %v704_v43 = vmul.f32 %v2623_v1, %v191_v26  ;;  %v212_v25 = vld [vmem:[%s2616_s16 + $0x1b0] sm:$0xff]  ;;  %v213_v30 = vld [vmem:[%s2616_s16 + $0x1b8] sm:$0xff] }
  0x6b   : > { %1722 = vst [vmem:[%s2655_s28 + $0xd0] sm:$0xff] %v1210_v34  ;;  %1723 = vst [vmem:[%s2655_s28 + $0xd8] sm:$0xff] %v1211_v35  ;;  %v1215_v45 = vadd.f32 %v2625_v2, %v702_v37  ;;  %v705_v46 = vmul.f32 %v2623_v1, %v192_v31  ;;  %v706_v47 = vmul.f32 %v2623_v1, %v193_v32  ;;  %v214_v35 = vld [vmem:[%s2616_s16 + $0x1c0] sm:$0xff] }
  0x6c   : > { %1724 = vst [vmem:[%s2655_s28 + $0xe0] sm:$0xff] %v1212_v36  ;;  %v707_v48 = vmul.f32 %v2623_v1, %v194_v33  ;;  %1725 = vst [vmem:[%s2655_s28 + $0xe8] sm:$0xff] %v1213_v40  ;;  %v1216_v51 = vadd.f32 %v2625_v2, %v703_v42  ;;  %v1217_v52 = vadd.f32 %v2625_v2, %v704_v43  ;;  %v215_v36 = vld [vmem:[%s2616_s16 + $0x1c8] sm:$0xff]  ;;  %v217_v42 = vld [vmem:[%s2616_s16 + $0x1d8] sm:$0xff] }
  0x6d   : > { %1726 = vst [vmem:[%s2655_s28 + $0xf0] sm:$0xff] %v1214_v41  ;;  %v708_v53 = vmul.f32 %v2623_v1, %v195_v38  ;;  %v709_v54 = vmul.f32 %v2623_v1, %v196_v39  ;;  %1727 = vst [vmem:[%s2655_s28 + $0xf8] sm:$0xff] %v1215_v45  ;;  %v1218_v58 = vadd.f32 %v2625_v2, %v705_v46  ;;  %v216_v41 = vld [vmem:[%s2616_s16 + $0x1d0] sm:$0xff]  ;;  %v218_v43 = vld [vmem:[%s2616_s16 + $0x1e0] sm:$0xff] }
  0x6e   : > { %v1219_v59 = vadd.f32 %v2625_v2, %v706_v47  ;;  %v1220_v60 = vadd.f32 %v2625_v2, %v707_v48  ;;  %v710_v61 = vmul.f32 %v2623_v1, %v197_v44  ;;  %1728 = vst [vmem:[%s2655_s28 + $0x100] sm:$0xff] %v1216_v51  ;;  %1729 = vst [vmem:[%s2655_s28 + $0x108] sm:$0xff] %v1217_v52  ;;  %v219_v48 = vld [vmem:[%s2616_s16 + $0x1e8] sm:$0xff] }
  0x6f   : > { %v1221_v0 = vadd.f32 %v2625_v2, %v708_v53  ;;  %v1222_v3 = vadd.f32 %v2625_v2, %v709_v54  ;;  %v711_v4 = vmul.f32 %v2623_v1, %v198_v49  ;;  %v712_v5 = vmul.f32 %v2623_v1, %v199_v50  ;;  %1730 = vst [vmem:[%s2655_s28 + $0x110] sm:$0xff] %v1218_v58  ;;  %v220_v49 = vld [vmem:[%s2616_s16 + $0x1f0] sm:$0xff]  ;;  %v221_v54 = vld [vmem:[%s2616_s16 + $0x1f8] sm:$0xff] }
  0x70   : > { %1731 = vst [vmem:[%s2655_s28 + $0x118] sm:$0xff] %v1219_v59  ;;  %1732 = vst [vmem:[%s2655_s28 + $0x120] sm:$0xff] %v1220_v60  ;;  %v1223_v7 = vadd.f32 %v2625_v2, %v710_v61  ;;  %v713_v8 = vmul.f32 %v2623_v1, %v200_v55  ;;  %v714_v9 = vmul.f32 %v2623_v1, %v201_v56  ;;  %v222_v59 = vld [vmem:[%s2616_s16 + $0x200] sm:$0xff]  ;;  %v223_v60 = vld [vmem:[%s2616_s16 + $0x208] sm:$0xff] }
  0x71   : > { %v715_v10 = vmul.f32 %v2623_v1, %v202_v57  ;;  %1733 = vst [vmem:[%s2655_s28 + $0x128] sm:$0xff] %v1221_v0  ;;  %1734 = vst [vmem:[%s2655_s28 + $0x130] sm:$0xff] %v1222_v3  ;;  %v1224_v13 = vadd.f32 %v2625_v2, %v711_v4  ;;  %v1225_v14 = vadd.f32 %v2625_v2, %v712_v5  ;;  %v224_v3 = vld [vmem:[%s2616_s16 + $0x210] sm:$0xff]  ;;  %v225_v4 = vld [vmem:[%s2616_s16 + $0x218] sm:$0xff] }
  0x72   : > { %v716_v15 = vmul.f32 %v2623_v1, %v203_v62  ;;  %v717_v16 = vmul.f32 %v2623_v1, %v204_v63  ;;  %1735 = vst [vmem:[%s2655_s28 + $0x138] sm:$0xff] %v1223_v7  ;;  %v1226_v20 = vadd.f32 %v2625_v2, %v713_v8  ;;  %v1227_v21 = vadd.f32 %v2625_v2, %v714_v9  ;;  %v226_v5 = vld [vmem:[%s2616_s16 + $0x220] sm:$0xff] }
  0x73   : > { %v1228_v22 = vadd.f32 %v2625_v2, %v715_v10  ;;  %v718_v23 = vmul.f32 %v2623_v1, %v205_v6  ;;  %1736 = vst [vmem:[%s2655_s28 + $0x140] sm:$0xff] %v1224_v13  ;;  %1737 = vst [vmem:[%s2655_s28 + $0x148] sm:$0xff] %v1225_v14  ;;  %v719_v28 = vmul.f32 %v2623_v1, %v206_v11  ;;  %v227_v10 = vld [vmem:[%s2616_s16 + $0x228] sm:$0xff]  ;;  %v228_v11 = vld [vmem:[%s2616_s16 + $0x230] sm:$0xff] }
  0x74   : > { %v1229_v26 = vadd.f32 %v2625_v2, %v716_v15  ;;  %v1230_v27 = vadd.f32 %v2625_v2, %v717_v16  ;;  %v720_v29 = vmul.f32 %v2623_v1, %v207_v12  ;;  %1738 = vst [vmem:[%s2655_s28 + $0x150] sm:$0xff] %v1226_v20  ;;  %1739 = vst [vmem:[%s2655_s28 + $0x158] sm:$0xff] %v1227_v21  ;;  %v229_v16 = vld [vmem:[%s2616_s16 + $0x238] sm:$0xff]  ;;  %v230_v21 = vld [vmem:[%s2616_s16 + $0x240] sm:$0xff] }
  0x75   : > { %1740 = vst [vmem:[%s2655_s28 + $0x160] sm:$0xff] %v1228_v22  ;;  %v1231_v31 = vadd.f32 %v2625_v2, %v718_v23  ;;  %v721_v32 = vmul.f32 %v2623_v1, %v208_v17  ;;  %v722_v33 = vmul.f32 %v2623_v1, %v209_v18  ;;  %v723_v34 = vmul.f32 %v2623_v1, %v210_v19  ;;  %v231_v22 = vld [vmem:[%s2616_s16 + $0x248] sm:$0xff] }
  0x76   : > { %1741 = vst [vmem:[%s2655_s28 + $0x168] sm:$0xff] %v1229_v26  ;;  %1742 = vst [vmem:[%s2655_s28 + $0x170] sm:$0xff] %v1230_v27  ;;  %v1232_v37 = vadd.f32 %v2625_v2, %v719_v28  ;;  %v1233_v38 = vadd.f32 %v2625_v2, %v720_v29  ;;  %v724_v39 = vmul.f32 %v2623_v1, %v211_v24  ;;  %v232_v27 = vld [vmem:[%s2616_s16 + $0x250] sm:$0xff]  ;;  %v233_v28 = vld [vmem:[%s2616_s16 + $0x258] sm:$0xff] }
  0x77   : > { %v725_v40 = vmul.f32 %v2623_v1, %v212_v25  ;;  %1743 = vst [vmem:[%s2655_s28 + $0x178] sm:$0xff] %v1231_v31  ;;  %v1234_v44 = vadd.f32 %v2625_v2, %v721_v32  ;;  %v1235_v45 = vadd.f32 %v2625_v2, %v722_v33  ;;  %v1236_v46 = vadd.f32 %v2625_v2, %v723_v34  ;;  %v234_v29 = vld [vmem:[%s2616_s16 + $0x260] sm:$0xff]  ;;  %v235_v34 = vld [vmem:[%s2616_s16 + $0x268] sm:$0xff] }
  0x78   : > { %v726_v47 = vmul.f32 %v2623_v1, %v213_v30  ;;  %1744 = vst [vmem:[%s2655_s28 + $0x180] sm:$0xff] %v1232_v37  ;;  %1745 = vst [vmem:[%s2655_s28 + $0x188] sm:$0xff] %v1233_v38  ;;  %v1237_v50 = vadd.f32 %v2625_v2, %v724_v39  ;;  %v727_v52 = vmul.f32 %v2623_v1, %v214_v35  ;;  %v236_v35 = vld [vmem:[%s2616_s16 + $0x270] sm:$0xff] }
  0x79   : > { %v1238_v51 = vadd.f32 %v2625_v2, %v725_v40  ;;  %v728_v53 = vmul.f32 %v2623_v1, %v215_v36  ;;  %1746 = vst [vmem:[%s2655_s28 + $0x190] sm:$0xff] %v1234_v44  ;;  %1747 = vst [vmem:[%s2655_s28 + $0x198] sm:$0xff] %v1235_v45  ;;  %v729_v56 = vmul.f32 %v2623_v1, %v216_v41  ;;  %v237_v40 = vld [vmem:[%s2616_s16 + $0x278] sm:$0xff]  ;;  %v238_v45 = vld [vmem:[%s2616_s16 + $0x280] sm:$0xff] }
  0x7a   : > { %1748 = vst [vmem:[%s2655_s28 + $0x1a0] sm:$0xff] %v1236_v46  ;;  %v1239_v55 = vadd.f32 %v2625_v2, %v726_v47  ;;  %v730_v57 = vmul.f32 %v2623_v1, %v217_v42  ;;  %v731_v58 = vmul.f32 %v2623_v1, %v218_v43  ;;  %1749 = vst [vmem:[%s2655_s28 + $0x1a8] sm:$0xff] %v1237_v50  ;;  %v239_v46 = vld [vmem:[%s2616_s16 + $0x288] sm:$0xff] }
  0x7b   : > { %1750 = vst [vmem:[%s2655_s28 + $0x1b0] sm:$0xff] %v1238_v51  ;;  %v1240_v61 = vadd.f32 %v2625_v2, %v727_v52  ;;  %v1241_v62 = vadd.f32 %v2625_v2, %v728_v53  ;;  %v732_v63 = vmul.f32 %v2623_v1, %v219_v48  ;;  %v733_v0 = vmul.f32 %v2623_v1, %v220_v49  ;;  %v240_v51 = vld [vmem:[%s2616_s16 + $0x290] sm:$0xff]  ;;  %v241_v52 = vld [vmem:[%s2616_s16 + $0x298] sm:$0xff]  ;;  %v242_v53 = vld [vmem:[%s2616_s16 + $0x2a0] sm:$0xff] }
  0x7c   : > { %1751 = vst [vmem:[%s2655_s28 + $0x1b8] sm:$0xff] %v1239_v55  ;;  %v1242_v6 = vadd.f32 %v2625_v2, %v729_v56  ;;  %v1243_v7 = vadd.f32 %v2625_v2, %v730_v57  ;;  %v1244_v8 = vadd.f32 %v2625_v2, %v731_v58  ;;  %v734_v9 = vmul.f32 %v2623_v1, %v221_v54  ;;  %v243_v58 = vld [vmem:[%s2616_s16 + $0x2a8] sm:$0xff] }
  0x7d   : > { %1752 = vst [vmem:[%s2655_s28 + $0x1c0] sm:$0xff] %v1240_v61  ;;  %1753 = vst [vmem:[%s2655_s28 + $0x1c8] sm:$0xff] %v1241_v62  ;;  %v1245_v12 = vadd.f32 %v2625_v2, %v732_v63  ;;  %v1246_v13 = vadd.f32 %v2625_v2, %v733_v0  ;;  %v735_v14 = vmul.f32 %v2623_v1, %v222_v59  ;;  %v244_v59 = vld [vmem:[%s2616_s16 + $0x2b0] sm:$0xff]  ;;  %v245_v0 = vld [vmem:[%s2616_s16 + $0x2b8] sm:$0xff] }
  0x7e   : > { %v736_v15 = vmul.f32 %v2623_v1, %v223_v60  ;;  %1754 = vst [vmem:[%s2655_s28 + $0x1d0] sm:$0xff] %v1242_v6  ;;  %1755 = vst [vmem:[%s2655_s28 + $0x1d8] sm:$0xff] %v1243_v7  ;;  %v1247_v17 = vadd.f32 %v2625_v2, %v734_v9  ;;  %v737_v18 = vmul.f32 %v2623_v1, %v224_v3  ;;  %v246_v7 = vld [vmem:[%s2616_s16 + $0x2c0] sm:$0xff] }
  0x7f   : > { %1756 = vst [vmem:[%s2655_s28 + $0x1e0] sm:$0xff] %v1244_v8  ;;  %v738_v19 = vmul.f32 %v2623_v1, %v225_v4  ;;  %v739_v20 = vmul.f32 %v2623_v1, %v226_v5  ;;  %1757 = vst [vmem:[%s2655_s28 + $0x1e8] sm:$0xff] %v1245_v12  ;;  %v1248_v23 = vadd.f32 %v2625_v2, %v735_v14  ;;  %v247_v8 = vld [vmem:[%s2616_s16 + $0x2c8] sm:$0xff]  ;;  %v249_v14 = vld [vmem:[%s2616_s16 + $0x2d8] sm:$0xff] }
  0x80   : > { %1758 = vst [vmem:[%s2655_s28 + $0x1f0] sm:$0xff] %v1246_v13  ;;  %v1249_v24 = vadd.f32 %v2625_v2, %v736_v15  ;;  %v740_v25 = vmul.f32 %v2623_v1, %v227_v10  ;;  %v741_v26 = vmul.f32 %v2623_v1, %v228_v11  ;;  %1759 = vst [vmem:[%s2655_s28 + $0x1f8] sm:$0xff] %v1247_v17  ;;  %v248_v13 = vld [vmem:[%s2616_s16 + $0x2d0] sm:$0xff]  ;;  %v250_v15 = vld [vmem:[%s2616_s16 + $0x2e0] sm:$0xff] }
  0x81   : > { %v1250_v30 = vadd.f32 %v2625_v2, %v737_v18  ;;  %v1251_v31 = vadd.f32 %v2625_v2, %v738_v19  ;;  %v1252_v32 = vadd.f32 %v2625_v2, %v739_v20  ;;  %v742_v33 = vmul.f32 %v2623_v1, %v229_v16  ;;  %1760 = vst [vmem:[%s2655_s28 + $0x200] sm:$0xff] %v1248_v23  ;;  %v251_v20 = vld [vmem:[%s2616_s16 + $0x2e8] sm:$0xff] }
  0x82   : > { %1761 = vst [vmem:[%s2655_s28 + $0x208] sm:$0xff] %v1249_v24  ;;  %v1253_v36 = vadd.f32 %v2625_v2, %v740_v25  ;;  %v1254_v37 = vadd.f32 %v2625_v2, %v741_v26  ;;  %v743_v38 = vmul.f32 %v2623_v1, %v230_v21  ;;  %v744_v39 = vmul.f32 %v2623_v1, %v231_v22  ;;  %v252_v21 = vld [vmem:[%s2616_s16 + $0x2f0] sm:$0xff]  ;;  %v253_v26 = vld [vmem:[%s2616_s16 + $0x2f8] sm:$0xff] }
  0x83   : > { %1762 = vst [vmem:[%s2655_s28 + $0x210] sm:$0xff] %v1250_v30  ;;  %1763 = vst [vmem:[%s2655_s28 + $0x218] sm:$0xff] %v1251_v31  ;;  %v1255_v41 = vadd.f32 %v2625_v2, %v742_v33  ;;  %v745_v42 = vmul.f32 %v2623_v1, %v232_v27  ;;  %v746_v43 = vmul.f32 %v2623_v1, %v233_v28  ;;  %v254_v31 = vld [vmem:[%s2616_s16 + $0x300] sm:$0xff] }
  0x84   : > { %1764 = vst [vmem:[%s2655_s28 + $0x220] sm:$0xff] %v1252_v32  ;;  %v747_v44 = vmul.f32 %v2623_v1, %v234_v29  ;;  %1765 = vst [vmem:[%s2655_s28 + $0x228] sm:$0xff] %v1253_v36  ;;  %v1256_v47 = vadd.f32 %v2625_v2, %v743_v38  ;;  %v1257_v48 = vadd.f32 %v2625_v2, %v744_v39  ;;  %v255_v32 = vld [vmem:[%s2616_s16 + $0x308] sm:$0xff]  ;;  %v257_v38 = vld [vmem:[%s2616_s16 + $0x318] sm:$0xff] }
  0x85   : > { %1766 = vst [vmem:[%s2655_s28 + $0x230] sm:$0xff] %v1254_v37  ;;  %v748_v49 = vmul.f32 %v2623_v1, %v235_v34  ;;  %v749_v50 = vmul.f32 %v2623_v1, %v236_v35  ;;  %1767 = vst [vmem:[%s2655_s28 + $0x238] sm:$0xff] %v1255_v41  ;;  %v1258_v54 = vadd.f32 %v2625_v2, %v745_v42  ;;  %v256_v37 = vld [vmem:[%s2616_s16 + $0x310] sm:$0xff]  ;;  %v258_v39 = vld [vmem:[%s2616_s16 + $0x320] sm:$0xff] }
  0x86   : > { %v1259_v55 = vadd.f32 %v2625_v2, %v746_v43  ;;  %v1260_v56 = vadd.f32 %v2625_v2, %v747_v44  ;;  %v750_v57 = vmul.f32 %v2623_v1, %v237_v40  ;;  %1768 = vst [vmem:[%s2655_s28 + $0x240] sm:$0xff] %v1256_v47  ;;  %1769 = vst [vmem:[%s2655_s28 + $0x248] sm:$0xff] %v1257_v48  ;;  %v259_v44 = vld [vmem:[%s2616_s16 + $0x328] sm:$0xff] }
  0x87   : > { %v1261_v60 = vadd.f32 %v2625_v2, %v748_v49  ;;  %v1262_v61 = vadd.f32 %v2625_v2, %v749_v50  ;;  %v751_v62 = vmul.f32 %v2623_v1, %v238_v45  ;;  %v752_v63 = vmul.f32 %v2623_v1, %v239_v46  ;;  %1770 = vst [vmem:[%s2655_s28 + $0x250] sm:$0xff] %v1258_v54  ;;  %v260_v45 = vld [vmem:[%s2616_s16 + $0x330] sm:$0xff]  ;;  %v261_v50 = vld [vmem:[%s2616_s16 + $0x338] sm:$0xff] }
  0x88   : > { %1771 = vst [vmem:[%s2655_s28 + $0x258] sm:$0xff] %v1259_v55  ;;  %1772 = vst [vmem:[%s2655_s28 + $0x260] sm:$0xff] %v1260_v56  ;;  %v1263_v3 = vadd.f32 %v2625_v2, %v750_v57  ;;  %v753_v4 = vmul.f32 %v2623_v1, %v240_v51  ;;  %v754_v5 = vmul.f32 %v2623_v1, %v241_v52  ;;  %v262_v55 = vld [vmem:[%s2616_s16 + $0x340] sm:$0xff]  ;;  %v263_v56 = vld [vmem:[%s2616_s16 + $0x348] sm:$0xff] }
  0x89   : > { %v755_v6 = vmul.f32 %v2623_v1, %v242_v53  ;;  %1773 = vst [vmem:[%s2655_s28 + $0x268] sm:$0xff] %v1261_v60  ;;  %1774 = vst [vmem:[%s2655_s28 + $0x270] sm:$0xff] %v1262_v61  ;;  %v1264_v9 = vadd.f32 %v2625_v2, %v751_v62  ;;  %v1265_v10 = vadd.f32 %v2625_v2, %v752_v63  ;;  %v264_v61 = vld [vmem:[%s2616_s16 + $0x350] sm:$0xff]  ;;  %v265_v62 = vld [vmem:[%s2616_s16 + $0x358] sm:$0xff] }
  0x8a   : > { %v756_v11 = vmul.f32 %v2623_v1, %v243_v58  ;;  %v757_v12 = vmul.f32 %v2623_v1, %v244_v59  ;;  %1775 = vst [vmem:[%s2655_s28 + $0x278] sm:$0xff] %v1263_v3  ;;  %v1266_v16 = vadd.f32 %v2625_v2, %v753_v4  ;;  %v1267_v17 = vadd.f32 %v2625_v2, %v754_v5  ;;  %v266_v63 = vld [vmem:[%s2616_s16 + $0x360] sm:$0xff] }
  0x8b   : > { %v1268_v18 = vadd.f32 %v2625_v2, %v755_v6  ;;  %v758_v19 = vmul.f32 %v2623_v1, %v245_v0  ;;  %1776 = vst [vmem:[%s2655_s28 + $0x280] sm:$0xff] %v1264_v9  ;;  %1777 = vst [vmem:[%s2655_s28 + $0x288] sm:$0xff] %v1265_v10  ;;  %v759_v24 = vmul.f32 %v2623_v1, %v246_v7  ;;  %v267_v6 = vld [vmem:[%s2616_s16 + $0x368] sm:$0xff]  ;;  %v268_v7 = vld [vmem:[%s2616_s16 + $0x370] sm:$0xff] }
  0x8c   : > { %v1269_v22 = vadd.f32 %v2625_v2, %v756_v11  ;;  %v1270_v23 = vadd.f32 %v2625_v2, %v757_v12  ;;  %v760_v25 = vmul.f32 %v2623_v1, %v247_v8  ;;  %1778 = vst [vmem:[%s2655_s28 + $0x290] sm:$0xff] %v1266_v16  ;;  %1779 = vst [vmem:[%s2655_s28 + $0x298] sm:$0xff] %v1267_v17  ;;  %v269_v12 = vld [vmem:[%s2616_s16 + $0x378] sm:$0xff]  ;;  %v270_v17 = vld [vmem:[%s2616_s16 + $0x380] sm:$0xff] }
  0x8d   : > { %1780 = vst [vmem:[%s2655_s28 + $0x2a0] sm:$0xff] %v1268_v18  ;;  %v1271_v27 = vadd.f32 %v2625_v2, %v758_v19  ;;  %v761_v28 = vmul.f32 %v2623_v1, %v248_v13  ;;  %v762_v29 = vmul.f32 %v2623_v1, %v249_v14  ;;  %v763_v30 = vmul.f32 %v2623_v1, %v250_v15  ;;  %v271_v18 = vld [vmem:[%s2616_s16 + $0x388] sm:$0xff] }
  0x8e   : > { %1781 = vst [vmem:[%s2655_s28 + $0x2a8] sm:$0xff] %v1269_v22  ;;  %1782 = vst [vmem:[%s2655_s28 + $0x2b0] sm:$0xff] %v1270_v23  ;;  %v1272_v33 = vadd.f32 %v2625_v2, %v759_v24  ;;  %v1273_v34 = vadd.f32 %v2625_v2, %v760_v25  ;;  %v764_v35 = vmul.f32 %v2623_v1, %v251_v20  ;;  %v272_v23 = vld [vmem:[%s2616_s16 + $0x390] sm:$0xff]  ;;  %v273_v24 = vld [vmem:[%s2616_s16 + $0x398] sm:$0xff] }
  0x8f   : > { %v765_v36 = vmul.f32 %v2623_v1, %v252_v21  ;;  %1783 = vst [vmem:[%s2655_s28 + $0x2b8] sm:$0xff] %v1271_v27  ;;  %v1274_v40 = vadd.f32 %v2625_v2, %v761_v28  ;;  %v1275_v41 = vadd.f32 %v2625_v2, %v762_v29  ;;  %v1276_v42 = vadd.f32 %v2625_v2, %v763_v30  ;;  %v274_v25 = vld [vmem:[%s2616_s16 + $0x3a0] sm:$0xff]  ;;  %v275_v30 = vld [vmem:[%s2616_s16 + $0x3a8] sm:$0xff] }
  0x90   : > { %v766_v43 = vmul.f32 %v2623_v1, %v253_v26  ;;  %1784 = vst [vmem:[%s2655_s28 + $0x2c0] sm:$0xff] %v1272_v33  ;;  %1785 = vst [vmem:[%s2655_s28 + $0x2c8] sm:$0xff] %v1273_v34  ;;  %v1277_v46 = vadd.f32 %v2625_v2, %v764_v35  ;;  %v767_v48 = vmul.f32 %v2623_v1, %v254_v31  ;;  %v276_v31 = vld [vmem:[%s2616_s16 + $0x3b0] sm:$0xff] }
  0x91   : > { %v1278_v47 = vadd.f32 %v2625_v2, %v765_v36  ;;  %v768_v49 = vmul.f32 %v2623_v1, %v255_v32  ;;  %1786 = vst [vmem:[%s2655_s28 + $0x2d0] sm:$0xff] %v1274_v40  ;;  %1787 = vst [vmem:[%s2655_s28 + $0x2d8] sm:$0xff] %v1275_v41  ;;  %v769_v52 = vmul.f32 %v2623_v1, %v256_v37  ;;  %v277_v36 = vld [vmem:[%s2616_s16 + $0x3b8] sm:$0xff]  ;;  %v278_v41 = vld [vmem:[%s2616_s16 + $0x3c0] sm:$0xff] }
  0x92   : > { %1788 = vst [vmem:[%s2655_s28 + $0x2e0] sm:$0xff] %v1276_v42  ;;  %v1279_v51 = vadd.f32 %v2625_v2, %v766_v43  ;;  %v770_v53 = vmul.f32 %v2623_v1, %v257_v38  ;;  %v771_v54 = vmul.f32 %v2623_v1, %v258_v39  ;;  %1789 = vst [vmem:[%s2655_s28 + $0x2e8] sm:$0xff] %v1277_v46  ;;  %v279_v42 = vld [vmem:[%s2616_s16 + $0x3c8] sm:$0xff] }
  0x93   : > { %1790 = vst [vmem:[%s2655_s28 + $0x2f0] sm:$0xff] %v1278_v47  ;;  %v1280_v57 = vadd.f32 %v2625_v2, %v767_v48  ;;  %v1281_v58 = vadd.f32 %v2625_v2, %v768_v49  ;;  %v772_v59 = vmul.f32 %v2623_v1, %v259_v44  ;;  %v773_v60 = vmul.f32 %v2623_v1, %v260_v45  ;;  %v280_v47 = vld [vmem:[%s2616_s16 + $0x3d0] sm:$0xff]  ;;  %v281_v48 = vld [vmem:[%s2616_s16 + $0x3d8] sm:$0xff]  ;;  %v282_v49 = vld [vmem:[%s2616_s16 + $0x3e0] sm:$0xff] }
  0x94   : > { %1791 = vst [vmem:[%s2655_s28 + $0x2f8] sm:$0xff] %v1279_v51  ;;  %v1282_v0 = vadd.f32 %v2625_v2, %v769_v52  ;;  %v1283_v3 = vadd.f32 %v2625_v2, %v770_v53  ;;  %v1284_v4 = vadd.f32 %v2625_v2, %v771_v54  ;;  %v774_v5 = vmul.f32 %v2623_v1, %v261_v50  ;;  %v283_v54 = vld [vmem:[%s2616_s16 + $0x3e8] sm:$0xff] }
  0x95   : > { %1792 = vst [vmem:[%s2655_s28 + $0x300] sm:$0xff] %v1280_v57  ;;  %1793 = vst [vmem:[%s2655_s28 + $0x308] sm:$0xff] %v1281_v58  ;;  %v1285_v8 = vadd.f32 %v2625_v2, %v772_v59  ;;  %v1286_v9 = vadd.f32 %v2625_v2, %v773_v60  ;;  %v775_v10 = vmul.f32 %v2623_v1, %v262_v55  ;;  %v284_v55 = vld [vmem:[%s2616_s16 + $0x3f0] sm:$0xff]  ;;  %v285_v60 = vld [vmem:[%s2616_s16 + $0x3f8] sm:$0xff] }
  0x96   : > { %v776_v11 = vmul.f32 %v2623_v1, %v263_v56  ;;  %1794 = vst [vmem:[%s2655_s28 + $0x310] sm:$0xff] %v1282_v0  ;;  %1795 = vst [vmem:[%s2655_s28 + $0x318] sm:$0xff] %v1283_v3  ;;  %v1287_v13 = vadd.f32 %v2625_v2, %v774_v5  ;;  %v777_v14 = vmul.f32 %v2623_v1, %v264_v61  ;;  %v286_v3 = vld [vmem:[%s2616_s16 + $0x400] sm:$0xff] }
  0x97   : > { %1796 = vst [vmem:[%s2655_s28 + $0x320] sm:$0xff] %v1284_v4  ;;  %v778_v15 = vmul.f32 %v2623_v1, %v265_v62  ;;  %v779_v16 = vmul.f32 %v2623_v1, %v266_v63  ;;  %1797 = vst [vmem:[%s2655_s28 + $0x328] sm:$0xff] %v1285_v8  ;;  %v1288_v19 = vadd.f32 %v2625_v2, %v775_v10  ;;  %v287_v4 = vld [vmem:[%s2616_s16 + $0x408] sm:$0xff]  ;;  %v289_v10 = vld [vmem:[%s2616_s16 + $0x418] sm:$0xff] }
  0x98   : > { %1798 = vst [vmem:[%s2655_s28 + $0x330] sm:$0xff] %v1286_v9  ;;  %v1289_v20 = vadd.f32 %v2625_v2, %v776_v11  ;;  %v780_v21 = vmul.f32 %v2623_v1, %v267_v6  ;;  %v781_v22 = vmul.f32 %v2623_v1, %v268_v7  ;;  %1799 = vst [vmem:[%s2655_s28 + $0x338] sm:$0xff] %v1287_v13  ;;  %v288_v9 = vld [vmem:[%s2616_s16 + $0x410] sm:$0xff]  ;;  %v290_v11 = vld [vmem:[%s2616_s16 + $0x420] sm:$0xff] }
  0x99   : > { %v1290_v26 = vadd.f32 %v2625_v2, %v777_v14  ;;  %v1291_v27 = vadd.f32 %v2625_v2, %v778_v15  ;;  %v1292_v28 = vadd.f32 %v2625_v2, %v779_v16  ;;  %v782_v29 = vmul.f32 %v2623_v1, %v269_v12  ;;  %1800 = vst [vmem:[%s2655_s28 + $0x340] sm:$0xff] %v1288_v19  ;;  %v291_v16 = vld [vmem:[%s2616_s16 + $0x428] sm:$0xff] }
  0x9a   : > { %1801 = vst [vmem:[%s2655_s28 + $0x348] sm:$0xff] %v1289_v20  ;;  %v1293_v32 = vadd.f32 %v2625_v2, %v780_v21  ;;  %v1294_v33 = vadd.f32 %v2625_v2, %v781_v22  ;;  %v783_v34 = vmul.f32 %v2623_v1, %v270_v17  ;;  %v784_v35 = vmul.f32 %v2623_v1, %v271_v18  ;;  %v292_v17 = vld [vmem:[%s2616_s16 + $0x430] sm:$0xff]  ;;  %v293_v22 = vld [vmem:[%s2616_s16 + $0x438] sm:$0xff] }
  0x9b   : > { %1802 = vst [vmem:[%s2655_s28 + $0x350] sm:$0xff] %v1290_v26  ;;  %1803 = vst [vmem:[%s2655_s28 + $0x358] sm:$0xff] %v1291_v27  ;;  %v1295_v37 = vadd.f32 %v2625_v2, %v782_v29  ;;  %v785_v38 = vmul.f32 %v2623_v1, %v272_v23  ;;  %v786_v39 = vmul.f32 %v2623_v1, %v273_v24  ;;  %v294_v27 = vld [vmem:[%s2616_s16 + $0x440] sm:$0xff] }
  0x9c   : > { %1804 = vst [vmem:[%s2655_s28 + $0x360] sm:$0xff] %v1292_v28  ;;  %v787_v40 = vmul.f32 %v2623_v1, %v274_v25  ;;  %1805 = vst [vmem:[%s2655_s28 + $0x368] sm:$0xff] %v1293_v32  ;;  %v1296_v43 = vadd.f32 %v2625_v2, %v783_v34  ;;  %v1297_v44 = vadd.f32 %v2625_v2, %v784_v35  ;;  %v295_v28 = vld [vmem:[%s2616_s16 + $0x448] sm:$0xff]  ;;  %v297_v34 = vld [vmem:[%s2616_s16 + $0x458] sm:$0xff] }
  0x9d   : > { %1806 = vst [vmem:[%s2655_s28 + $0x370] sm:$0xff] %v1294_v33  ;;  %v788_v45 = vmul.f32 %v2623_v1, %v275_v30  ;;  %v789_v46 = vmul.f32 %v2623_v1, %v276_v31  ;;  %1807 = vst [vmem:[%s2655_s28 + $0x378] sm:$0xff] %v1295_v37  ;;  %v1298_v50 = vadd.f32 %v2625_v2, %v785_v38  ;;  %v296_v33 = vld [vmem:[%s2616_s16 + $0x450] sm:$0xff]  ;;  %v298_v35 = vld [vmem:[%s2616_s16 + $0x460] sm:$0xff] }
  0x9e   : > { %v1299_v51 = vadd.f32 %v2625_v2, %v786_v39  ;;  %v1300_v52 = vadd.f32 %v2625_v2, %v787_v40  ;;  %v790_v53 = vmul.f32 %v2623_v1, %v277_v36  ;;  %1808 = vst [vmem:[%s2655_s28 + $0x380] sm:$0xff] %v1296_v43  ;;  %1809 = vst [vmem:[%s2655_s28 + $0x388] sm:$0xff] %v1297_v44  ;;  %v299_v40 = vld [vmem:[%s2616_s16 + $0x468] sm:$0xff] }
  0x9f   : > { %v1301_v56 = vadd.f32 %v2625_v2, %v788_v45  ;;  %v1302_v57 = vadd.f32 %v2625_v2, %v789_v46  ;;  %v791_v58 = vmul.f32 %v2623_v1, %v278_v41  ;;  %v792_v59 = vmul.f32 %v2623_v1, %v279_v42  ;;  %1810 = vst [vmem:[%s2655_s28 + $0x390] sm:$0xff] %v1298_v50  ;;  %v300_v41 = vld [vmem:[%s2616_s16 + $0x470] sm:$0xff]  ;;  %v301_v46 = vld [vmem:[%s2616_s16 + $0x478] sm:$0xff] }
  0xa0   : > { %1811 = vst [vmem:[%s2655_s28 + $0x398] sm:$0xff] %v1299_v51  ;;  %1812 = vst [vmem:[%s2655_s28 + $0x3a0] sm:$0xff] %v1300_v52  ;;  %v1303_v61 = vadd.f32 %v2625_v2, %v790_v53  ;;  %v793_v62 = vmul.f32 %v2623_v1, %v280_v47  ;;  %v794_v63 = vmul.f32 %v2623_v1, %v281_v48  ;;  %v302_v51 = vld [vmem:[%s2616_s16 + $0x480] sm:$0xff]  ;;  %v303_v52 = vld [vmem:[%s2616_s16 + $0x488] sm:$0xff] }
  0xa1   : > { %v795_v0 = vmul.f32 %v2623_v1, %v282_v49  ;;  %1813 = vst [vmem:[%s2655_s28 + $0x3a8] sm:$0xff] %v1301_v56  ;;  %1814 = vst [vmem:[%s2655_s28 + $0x3b0] sm:$0xff] %v1302_v57  ;;  %v1304_v5 = vadd.f32 %v2625_v2, %v791_v58  ;;  %v1305_v6 = vadd.f32 %v2625_v2, %v792_v59  ;;  %v304_v57 = vld [vmem:[%s2616_s16 + $0x490] sm:$0xff]  ;;  %v305_v58 = vld [vmem:[%s2616_s16 + $0x498] sm:$0xff] }
  0xa2   : > { %v796_v7 = vmul.f32 %v2623_v1, %v283_v54  ;;  %v797_v8 = vmul.f32 %v2623_v1, %v284_v55  ;;  %1815 = vst [vmem:[%s2655_s28 + $0x3b8] sm:$0xff] %v1303_v61  ;;  %v1306_v12 = vadd.f32 %v2625_v2, %v793_v62  ;;  %v1307_v13 = vadd.f32 %v2625_v2, %v794_v63  ;;  %v306_v59 = vld [vmem:[%s2616_s16 + $0x4a0] sm:$0xff] }
  0xa3   : > { %v1308_v14 = vadd.f32 %v2625_v2, %v795_v0  ;;  %v798_v15 = vmul.f32 %v2623_v1, %v285_v60  ;;  %1816 = vst [vmem:[%s2655_s28 + $0x3c0] sm:$0xff] %v1304_v5  ;;  %1817 = vst [vmem:[%s2655_s28 + $0x3c8] sm:$0xff] %v1305_v6  ;;  %v799_v20 = vmul.f32 %v2623_v1, %v286_v3  ;;  %v307_v0 = vld [vmem:[%s2616_s16 + $0x4a8] sm:$0xff]  ;;  %v308_v3 = vld [vmem:[%s2616_s16 + $0x4b0] sm:$0xff] }
  0xa4   : > { %v1309_v18 = vadd.f32 %v2625_v2, %v796_v7  ;;  %v1310_v19 = vadd.f32 %v2625_v2, %v797_v8  ;;  %v800_v21 = vmul.f32 %v2623_v1, %v287_v4  ;;  %1818 = vst [vmem:[%s2655_s28 + $0x3d0] sm:$0xff] %v1306_v12  ;;  %1819 = vst [vmem:[%s2655_s28 + $0x3d8] sm:$0xff] %v1307_v13  ;;  %v309_v8 = vld [vmem:[%s2616_s16 + $0x4b8] sm:$0xff]  ;;  %v310_v13 = vld [vmem:[%s2616_s16 + $0x4c0] sm:$0xff] }
  0xa5   : > { %1820 = vst [vmem:[%s2655_s28 + $0x3e0] sm:$0xff] %v1308_v14  ;;  %v1311_v23 = vadd.f32 %v2625_v2, %v798_v15  ;;  %v801_v24 = vmul.f32 %v2623_v1, %v288_v9  ;;  %v802_v25 = vmul.f32 %v2623_v1, %v289_v10  ;;  %v803_v26 = vmul.f32 %v2623_v1, %v290_v11  ;;  %v311_v14 = vld [vmem:[%s2616_s16 + $0x4c8] sm:$0xff] }
  0xa6   : > { %1821 = vst [vmem:[%s2655_s28 + $0x3e8] sm:$0xff] %v1309_v18  ;;  %1822 = vst [vmem:[%s2655_s28 + $0x3f0] sm:$0xff] %v1310_v19  ;;  %v1312_v29 = vadd.f32 %v2625_v2, %v799_v20  ;;  %v1313_v30 = vadd.f32 %v2625_v2, %v800_v21  ;;  %v804_v31 = vmul.f32 %v2623_v1, %v291_v16  ;;  %v312_v19 = vld [vmem:[%s2616_s16 + $0x4d0] sm:$0xff]  ;;  %v313_v20 = vld [vmem:[%s2616_s16 + $0x4d8] sm:$0xff] }
  0xa7   : > { %v805_v32 = vmul.f32 %v2623_v1, %v292_v17  ;;  %1823 = vst [vmem:[%s2655_s28 + $0x3f8] sm:$0xff] %v1311_v23  ;;  %v1314_v36 = vadd.f32 %v2625_v2, %v801_v24  ;;  %v1315_v37 = vadd.f32 %v2625_v2, %v802_v25  ;;  %v1316_v38 = vadd.f32 %v2625_v2, %v803_v26  ;;  %v314_v21 = vld [vmem:[%s2616_s16 + $0x4e0] sm:$0xff]  ;;  %v315_v26 = vld [vmem:[%s2616_s16 + $0x4e8] sm:$0xff] }
  0xa8   : > { %v806_v39 = vmul.f32 %v2623_v1, %v293_v22  ;;  %1824 = vst [vmem:[%s2655_s28 + $0x400] sm:$0xff] %v1312_v29  ;;  %1825 = vst [vmem:[%s2655_s28 + $0x408] sm:$0xff] %v1313_v30  ;;  %v1317_v42 = vadd.f32 %v2625_v2, %v804_v31  ;;  %v807_v44 = vmul.f32 %v2623_v1, %v294_v27  ;;  %v316_v27 = vld [vmem:[%s2616_s16 + $0x4f0] sm:$0xff] }
  0xa9   : > { %v1318_v43 = vadd.f32 %v2625_v2, %v805_v32  ;;  %v808_v45 = vmul.f32 %v2623_v1, %v295_v28  ;;  %1826 = vst [vmem:[%s2655_s28 + $0x410] sm:$0xff] %v1314_v36  ;;  %1827 = vst [vmem:[%s2655_s28 + $0x418] sm:$0xff] %v1315_v37  ;;  %v809_v48 = vmul.f32 %v2623_v1, %v296_v33  ;;  %v317_v32 = vld [vmem:[%s2616_s16 + $0x4f8] sm:$0xff]  ;;  %v318_v37 = vld [vmem:[%s2616_s16 + $0x500] sm:$0xff] }
  0xaa   : > { %1828 = vst [vmem:[%s2655_s28 + $0x420] sm:$0xff] %v1316_v38  ;;  %v1319_v47 = vadd.f32 %v2625_v2, %v806_v39  ;;  %v810_v49 = vmul.f32 %v2623_v1, %v297_v34  ;;  %v811_v50 = vmul.f32 %v2623_v1, %v298_v35  ;;  %1829 = vst [vmem:[%s2655_s28 + $0x428] sm:$0xff] %v1317_v42  ;;  %v319_v38 = vld [vmem:[%s2616_s16 + $0x508] sm:$0xff] }
  0xab   : > { %1830 = vst [vmem:[%s2655_s28 + $0x430] sm:$0xff] %v1318_v43  ;;  %v1320_v53 = vadd.f32 %v2625_v2, %v807_v44  ;;  %v1321_v54 = vadd.f32 %v2625_v2, %v808_v45  ;;  %v812_v55 = vmul.f32 %v2623_v1, %v299_v40  ;;  %v813_v56 = vmul.f32 %v2623_v1, %v300_v41  ;;  %v320_v43 = vld [vmem:[%s2616_s16 + $0x510] sm:$0xff]  ;;  %v321_v44 = vld [vmem:[%s2616_s16 + $0x518] sm:$0xff]  ;;  %v322_v45 = vld [vmem:[%s2616_s16 + $0x520] sm:$0xff] }
  0xac   : > { %1831 = vst [vmem:[%s2655_s28 + $0x438] sm:$0xff] %v1319_v47  ;;  %v1322_v60 = vadd.f32 %v2625_v2, %v809_v48  ;;  %v1323_v61 = vadd.f32 %v2625_v2, %v810_v49  ;;  %v1324_v62 = vadd.f32 %v2625_v2, %v811_v50  ;;  %v814_v63 = vmul.f32 %v2623_v1, %v301_v46  ;;  %v323_v50 = vld [vmem:[%s2616_s16 + $0x528] sm:$0xff] }
  0xad   : > { %1832 = vst [vmem:[%s2655_s28 + $0x440] sm:$0xff] %v1320_v53  ;;  %1833 = vst [vmem:[%s2655_s28 + $0x448] sm:$0xff] %v1321_v54  ;;  %v1325_v4 = vadd.f32 %v2625_v2, %v812_v55  ;;  %v1326_v5 = vadd.f32 %v2625_v2, %v813_v56  ;;  %v815_v6 = vmul.f32 %v2623_v1, %v302_v51  ;;  %v324_v51 = vld [vmem:[%s2616_s16 + $0x530] sm:$0xff]  ;;  %v325_v56 = vld [vmem:[%s2616_s16 + $0x538] sm:$0xff] }
  0xae   : > { %v816_v7 = vmul.f32 %v2623_v1, %v303_v52  ;;  %1834 = vst [vmem:[%s2655_s28 + $0x450] sm:$0xff] %v1322_v60  ;;  %1835 = vst [vmem:[%s2655_s28 + $0x458] sm:$0xff] %v1323_v61  ;;  %v1327_v9 = vadd.f32 %v2625_v2, %v814_v63  ;;  %v817_v10 = vmul.f32 %v2623_v1, %v304_v57  ;;  %v326_v61 = vld [vmem:[%s2616_s16 + $0x540] sm:$0xff] }
  0xaf   : > { %1836 = vst [vmem:[%s2655_s28 + $0x460] sm:$0xff] %v1324_v62  ;;  %v818_v11 = vmul.f32 %v2623_v1, %v305_v58  ;;  %v819_v12 = vmul.f32 %v2623_v1, %v306_v59  ;;  %1837 = vst [vmem:[%s2655_s28 + $0x468] sm:$0xff] %v1325_v4  ;;  %v1328_v15 = vadd.f32 %v2625_v2, %v815_v6  ;;  %v327_v62 = vld [vmem:[%s2616_s16 + $0x548] sm:$0xff]  ;;  %v329_v6 = vld [vmem:[%s2616_s16 + $0x558] sm:$0xff] }
  0xb0   : > { %1838 = vst [vmem:[%s2655_s28 + $0x470] sm:$0xff] %v1326_v5  ;;  %v1329_v16 = vadd.f32 %v2625_v2, %v816_v7  ;;  %v820_v17 = vmul.f32 %v2623_v1, %v307_v0  ;;  %v821_v18 = vmul.f32 %v2623_v1, %v308_v3  ;;  %1839 = vst [vmem:[%s2655_s28 + $0x478] sm:$0xff] %v1327_v9  ;;  %v328_v5 = vld [vmem:[%s2616_s16 + $0x550] sm:$0xff]  ;;  %v330_v7 = vld [vmem:[%s2616_s16 + $0x560] sm:$0xff] }
  0xb1   : > { %v1330_v22 = vadd.f32 %v2625_v2, %v817_v10  ;;  %v1331_v23 = vadd.f32 %v2625_v2, %v818_v11  ;;  %v1332_v24 = vadd.f32 %v2625_v2, %v819_v12  ;;  %v822_v25 = vmul.f32 %v2623_v1, %v309_v8  ;;  %1840 = vst [vmem:[%s2655_s28 + $0x480] sm:$0xff] %v1328_v15  ;;  %v331_v12 = vld [vmem:[%s2616_s16 + $0x568] sm:$0xff] }
  0xb2   : > { %1841 = vst [vmem:[%s2655_s28 + $0x488] sm:$0xff] %v1329_v16  ;;  %v1333_v28 = vadd.f32 %v2625_v2, %v820_v17  ;;  %v1334_v29 = vadd.f32 %v2625_v2, %v821_v18  ;;  %v823_v30 = vmul.f32 %v2623_v1, %v310_v13  ;;  %v824_v31 = vmul.f32 %v2623_v1, %v311_v14  ;;  %v332_v13 = vld [vmem:[%s2616_s16 + $0x570] sm:$0xff]  ;;  %v333_v18 = vld [vmem:[%s2616_s16 + $0x578] sm:$0xff] }
  0xb3   : > { %1842 = vst [vmem:[%s2655_s28 + $0x490] sm:$0xff] %v1330_v22  ;;  %1843 = vst [vmem:[%s2655_s28 + $0x498] sm:$0xff] %v1331_v23  ;;  %v1335_v33 = vadd.f32 %v2625_v2, %v822_v25  ;;  %v825_v34 = vmul.f32 %v2623_v1, %v312_v19  ;;  %v826_v35 = vmul.f32 %v2623_v1, %v313_v20  ;;  %v334_v23 = vld [vmem:[%s2616_s16 + $0x580] sm:$0xff] }
  0xb4   : > { %1844 = vst [vmem:[%s2655_s28 + $0x4a0] sm:$0xff] %v1332_v24  ;;  %v827_v36 = vmul.f32 %v2623_v1, %v314_v21  ;;  %1845 = vst [vmem:[%s2655_s28 + $0x4a8] sm:$0xff] %v1333_v28  ;;  %v1336_v39 = vadd.f32 %v2625_v2, %v823_v30  ;;  %v1337_v40 = vadd.f32 %v2625_v2, %v824_v31  ;;  %v335_v24 = vld [vmem:[%s2616_s16 + $0x588] sm:$0xff]  ;;  %v337_v30 = vld [vmem:[%s2616_s16 + $0x598] sm:$0xff] }
  0xb5   : > { %1846 = vst [vmem:[%s2655_s28 + $0x4b0] sm:$0xff] %v1334_v29  ;;  %v828_v41 = vmul.f32 %v2623_v1, %v315_v26  ;;  %v829_v42 = vmul.f32 %v2623_v1, %v316_v27  ;;  %1847 = vst [vmem:[%s2655_s28 + $0x4b8] sm:$0xff] %v1335_v33  ;;  %v1338_v46 = vadd.f32 %v2625_v2, %v825_v34  ;;  %v336_v29 = vld [vmem:[%s2616_s16 + $0x590] sm:$0xff]  ;;  %v338_v31 = vld [vmem:[%s2616_s16 + $0x5a0] sm:$0xff] }
  0xb6   : > { %v1339_v47 = vadd.f32 %v2625_v2, %v826_v35  ;;  %v1340_v48 = vadd.f32 %v2625_v2, %v827_v36  ;;  %v830_v49 = vmul.f32 %v2623_v1, %v317_v32  ;;  %1848 = vst [vmem:[%s2655_s28 + $0x4c0] sm:$0xff] %v1336_v39  ;;  %1849 = vst [vmem:[%s2655_s28 + $0x4c8] sm:$0xff] %v1337_v40  ;;  %v339_v36 = vld [vmem:[%s2616_s16 + $0x5a8] sm:$0xff] }
  0xb7   : > { %v1341_v52 = vadd.f32 %v2625_v2, %v828_v41  ;;  %v1342_v53 = vadd.f32 %v2625_v2, %v829_v42  ;;  %v831_v54 = vmul.f32 %v2623_v1, %v318_v37  ;;  %v832_v55 = vmul.f32 %v2623_v1, %v319_v38  ;;  %1850 = vst [vmem:[%s2655_s28 + $0x4d0] sm:$0xff] %v1338_v46  ;;  %v340_v37 = vld [vmem:[%s2616_s16 + $0x5b0] sm:$0xff]  ;;  %v341_v42 = vld [vmem:[%s2616_s16 + $0x5b8] sm:$0xff] }
  0xb8   : > { %1851 = vst [vmem:[%s2655_s28 + $0x4d8] sm:$0xff] %v1339_v47  ;;  %1852 = vst [vmem:[%s2655_s28 + $0x4e0] sm:$0xff] %v1340_v48  ;;  %v1343_v57 = vadd.f32 %v2625_v2, %v830_v49  ;;  %v833_v58 = vmul.f32 %v2623_v1, %v320_v43  ;;  %v834_v59 = vmul.f32 %v2623_v1, %v321_v44  ;;  %v342_v47 = vld [vmem:[%s2616_s16 + $0x5c0] sm:$0xff]  ;;  %v343_v48 = vld [vmem:[%s2616_s16 + $0x5c8] sm:$0xff] }
  0xb9   : > { %v835_v60 = vmul.f32 %v2623_v1, %v322_v45  ;;  %1853 = vst [vmem:[%s2655_s28 + $0x4e8] sm:$0xff] %v1341_v52  ;;  %1854 = vst [vmem:[%s2655_s28 + $0x4f0] sm:$0xff] %v1342_v53  ;;  %v1344_v63 = vadd.f32 %v2625_v2, %v831_v54  ;;  %v1345_v0 = vadd.f32 %v2625_v2, %v832_v55  ;;  %v344_v53 = vld [vmem:[%s2616_s16 + $0x5d0] sm:$0xff]  ;;  %v345_v54 = vld [vmem:[%s2616_s16 + $0x5d8] sm:$0xff] }
  0xba   : > { %v836_v3 = vmul.f32 %v2623_v1, %v323_v50  ;;  %v837_v4 = vmul.f32 %v2623_v1, %v324_v51  ;;  %1855 = vst [vmem:[%s2655_s28 + $0x4f8] sm:$0xff] %v1343_v57  ;;  %v1346_v8 = vadd.f32 %v2625_v2, %v833_v58  ;;  %v1347_v9 = vadd.f32 %v2625_v2, %v834_v59  ;;  %v346_v55 = vld [vmem:[%s2616_s16 + $0x5e0] sm:$0xff] }
  0xbb   : > { %v1348_v10 = vadd.f32 %v2625_v2, %v835_v60  ;;  %v838_v11 = vmul.f32 %v2623_v1, %v325_v56  ;;  %1856 = vst [vmem:[%s2655_s28 + $0x500] sm:$0xff] %v1344_v63  ;;  %1857 = vst [vmem:[%s2655_s28 + $0x508] sm:$0xff] %v1345_v0  ;;  %v839_v16 = vmul.f32 %v2623_v1, %v326_v61  ;;  %v347_v60 = vld [vmem:[%s2616_s16 + $0x5e8] sm:$0xff]  ;;  %v348_v61 = vld [vmem:[%s2616_s16 + $0x5f0] sm:$0xff] }
  0xbc   : > { %v1349_v14 = vadd.f32 %v2625_v2, %v836_v3  ;;  %v1350_v15 = vadd.f32 %v2625_v2, %v837_v4  ;;  %v840_v17 = vmul.f32 %v2623_v1, %v327_v62  ;;  %1858 = vst [vmem:[%s2655_s28 + $0x510] sm:$0xff] %v1346_v8  ;;  %1859 = vst [vmem:[%s2655_s28 + $0x518] sm:$0xff] %v1347_v9  ;;  %v349_v4 = vld [vmem:[%s2616_s16 + $0x5f8] sm:$0xff]  ;;  %v350_v9 = vld [vmem:[%s2616_s16 + $0x600] sm:$0xff] }
  0xbd   : > { %1860 = vst [vmem:[%s2655_s28 + $0x520] sm:$0xff] %v1348_v10  ;;  %v1351_v19 = vadd.f32 %v2625_v2, %v838_v11  ;;  %v841_v20 = vmul.f32 %v2623_v1, %v328_v5  ;;  %v842_v21 = vmul.f32 %v2623_v1, %v329_v6  ;;  %v843_v22 = vmul.f32 %v2623_v1, %v330_v7  ;;  %v351_v10 = vld [vmem:[%s2616_s16 + $0x608] sm:$0xff] }
  0xbe   : > { %1861 = vst [vmem:[%s2655_s28 + $0x528] sm:$0xff] %v1349_v14  ;;  %1862 = vst [vmem:[%s2655_s28 + $0x530] sm:$0xff] %v1350_v15  ;;  %v1352_v25 = vadd.f32 %v2625_v2, %v839_v16  ;;  %v1353_v26 = vadd.f32 %v2625_v2, %v840_v17  ;;  %v844_v27 = vmul.f32 %v2623_v1, %v331_v12  ;;  %v352_v15 = vld [vmem:[%s2616_s16 + $0x610] sm:$0xff]  ;;  %v353_v16 = vld [vmem:[%s2616_s16 + $0x618] sm:$0xff] }
  0xbf   : > { %v845_v28 = vmul.f32 %v2623_v1, %v332_v13  ;;  %1863 = vst [vmem:[%s2655_s28 + $0x538] sm:$0xff] %v1351_v19  ;;  %v1354_v32 = vadd.f32 %v2625_v2, %v841_v20  ;;  %v1355_v33 = vadd.f32 %v2625_v2, %v842_v21  ;;  %v1356_v34 = vadd.f32 %v2625_v2, %v843_v22  ;;  %v354_v17 = vld [vmem:[%s2616_s16 + $0x620] sm:$0xff]  ;;  %v355_v22 = vld [vmem:[%s2616_s16 + $0x628] sm:$0xff] }
  0xc0   : > { %v846_v35 = vmul.f32 %v2623_v1, %v333_v18  ;;  %1864 = vst [vmem:[%s2655_s28 + $0x540] sm:$0xff] %v1352_v25  ;;  %1865 = vst [vmem:[%s2655_s28 + $0x548] sm:$0xff] %v1353_v26  ;;  %v1357_v38 = vadd.f32 %v2625_v2, %v844_v27  ;;  %v847_v40 = vmul.f32 %v2623_v1, %v334_v23  ;;  %v356_v23 = vld [vmem:[%s2616_s16 + $0x630] sm:$0xff] }
  0xc1   : > { %v1358_v39 = vadd.f32 %v2625_v2, %v845_v28  ;;  %v848_v41 = vmul.f32 %v2623_v1, %v335_v24  ;;  %1866 = vst [vmem:[%s2655_s28 + $0x550] sm:$0xff] %v1354_v32  ;;  %1867 = vst [vmem:[%s2655_s28 + $0x558] sm:$0xff] %v1355_v33  ;;  %v849_v44 = vmul.f32 %v2623_v1, %v336_v29  ;;  %v357_v28 = vld [vmem:[%s2616_s16 + $0x638] sm:$0xff]  ;;  %v358_v33 = vld [vmem:[%s2616_s16 + $0x640] sm:$0xff] }
  0xc2   : > { %1868 = vst [vmem:[%s2655_s28 + $0x560] sm:$0xff] %v1356_v34  ;;  %v1359_v43 = vadd.f32 %v2625_v2, %v846_v35  ;;  %v850_v45 = vmul.f32 %v2623_v1, %v337_v30  ;;  %v851_v46 = vmul.f32 %v2623_v1, %v338_v31  ;;  %1869 = vst [vmem:[%s2655_s28 + $0x568] sm:$0xff] %v1357_v38  ;;  %v359_v34 = vld [vmem:[%s2616_s16 + $0x648] sm:$0xff] }
  0xc3   : > { %1870 = vst [vmem:[%s2655_s28 + $0x570] sm:$0xff] %v1358_v39  ;;  %v1360_v49 = vadd.f32 %v2625_v2, %v847_v40  ;;  %v1361_v50 = vadd.f32 %v2625_v2, %v848_v41  ;;  %v852_v51 = vmul.f32 %v2623_v1, %v339_v36  ;;  %v853_v52 = vmul.f32 %v2623_v1, %v340_v37  ;;  %v360_v39 = vld [vmem:[%s2616_s16 + $0x650] sm:$0xff]  ;;  %v361_v40 = vld [vmem:[%s2616_s16 + $0x658] sm:$0xff]  ;;  %v362_v41 = vld [vmem:[%s2616_s16 + $0x660] sm:$0xff] }
  0xc4   : > { %1871 = vst [vmem:[%s2655_s28 + $0x578] sm:$0xff] %v1359_v43  ;;  %v1362_v56 = vadd.f32 %v2625_v2, %v849_v44  ;;  %v1363_v57 = vadd.f32 %v2625_v2, %v850_v45  ;;  %v1364_v58 = vadd.f32 %v2625_v2, %v851_v46  ;;  %v854_v59 = vmul.f32 %v2623_v1, %v341_v42  ;;  %v363_v46 = vld [vmem:[%s2616_s16 + $0x668] sm:$0xff] }
  0xc5   : > { %1872 = vst [vmem:[%s2655_s28 + $0x580] sm:$0xff] %v1360_v49  ;;  %1873 = vst [vmem:[%s2655_s28 + $0x588] sm:$0xff] %v1361_v50  ;;  %v1365_v62 = vadd.f32 %v2625_v2, %v852_v51  ;;  %v1366_v63 = vadd.f32 %v2625_v2, %v853_v52  ;;  %v855_v0 = vmul.f32 %v2623_v1, %v342_v47  ;;  %v364_v47 = vld [vmem:[%s2616_s16 + $0x670] sm:$0xff]  ;;  %v365_v52 = vld [vmem:[%s2616_s16 + $0x678] sm:$0xff] }
  0xc6   : > { %v856_v3 = vmul.f32 %v2623_v1, %v343_v48  ;;  %1874 = vst [vmem:[%s2655_s28 + $0x590] sm:$0xff] %v1362_v56  ;;  %1875 = vst [vmem:[%s2655_s28 + $0x598] sm:$0xff] %v1363_v57  ;;  %v1367_v5 = vadd.f32 %v2625_v2, %v854_v59  ;;  %v857_v6 = vmul.f32 %v2623_v1, %v344_v53  ;;  %v366_v57 = vld [vmem:[%s2616_s16 + $0x680] sm:$0xff] }
  0xc7   : > { %1876 = vst [vmem:[%s2655_s28 + $0x5a0] sm:$0xff] %v1364_v58  ;;  %v858_v7 = vmul.f32 %v2623_v1, %v345_v54  ;;  %v859_v8 = vmul.f32 %v2623_v1, %v346_v55  ;;  %1877 = vst [vmem:[%s2655_s28 + $0x5a8] sm:$0xff] %v1365_v62  ;;  %v1368_v11 = vadd.f32 %v2625_v2, %v855_v0  ;;  %v367_v58 = vld [vmem:[%s2616_s16 + $0x688] sm:$0xff]  ;;  %v369_v0 = vld [vmem:[%s2616_s16 + $0x698] sm:$0xff] }
  0xc8   : > { %1878 = vst [vmem:[%s2655_s28 + $0x5b0] sm:$0xff] %v1366_v63  ;;  %v1369_v12 = vadd.f32 %v2625_v2, %v856_v3  ;;  %v860_v13 = vmul.f32 %v2623_v1, %v347_v60  ;;  %v861_v14 = vmul.f32 %v2623_v1, %v348_v61  ;;  %1879 = vst [vmem:[%s2655_s28 + $0x5b8] sm:$0xff] %v1367_v5  ;;  %v368_v63 = vld [vmem:[%s2616_s16 + $0x690] sm:$0xff]  ;;  %v370_v3 = vld [vmem:[%s2616_s16 + $0x6a0] sm:$0xff] }
  0xc9   : > { %v1370_v18 = vadd.f32 %v2625_v2, %v857_v6  ;;  %v1371_v19 = vadd.f32 %v2625_v2, %v858_v7  ;;  %v1372_v20 = vadd.f32 %v2625_v2, %v859_v8  ;;  %v862_v21 = vmul.f32 %v2623_v1, %v349_v4  ;;  %1880 = vst [vmem:[%s2655_s28 + $0x5c0] sm:$0xff] %v1368_v11  ;;  %v371_v8 = vld [vmem:[%s2616_s16 + $0x6a8] sm:$0xff] }
  0xca   : > { %1881 = vst [vmem:[%s2655_s28 + $0x5c8] sm:$0xff] %v1369_v12  ;;  %v1373_v24 = vadd.f32 %v2625_v2, %v860_v13  ;;  %v1374_v25 = vadd.f32 %v2625_v2, %v861_v14  ;;  %v863_v26 = vmul.f32 %v2623_v1, %v350_v9  ;;  %v864_v27 = vmul.f32 %v2623_v1, %v351_v10  ;;  %v372_v9 = vld [vmem:[%s2616_s16 + $0x6b0] sm:$0xff]  ;;  %v373_v14 = vld [vmem:[%s2616_s16 + $0x6b8] sm:$0xff] }
  0xcb   : > { %1882 = vst [vmem:[%s2655_s28 + $0x5d0] sm:$0xff] %v1370_v18  ;;  %1883 = vst [vmem:[%s2655_s28 + $0x5d8] sm:$0xff] %v1371_v19  ;;  %v1375_v29 = vadd.f32 %v2625_v2, %v862_v21  ;;  %v865_v30 = vmul.f32 %v2623_v1, %v352_v15  ;;  %v866_v31 = vmul.f32 %v2623_v1, %v353_v16  ;;  %v374_v19 = vld [vmem:[%s2616_s16 + $0x6c0] sm:$0xff] }
  0xcc   : > { %1884 = vst [vmem:[%s2655_s28 + $0x5e0] sm:$0xff] %v1372_v20  ;;  %v867_v32 = vmul.f32 %v2623_v1, %v354_v17  ;;  %1885 = vst [vmem:[%s2655_s28 + $0x5e8] sm:$0xff] %v1373_v24  ;;  %v1376_v35 = vadd.f32 %v2625_v2, %v863_v26  ;;  %v1377_v36 = vadd.f32 %v2625_v2, %v864_v27  ;;  %v375_v20 = vld [vmem:[%s2616_s16 + $0x6c8] sm:$0xff]  ;;  %v377_v26 = vld [vmem:[%s2616_s16 + $0x6d8] sm:$0xff] }
  0xcd   : > { %1886 = vst [vmem:[%s2655_s28 + $0x5f0] sm:$0xff] %v1374_v25  ;;  %v868_v37 = vmul.f32 %v2623_v1, %v355_v22  ;;  %v869_v38 = vmul.f32 %v2623_v1, %v356_v23  ;;  %1887 = vst [vmem:[%s2655_s28 + $0x5f8] sm:$0xff] %v1375_v29  ;;  %v1378_v42 = vadd.f32 %v2625_v2, %v865_v30  ;;  %v376_v25 = vld [vmem:[%s2616_s16 + $0x6d0] sm:$0xff]  ;;  %v378_v27 = vld [vmem:[%s2616_s16 + $0x6e0] sm:$0xff] }
  0xce   : > { %v1379_v43 = vadd.f32 %v2625_v2, %v866_v31  ;;  %v1380_v44 = vadd.f32 %v2625_v2, %v867_v32  ;;  %v870_v45 = vmul.f32 %v2623_v1, %v357_v28  ;;  %1888 = vst [vmem:[%s2655_s28 + $0x600] sm:$0xff] %v1376_v35  ;;  %1889 = vst [vmem:[%s2655_s28 + $0x608] sm:$0xff] %v1377_v36  ;;  %v379_v32 = vld [vmem:[%s2616_s16 + $0x6e8] sm:$0xff] }
  0xcf   : > { %v1381_v48 = vadd.f32 %v2625_v2, %v868_v37  ;;  %v1382_v49 = vadd.f32 %v2625_v2, %v869_v38  ;;  %v871_v50 = vmul.f32 %v2623_v1, %v358_v33  ;;  %v872_v51 = vmul.f32 %v2623_v1, %v359_v34  ;;  %1890 = vst [vmem:[%s2655_s28 + $0x610] sm:$0xff] %v1378_v42  ;;  %v380_v33 = vld [vmem:[%s2616_s16 + $0x6f0] sm:$0xff]  ;;  %v381_v38 = vld [vmem:[%s2616_s16 + $0x6f8] sm:$0xff] }
  0xd0   : > { %1891 = vst [vmem:[%s2655_s28 + $0x618] sm:$0xff] %v1379_v43  ;;  %1892 = vst [vmem:[%s2655_s28 + $0x620] sm:$0xff] %v1380_v44  ;;  %v1383_v53 = vadd.f32 %v2625_v2, %v870_v45  ;;  %v873_v54 = vmul.f32 %v2623_v1, %v360_v39  ;;  %v874_v55 = vmul.f32 %v2623_v1, %v361_v40  ;;  %v382_v43 = vld [vmem:[%s2616_s16 + $0x700] sm:$0xff]  ;;  %v383_v44 = vld [vmem:[%s2616_s16 + $0x708] sm:$0xff] }
  0xd1   : > { %v875_v56 = vmul.f32 %v2623_v1, %v362_v41  ;;  %1893 = vst [vmem:[%s2655_s28 + $0x628] sm:$0xff] %v1381_v48  ;;  %1894 = vst [vmem:[%s2655_s28 + $0x630] sm:$0xff] %v1382_v49  ;;  %v1384_v59 = vadd.f32 %v2625_v2, %v871_v50  ;;  %v1385_v60 = vadd.f32 %v2625_v2, %v872_v51  ;;  %v384_v49 = vld [vmem:[%s2616_s16 + $0x710] sm:$0xff]  ;;  %v385_v50 = vld [vmem:[%s2616_s16 + $0x718] sm:$0xff] }
  0xd2   : > { %v876_v61 = vmul.f32 %v2623_v1, %v363_v46  ;;  %v877_v62 = vmul.f32 %v2623_v1, %v364_v47  ;;  %1895 = vst [vmem:[%s2655_s28 + $0x638] sm:$0xff] %v1383_v53  ;;  %v1386_v4 = vadd.f32 %v2625_v2, %v873_v54  ;;  %v1387_v5 = vadd.f32 %v2625_v2, %v874_v55  ;;  %v386_v51 = vld [vmem:[%s2616_s16 + $0x720] sm:$0xff] }
  0xd3   : > { %v1388_v6 = vadd.f32 %v2625_v2, %v875_v56  ;;  %v878_v7 = vmul.f32 %v2623_v1, %v365_v52  ;;  %1896 = vst [vmem:[%s2655_s28 + $0x640] sm:$0xff] %v1384_v59  ;;  %1897 = vst [vmem:[%s2655_s28 + $0x648] sm:$0xff] %v1385_v60  ;;  %v879_v12 = vmul.f32 %v2623_v1, %v366_v57  ;;  %v387_v56 = vld [vmem:[%s2616_s16 + $0x728] sm:$0xff]  ;;  %v388_v57 = vld [vmem:[%s2616_s16 + $0x730] sm:$0xff] }
  0xd4   : > { %v1389_v10 = vadd.f32 %v2625_v2, %v876_v61  ;;  %v1390_v11 = vadd.f32 %v2625_v2, %v877_v62  ;;  %v880_v13 = vmul.f32 %v2623_v1, %v367_v58  ;;  %1898 = vst [vmem:[%s2655_s28 + $0x650] sm:$0xff] %v1386_v4  ;;  %1899 = vst [vmem:[%s2655_s28 + $0x658] sm:$0xff] %v1387_v5  ;;  %v389_v62 = vld [vmem:[%s2616_s16 + $0x738] sm:$0xff]  ;;  %v390_v5 = vld [vmem:[%s2616_s16 + $0x740] sm:$0xff] }
  0xd5   : > { %1900 = vst [vmem:[%s2655_s28 + $0x660] sm:$0xff] %v1388_v6  ;;  %v1391_v15 = vadd.f32 %v2625_v2, %v878_v7  ;;  %v881_v16 = vmul.f32 %v2623_v1, %v368_v63  ;;  %v882_v17 = vmul.f32 %v2623_v1, %v369_v0  ;;  %v883_v18 = vmul.f32 %v2623_v1, %v370_v3  ;;  %v391_v6 = vld [vmem:[%s2616_s16 + $0x748] sm:$0xff] }
  0xd6   : > { %1901 = vst [vmem:[%s2655_s28 + $0x668] sm:$0xff] %v1389_v10  ;;  %1902 = vst [vmem:[%s2655_s28 + $0x670] sm:$0xff] %v1390_v11  ;;  %v1392_v21 = vadd.f32 %v2625_v2, %v879_v12  ;;  %v1393_v22 = vadd.f32 %v2625_v2, %v880_v13  ;;  %v884_v23 = vmul.f32 %v2623_v1, %v371_v8  ;;  %v392_v11 = vld [vmem:[%s2616_s16 + $0x750] sm:$0xff]  ;;  %v393_v12 = vld [vmem:[%s2616_s16 + $0x758] sm:$0xff] }
  0xd7   : > { %v885_v24 = vmul.f32 %v2623_v1, %v372_v9  ;;  %1903 = vst [vmem:[%s2655_s28 + $0x678] sm:$0xff] %v1391_v15  ;;  %v1394_v28 = vadd.f32 %v2625_v2, %v881_v16  ;;  %v1395_v29 = vadd.f32 %v2625_v2, %v882_v17  ;;  %v1396_v30 = vadd.f32 %v2625_v2, %v883_v18  ;;  %v394_v13 = vld [vmem:[%s2616_s16 + $0x760] sm:$0xff]  ;;  %v395_v18 = vld [vmem:[%s2616_s16 + $0x768] sm:$0xff] }
  0xd8   : > { %v886_v31 = vmul.f32 %v2623_v1, %v373_v14  ;;  %1904 = vst [vmem:[%s2655_s28 + $0x680] sm:$0xff] %v1392_v21  ;;  %1905 = vst [vmem:[%s2655_s28 + $0x688] sm:$0xff] %v1393_v22  ;;  %v1397_v34 = vadd.f32 %v2625_v2, %v884_v23  ;;  %v887_v36 = vmul.f32 %v2623_v1, %v374_v19  ;;  %v396_v19 = vld [vmem:[%s2616_s16 + $0x770] sm:$0xff] }
  0xd9   : > { %v1398_v35 = vadd.f32 %v2625_v2, %v885_v24  ;;  %v888_v37 = vmul.f32 %v2623_v1, %v375_v20  ;;  %1906 = vst [vmem:[%s2655_s28 + $0x690] sm:$0xff] %v1394_v28  ;;  %1907 = vst [vmem:[%s2655_s28 + $0x698] sm:$0xff] %v1395_v29  ;;  %v889_v40 = vmul.f32 %v2623_v1, %v376_v25  ;;  %v397_v24 = vld [vmem:[%s2616_s16 + $0x778] sm:$0xff]  ;;  %v398_v29 = vld [vmem:[%s2616_s16 + $0x780] sm:$0xff] }
  0xda   : > { %1908 = vst [vmem:[%s2655_s28 + $0x6a0] sm:$0xff] %v1396_v30  ;;  %v1399_v39 = vadd.f32 %v2625_v2, %v886_v31  ;;  %v890_v41 = vmul.f32 %v2623_v1, %v377_v26  ;;  %v891_v42 = vmul.f32 %v2623_v1, %v378_v27  ;;  %1909 = vst [vmem:[%s2655_s28 + $0x6a8] sm:$0xff] %v1397_v34  ;;  %v399_v30 = vld [vmem:[%s2616_s16 + $0x788] sm:$0xff] }
  0xdb   : > { %1910 = vst [vmem:[%s2655_s28 + $0x6b0] sm:$0xff] %v1398_v35  ;;  %v1400_v45 = vadd.f32 %v2625_v2, %v887_v36  ;;  %v1401_v46 = vadd.f32 %v2625_v2, %v888_v37  ;;  %v892_v47 = vmul.f32 %v2623_v1, %v379_v32  ;;  %v893_v48 = vmul.f32 %v2623_v1, %v380_v33  ;;  %v400_v35 = vld [vmem:[%s2616_s16 + $0x790] sm:$0xff]  ;;  %v401_v36 = vld [vmem:[%s2616_s16 + $0x798] sm:$0xff]  ;;  %v402_v37 = vld [vmem:[%s2616_s16 + $0x7a0] sm:$0xff] }
  0xdc   : > { %1911 = vst [vmem:[%s2655_s28 + $0x6b8] sm:$0xff] %v1399_v39  ;;  %v1402_v52 = vadd.f32 %v2625_v2, %v889_v40  ;;  %v1403_v53 = vadd.f32 %v2625_v2, %v890_v41  ;;  %v1404_v54 = vadd.f32 %v2625_v2, %v891_v42  ;;  %v894_v55 = vmul.f32 %v2623_v1, %v381_v38  ;;  %v403_v42 = vld [vmem:[%s2616_s16 + $0x7a8] sm:$0xff] }
  0xdd   : > { %1912 = vst [vmem:[%s2655_s28 + $0x6c0] sm:$0xff] %v1400_v45  ;;  %1913 = vst [vmem:[%s2655_s28 + $0x6c8] sm:$0xff] %v1401_v46  ;;  %v1405_v58 = vadd.f32 %v2625_v2, %v892_v47  ;;  %v1406_v59 = vadd.f32 %v2625_v2, %v893_v48  ;;  %v895_v60 = vmul.f32 %v2623_v1, %v382_v43  ;;  %v404_v43 = vld [vmem:[%s2616_s16 + $0x7b0] sm:$0xff]  ;;  %v405_v48 = vld [vmem:[%s2616_s16 + $0x7b8] sm:$0xff] }
  0xde   : > { %v896_v61 = vmul.f32 %v2623_v1, %v383_v44  ;;  %1914 = vst [vmem:[%s2655_s28 + $0x6d0] sm:$0xff] %v1402_v52  ;;  %1915 = vst [vmem:[%s2655_s28 + $0x6d8] sm:$0xff] %v1403_v53  ;;  %v1407_v63 = vadd.f32 %v2625_v2, %v894_v55  ;;  %v897_v0 = vmul.f32 %v2623_v1, %v384_v49  ;;  %v406_v53 = vld [vmem:[%s2616_s16 + $0x7c0] sm:$0xff] }
  0xdf   : > { %1916 = vst [vmem:[%s2655_s28 + $0x6e0] sm:$0xff] %v1404_v54  ;;  %v898_v3 = vmul.f32 %v2623_v1, %v385_v50  ;;  %v899_v4 = vmul.f32 %v2623_v1, %v386_v51  ;;  %1917 = vst [vmem:[%s2655_s28 + $0x6e8] sm:$0xff] %v1405_v58  ;;  %v1408_v7 = vadd.f32 %v2625_v2, %v895_v60  ;;  %v407_v54 = vld [vmem:[%s2616_s16 + $0x7c8] sm:$0xff]  ;;  %v409_v60 = vld [vmem:[%s2616_s16 + $0x7d8] sm:$0xff] }
  0xe0   : > { %1918 = vst [vmem:[%s2655_s28 + $0x6f0] sm:$0xff] %v1406_v59  ;;  %v1409_v8 = vadd.f32 %v2625_v2, %v896_v61  ;;  %v900_v9 = vmul.f32 %v2623_v1, %v387_v56  ;;  %v901_v10 = vmul.f32 %v2623_v1, %v388_v57  ;;  %1919 = vst [vmem:[%s2655_s28 + $0x6f8] sm:$0xff] %v1407_v63  ;;  %v408_v59 = vld [vmem:[%s2616_s16 + $0x7d0] sm:$0xff]  ;;  %v410_v61 = vld [vmem:[%s2616_s16 + $0x7e0] sm:$0xff] }
  0xe1   : > { %v1410_v14 = vadd.f32 %v2625_v2, %v897_v0  ;;  %v1411_v15 = vadd.f32 %v2625_v2, %v898_v3  ;;  %v1412_v16 = vadd.f32 %v2625_v2, %v899_v4  ;;  %v902_v17 = vmul.f32 %v2623_v1, %v389_v62  ;;  %1920 = vst [vmem:[%s2655_s28 + $0x700] sm:$0xff] %v1408_v7  ;;  %v411_v4 = vld [vmem:[%s2616_s16 + $0x7e8] sm:$0xff] }
  0xe2   : > { %1921 = vst [vmem:[%s2655_s28 + $0x708] sm:$0xff] %v1409_v8  ;;  %v1413_v20 = vadd.f32 %v2625_v2, %v900_v9  ;;  %v1414_v21 = vadd.f32 %v2625_v2, %v901_v10  ;;  %v903_v22 = vmul.f32 %v2623_v1, %v390_v5  ;;  %v904_v23 = vmul.f32 %v2623_v1, %v391_v6  ;;  %v412_v5 = vld [vmem:[%s2616_s16 + $0x7f0] sm:$0xff]  ;;  %v413_v10 = vld [vmem:[%s2616_s16 + $0x7f8] sm:$0xff] }
  0xe3   : > { %1922 = vst [vmem:[%s2655_s28 + $0x710] sm:$0xff] %v1410_v14  ;;  %1923 = vst [vmem:[%s2655_s28 + $0x718] sm:$0xff] %v1411_v15  ;;  %v1415_v25 = vadd.f32 %v2625_v2, %v902_v17  ;;  %v905_v26 = vmul.f32 %v2623_v1, %v392_v11  ;;  %v906_v27 = vmul.f32 %v2623_v1, %v393_v12  ;;  %v414_v15 = vld [vmem:[%s2616_s16 + $0x800] sm:$0xff] }
  0xe4   : > { %1924 = vst [vmem:[%s2655_s28 + $0x720] sm:$0xff] %v1412_v16  ;;  %v907_v28 = vmul.f32 %v2623_v1, %v394_v13  ;;  %1925 = vst [vmem:[%s2655_s28 + $0x728] sm:$0xff] %v1413_v20  ;;  %v1416_v31 = vadd.f32 %v2625_v2, %v903_v22  ;;  %v1417_v32 = vadd.f32 %v2625_v2, %v904_v23  ;;  %v415_v16 = vld [vmem:[%s2616_s16 + $0x808] sm:$0xff]  ;;  %v417_v22 = vld [vmem:[%s2616_s16 + $0x818] sm:$0xff] }
  0xe5   : > { %1926 = vst [vmem:[%s2655_s28 + $0x730] sm:$0xff] %v1414_v21  ;;  %v908_v33 = vmul.f32 %v2623_v1, %v395_v18  ;;  %v909_v34 = vmul.f32 %v2623_v1, %v396_v19  ;;  %1927 = vst [vmem:[%s2655_s28 + $0x738] sm:$0xff] %v1415_v25  ;;  %v1418_v38 = vadd.f32 %v2625_v2, %v905_v26  ;;  %v416_v21 = vld [vmem:[%s2616_s16 + $0x810] sm:$0xff]  ;;  %v418_v23 = vld [vmem:[%s2616_s16 + $0x820] sm:$0xff] }
  0xe6   : > { %v1419_v39 = vadd.f32 %v2625_v2, %v906_v27  ;;  %v1420_v40 = vadd.f32 %v2625_v2, %v907_v28  ;;  %v910_v41 = vmul.f32 %v2623_v1, %v397_v24  ;;  %1928 = vst [vmem:[%s2655_s28 + $0x740] sm:$0xff] %v1416_v31  ;;  %1929 = vst [vmem:[%s2655_s28 + $0x748] sm:$0xff] %v1417_v32  ;;  %v419_v28 = vld [vmem:[%s2616_s16 + $0x828] sm:$0xff] }
  0xe7   : > { %v1421_v44 = vadd.f32 %v2625_v2, %v908_v33  ;;  %v1422_v45 = vadd.f32 %v2625_v2, %v909_v34  ;;  %v911_v46 = vmul.f32 %v2623_v1, %v398_v29  ;;  %v912_v47 = vmul.f32 %v2623_v1, %v399_v30  ;;  %1930 = vst [vmem:[%s2655_s28 + $0x750] sm:$0xff] %v1418_v38  ;;  %v420_v29 = vld [vmem:[%s2616_s16 + $0x830] sm:$0xff]  ;;  %v421_v34 = vld [vmem:[%s2616_s16 + $0x838] sm:$0xff] }
  0xe8   : > { %1931 = vst [vmem:[%s2655_s28 + $0x758] sm:$0xff] %v1419_v39  ;;  %1932 = vst [vmem:[%s2655_s28 + $0x760] sm:$0xff] %v1420_v40  ;;  %v1423_v49 = vadd.f32 %v2625_v2, %v910_v41  ;;  %v913_v50 = vmul.f32 %v2623_v1, %v400_v35  ;;  %v914_v51 = vmul.f32 %v2623_v1, %v401_v36  ;;  %v422_v39 = vld [vmem:[%s2616_s16 + $0x840] sm:$0xff]  ;;  %v423_v40 = vld [vmem:[%s2616_s16 + $0x848] sm:$0xff] }
  0xe9   : > { %v915_v52 = vmul.f32 %v2623_v1, %v402_v37  ;;  %1933 = vst [vmem:[%s2655_s28 + $0x768] sm:$0xff] %v1421_v44  ;;  %1934 = vst [vmem:[%s2655_s28 + $0x770] sm:$0xff] %v1422_v45  ;;  %v1424_v55 = vadd.f32 %v2625_v2, %v911_v46  ;;  %v1425_v56 = vadd.f32 %v2625_v2, %v912_v47  ;;  %v424_v45 = vld [vmem:[%s2616_s16 + $0x850] sm:$0xff]  ;;  %v425_v46 = vld [vmem:[%s2616_s16 + $0x858] sm:$0xff] }
  0xea   : > { %v916_v57 = vmul.f32 %v2623_v1, %v403_v42  ;;  %v917_v58 = vmul.f32 %v2623_v1, %v404_v43  ;;  %1935 = vst [vmem:[%s2655_s28 + $0x778] sm:$0xff] %v1423_v49  ;;  %v1426_v62 = vadd.f32 %v2625_v2, %v913_v50  ;;  %v1427_v63 = vadd.f32 %v2625_v2, %v914_v51  ;;  %v426_v47 = vld [vmem:[%s2616_s16 + $0x860] sm:$0xff] }
  0xeb   : > { %v1428_v0 = vadd.f32 %v2625_v2, %v915_v52  ;;  %v918_v3 = vmul.f32 %v2623_v1, %v405_v48  ;;  %1936 = vst [vmem:[%s2655_s28 + $0x780] sm:$0xff] %v1424_v55  ;;  %1937 = vst [vmem:[%s2655_s28 + $0x788] sm:$0xff] %v1425_v56  ;;  %v919_v8 = vmul.f32 %v2623_v1, %v406_v53  ;;  %v427_v52 = vld [vmem:[%s2616_s16 + $0x868] sm:$0xff]  ;;  %v428_v53 = vld [vmem:[%s2616_s16 + $0x870] sm:$0xff] }
  0xec   : > { %v1429_v6 = vadd.f32 %v2625_v2, %v916_v57  ;;  %v1430_v7 = vadd.f32 %v2625_v2, %v917_v58  ;;  %v920_v9 = vmul.f32 %v2623_v1, %v407_v54  ;;  %1938 = vst [vmem:[%s2655_s28 + $0x790] sm:$0xff] %v1426_v62  ;;  %1939 = vst [vmem:[%s2655_s28 + $0x798] sm:$0xff] %v1427_v63  ;;  %v429_v58 = vld [vmem:[%s2616_s16 + $0x878] sm:$0xff]  ;;  %v430_v63 = vld [vmem:[%s2616_s16 + $0x880] sm:$0xff] }
  0xed   : > { %1940 = vst [vmem:[%s2655_s28 + $0x7a0] sm:$0xff] %v1428_v0  ;;  %v1431_v11 = vadd.f32 %v2625_v2, %v918_v3  ;;  %v921_v12 = vmul.f32 %v2623_v1, %v408_v59  ;;  %v922_v13 = vmul.f32 %v2623_v1, %v409_v60  ;;  %v923_v14 = vmul.f32 %v2623_v1, %v410_v61  ;;  %v431_v0 = vld [vmem:[%s2616_s16 + $0x888] sm:$0xff] }
  0xee   : > { %1941 = vst [vmem:[%s2655_s28 + $0x7a8] sm:$0xff] %v1429_v6  ;;  %1942 = vst [vmem:[%s2655_s28 + $0x7b0] sm:$0xff] %v1430_v7  ;;  %v1432_v17 = vadd.f32 %v2625_v2, %v919_v8  ;;  %v1433_v18 = vadd.f32 %v2625_v2, %v920_v9  ;;  %v924_v19 = vmul.f32 %v2623_v1, %v411_v4  ;;  %v432_v7 = vld [vmem:[%s2616_s16 + $0x890] sm:$0xff]  ;;  %v433_v8 = vld [vmem:[%s2616_s16 + $0x898] sm:$0xff] }
  0xef   : > { %v925_v20 = vmul.f32 %v2623_v1, %v412_v5  ;;  %1943 = vst [vmem:[%s2655_s28 + $0x7b8] sm:$0xff] %v1431_v11  ;;  %v1434_v24 = vadd.f32 %v2625_v2, %v921_v12  ;;  %v1435_v25 = vadd.f32 %v2625_v2, %v922_v13  ;;  %v1436_v26 = vadd.f32 %v2625_v2, %v923_v14  ;;  %v434_v9 = vld [vmem:[%s2616_s16 + $0x8a0] sm:$0xff]  ;;  %v435_v14 = vld [vmem:[%s2616_s16 + $0x8a8] sm:$0xff] }
  0xf0   : > { %v926_v27 = vmul.f32 %v2623_v1, %v413_v10  ;;  %1944 = vst [vmem:[%s2655_s28 + $0x7c0] sm:$0xff] %v1432_v17  ;;  %1945 = vst [vmem:[%s2655_s28 + $0x7c8] sm:$0xff] %v1433_v18  ;;  %v1437_v30 = vadd.f32 %v2625_v2, %v924_v19  ;;  %v927_v32 = vmul.f32 %v2623_v1, %v414_v15  ;;  %v436_v15 = vld [vmem:[%s2616_s16 + $0x8b0] sm:$0xff] }
  0xf1   : > { %v1438_v31 = vadd.f32 %v2625_v2, %v925_v20  ;;  %v928_v33 = vmul.f32 %v2623_v1, %v415_v16  ;;  %1946 = vst [vmem:[%s2655_s28 + $0x7d0] sm:$0xff] %v1434_v24  ;;  %1947 = vst [vmem:[%s2655_s28 + $0x7d8] sm:$0xff] %v1435_v25  ;;  %v929_v36 = vmul.f32 %v2623_v1, %v416_v21  ;;  %v437_v20 = vld [vmem:[%s2616_s16 + $0x8b8] sm:$0xff]  ;;  %v438_v25 = vld [vmem:[%s2616_s16 + $0x8c0] sm:$0xff] }
  0xf2   : > { %1948 = vst [vmem:[%s2655_s28 + $0x7e0] sm:$0xff] %v1436_v26  ;;  %v1439_v35 = vadd.f32 %v2625_v2, %v926_v27  ;;  %v930_v37 = vmul.f32 %v2623_v1, %v417_v22  ;;  %v931_v38 = vmul.f32 %v2623_v1, %v418_v23  ;;  %1949 = vst [vmem:[%s2655_s28 + $0x7e8] sm:$0xff] %v1437_v30  ;;  %v439_v26 = vld [vmem:[%s2616_s16 + $0x8c8] sm:$0xff] }
  0xf3   : > { %1950 = vst [vmem:[%s2655_s28 + $0x7f0] sm:$0xff] %v1438_v31  ;;  %v1440_v41 = vadd.f32 %v2625_v2, %v927_v32  ;;  %v1441_v42 = vadd.f32 %v2625_v2, %v928_v33  ;;  %v932_v43 = vmul.f32 %v2623_v1, %v419_v28  ;;  %v933_v44 = vmul.f32 %v2623_v1, %v420_v29  ;;  %v440_v31 = vld [vmem:[%s2616_s16 + $0x8d0] sm:$0xff]  ;;  %v441_v32 = vld [vmem:[%s2616_s16 + $0x8d8] sm:$0xff]  ;;  %v442_v33 = vld [vmem:[%s2616_s16 + $0x8e0] sm:$0xff] }
  0xf4   : > { %1951 = vst [vmem:[%s2655_s28 + $0x7f8] sm:$0xff] %v1439_v35  ;;  %v1442_v48 = vadd.f32 %v2625_v2, %v929_v36  ;;  %v1443_v49 = vadd.f32 %v2625_v2, %v930_v37  ;;  %v1444_v50 = vadd.f32 %v2625_v2, %v931_v38  ;;  %v934_v51 = vmul.f32 %v2623_v1, %v421_v34  ;;  %v443_v38 = vld [vmem:[%s2616_s16 + $0x8e8] sm:$0xff] }
  0xf5   : > { %1952 = vst [vmem:[%s2655_s28 + $0x800] sm:$0xff] %v1440_v41  ;;  %1953 = vst [vmem:[%s2655_s28 + $0x808] sm:$0xff] %v1441_v42  ;;  %v1445_v54 = vadd.f32 %v2625_v2, %v932_v43  ;;  %v1446_v55 = vadd.f32 %v2625_v2, %v933_v44  ;;  %v935_v56 = vmul.f32 %v2623_v1, %v422_v39  ;;  %v444_v39 = vld [vmem:[%s2616_s16 + $0x8f0] sm:$0xff]  ;;  %v445_v44 = vld [vmem:[%s2616_s16 + $0x8f8] sm:$0xff] }
  0xf6   : > { %v936_v57 = vmul.f32 %v2623_v1, %v423_v40  ;;  %1954 = vst [vmem:[%s2655_s28 + $0x810] sm:$0xff] %v1442_v48  ;;  %1955 = vst [vmem:[%s2655_s28 + $0x818] sm:$0xff] %v1443_v49  ;;  %v1447_v59 = vadd.f32 %v2625_v2, %v934_v51  ;;  %v937_v60 = vmul.f32 %v2623_v1, %v424_v45  ;;  %v446_v49 = vld [vmem:[%s2616_s16 + $0x900] sm:$0xff] }
  0xf7   : > { %1956 = vst [vmem:[%s2655_s28 + $0x820] sm:$0xff] %v1444_v50  ;;  %v938_v61 = vmul.f32 %v2623_v1, %v425_v46  ;;  %v939_v62 = vmul.f32 %v2623_v1, %v426_v47  ;;  %1957 = vst [vmem:[%s2655_s28 + $0x828] sm:$0xff] %v1445_v54  ;;  %v1448_v3 = vadd.f32 %v2625_v2, %v935_v56  ;;  %v447_v50 = vld [vmem:[%s2616_s16 + $0x908] sm:$0xff]  ;;  %v449_v56 = vld [vmem:[%s2616_s16 + $0x918] sm:$0xff] }
  0xf8   : > { %1958 = vst [vmem:[%s2655_s28 + $0x830] sm:$0xff] %v1446_v55  ;;  %v1449_v4 = vadd.f32 %v2625_v2, %v936_v57  ;;  %v940_v5 = vmul.f32 %v2623_v1, %v427_v52  ;;  %v941_v6 = vmul.f32 %v2623_v1, %v428_v53  ;;  %1959 = vst [vmem:[%s2655_s28 + $0x838] sm:$0xff] %v1447_v59  ;;  %v448_v55 = vld [vmem:[%s2616_s16 + $0x910] sm:$0xff]  ;;  %v450_v57 = vld [vmem:[%s2616_s16 + $0x920] sm:$0xff] }
  0xf9   : > { %v1450_v10 = vadd.f32 %v2625_v2, %v937_v60  ;;  %v1451_v11 = vadd.f32 %v2625_v2, %v938_v61  ;;  %v1452_v12 = vadd.f32 %v2625_v2, %v939_v62  ;;  %v942_v13 = vmul.f32 %v2623_v1, %v429_v58  ;;  %1960 = vst [vmem:[%s2655_s28 + $0x840] sm:$0xff] %v1448_v3  ;;  %v451_v62 = vld [vmem:[%s2616_s16 + $0x928] sm:$0xff] }
  0xfa   : > { %1961 = vst [vmem:[%s2655_s28 + $0x848] sm:$0xff] %v1449_v4  ;;  %v1453_v16 = vadd.f32 %v2625_v2, %v940_v5  ;;  %v1454_v17 = vadd.f32 %v2625_v2, %v941_v6  ;;  %v943_v18 = vmul.f32 %v2623_v1, %v430_v63  ;;  %v944_v19 = vmul.f32 %v2623_v1, %v431_v0  ;;  %v452_v63 = vld [vmem:[%s2616_s16 + $0x930] sm:$0xff]  ;;  %v453_v6 = vld [vmem:[%s2616_s16 + $0x938] sm:$0xff] }
  0xfb   : > { %1962 = vst [vmem:[%s2655_s28 + $0x850] sm:$0xff] %v1450_v10  ;;  %1963 = vst [vmem:[%s2655_s28 + $0x858] sm:$0xff] %v1451_v11  ;;  %v1455_v21 = vadd.f32 %v2625_v2, %v942_v13  ;;  %v945_v22 = vmul.f32 %v2623_v1, %v432_v7  ;;  %v946_v23 = vmul.f32 %v2623_v1, %v433_v8  ;;  %v454_v11 = vld [vmem:[%s2616_s16 + $0x940] sm:$0xff] }
  0xfc   : > { %1964 = vst [vmem:[%s2655_s28 + $0x860] sm:$0xff] %v1452_v12  ;;  %v947_v24 = vmul.f32 %v2623_v1, %v434_v9  ;;  %1965 = vst [vmem:[%s2655_s28 + $0x868] sm:$0xff] %v1453_v16  ;;  %v1456_v27 = vadd.f32 %v2625_v2, %v943_v18  ;;  %v1457_v28 = vadd.f32 %v2625_v2, %v944_v19  ;;  %v455_v12 = vld [vmem:[%s2616_s16 + $0x948] sm:$0xff]  ;;  %v457_v18 = vld [vmem:[%s2616_s16 + $0x958] sm:$0xff] }
  0xfd   : > { %1966 = vst [vmem:[%s2655_s28 + $0x870] sm:$0xff] %v1454_v17  ;;  %v948_v29 = vmul.f32 %v2623_v1, %v435_v14  ;;  %v949_v30 = vmul.f32 %v2623_v1, %v436_v15  ;;  %1967 = vst [vmem:[%s2655_s28 + $0x878] sm:$0xff] %v1455_v21  ;;  %v1458_v34 = vadd.f32 %v2625_v2, %v945_v22  ;;  %v456_v17 = vld [vmem:[%s2616_s16 + $0x950] sm:$0xff]  ;;  %v458_v19 = vld [vmem:[%s2616_s16 + $0x960] sm:$0xff] }
  0xfe   : > { %v1459_v35 = vadd.f32 %v2625_v2, %v946_v23  ;;  %v1460_v36 = vadd.f32 %v2625_v2, %v947_v24  ;;  %v950_v37 = vmul.f32 %v2623_v1, %v437_v20  ;;  %1968 = vst [vmem:[%s2655_s28 + $0x880] sm:$0xff] %v1456_v27  ;;  %1969 = vst [vmem:[%s2655_s28 + $0x888] sm:$0xff] %v1457_v28  ;;  %v459_v24 = vld [vmem:[%s2616_s16 + $0x968] sm:$0xff] }
  0xff   : > { %v1461_v40 = vadd.f32 %v2625_v2, %v948_v29  ;;  %v1462_v41 = vadd.f32 %v2625_v2, %v949_v30  ;;  %v951_v42 = vmul.f32 %v2623_v1, %v438_v25  ;;  %v952_v43 = vmul.f32 %v2623_v1, %v439_v26  ;;  %1970 = vst [vmem:[%s2655_s28 + $0x890] sm:$0xff] %v1458_v34  ;;  %v460_v25 = vld [vmem:[%s2616_s16 + $0x970] sm:$0xff]  ;;  %v461_v30 = vld [vmem:[%s2616_s16 + $0x978] sm:$0xff] }
 0x100   : > { %1971 = vst [vmem:[%s2655_s28 + $0x898] sm:$0xff] %v1459_v35  ;;  %1972 = vst [vmem:[%s2655_s28 + $0x8a0] sm:$0xff] %v1460_v36  ;;  %v1463_v45 = vadd.f32 %v2625_v2, %v950_v37  ;;  %v953_v46 = vmul.f32 %v2623_v1, %v440_v31  ;;  %v954_v47 = vmul.f32 %v2623_v1, %v441_v32  ;;  %v462_v35 = vld [vmem:[%s2616_s16 + $0x980] sm:$0xff]  ;;  %v463_v36 = vld [vmem:[%s2616_s16 + $0x988] sm:$0xff] }
 0x101   : > { %v955_v48 = vmul.f32 %v2623_v1, %v442_v33  ;;  %1973 = vst [vmem:[%s2655_s28 + $0x8a8] sm:$0xff] %v1461_v40  ;;  %1974 = vst [vmem:[%s2655_s28 + $0x8b0] sm:$0xff] %v1462_v41  ;;  %v1464_v51 = vadd.f32 %v2625_v2, %v951_v42  ;;  %v1465_v52 = vadd.f32 %v2625_v2, %v952_v43  ;;  %v464_v41 = vld [vmem:[%s2616_s16 + $0x990] sm:$0xff]  ;;  %v465_v42 = vld [vmem:[%s2616_s16 + $0x998] sm:$0xff] }
 0x102   : > { %v956_v53 = vmul.f32 %v2623_v1, %v443_v38  ;;  %v957_v54 = vmul.f32 %v2623_v1, %v444_v39  ;;  %1975 = vst [vmem:[%s2655_s28 + $0x8b8] sm:$0xff] %v1463_v45  ;;  %v1466_v58 = vadd.f32 %v2625_v2, %v953_v46  ;;  %v1467_v59 = vadd.f32 %v2625_v2, %v954_v47  ;;  %v466_v43 = vld [vmem:[%s2616_s16 + $0x9a0] sm:$0xff] }
 0x103   : > { %v1468_v60 = vadd.f32 %v2625_v2, %v955_v48  ;;  %v958_v61 = vmul.f32 %v2623_v1, %v445_v44  ;;  %1976 = vst [vmem:[%s2655_s28 + $0x8c0] sm:$0xff] %v1464_v51  ;;  %1977 = vst [vmem:[%s2655_s28 + $0x8c8] sm:$0xff] %v1465_v52  ;;  %v959_v4 = vmul.f32 %v2623_v1, %v446_v49  ;;  %v467_v48 = vld [vmem:[%s2616_s16 + $0x9a8] sm:$0xff]  ;;  %v468_v49 = vld [vmem:[%s2616_s16 + $0x9b0] sm:$0xff] }
 0x104   : > { %v1469_v0 = vadd.f32 %v2625_v2, %v956_v53  ;;  %v1470_v3 = vadd.f32 %v2625_v2, %v957_v54  ;;  %v960_v5 = vmul.f32 %v2623_v1, %v447_v50  ;;  %1978 = vst [vmem:[%s2655_s28 + $0x8d0] sm:$0xff] %v1466_v58  ;;  %1979 = vst [vmem:[%s2655_s28 + $0x8d8] sm:$0xff] %v1467_v59  ;;  %v469_v54 = vld [vmem:[%s2616_s16 + $0x9b8] sm:$0xff]  ;;  %v470_v59 = vld [vmem:[%s2616_s16 + $0x9c0] sm:$0xff] }
 0x105   : > { %1980 = vst [vmem:[%s2655_s28 + $0x8e0] sm:$0xff] %v1468_v60  ;;  %v1471_v7 = vadd.f32 %v2625_v2, %v958_v61  ;;  %v961_v8 = vmul.f32 %v2623_v1, %v448_v55  ;;  %v962_v9 = vmul.f32 %v2623_v1, %v449_v56  ;;  %v963_v10 = vmul.f32 %v2623_v1, %v450_v57  ;;  %v471_v60 = vld [vmem:[%s2616_s16 + $0x9c8] sm:$0xff] }
 0x106   : > { %1981 = vst [vmem:[%s2655_s28 + $0x8e8] sm:$0xff] %v1469_v0  ;;  %1982 = vst [vmem:[%s2655_s28 + $0x8f0] sm:$0xff] %v1470_v3  ;;  %v1472_v13 = vadd.f32 %v2625_v2, %v959_v4  ;;  %v1473_v14 = vadd.f32 %v2625_v2, %v960_v5  ;;  %v964_v15 = vmul.f32 %v2623_v1, %v451_v62  ;;  %v472_v3 = vld [vmem:[%s2616_s16 + $0x9d0] sm:$0xff]  ;;  %v473_v4 = vld [vmem:[%s2616_s16 + $0x9d8] sm:$0xff] }
 0x107   : > { %v965_v16 = vmul.f32 %v2623_v1, %v452_v63  ;;  %1983 = vst [vmem:[%s2655_s28 + $0x8f8] sm:$0xff] %v1471_v7  ;;  %v1474_v20 = vadd.f32 %v2625_v2, %v961_v8  ;;  %v1475_v21 = vadd.f32 %v2625_v2, %v962_v9  ;;  %v1476_v22 = vadd.f32 %v2625_v2, %v963_v10  ;;  %v474_v5 = vld [vmem:[%s2616_s16 + $0x9e0] sm:$0xff]  ;;  %v475_v10 = vld [vmem:[%s2616_s16 + $0x9e8] sm:$0xff] }
 0x108   : > { %v966_v23 = vmul.f32 %v2623_v1, %v453_v6  ;;  %1984 = vst [vmem:[%s2655_s28 + $0x900] sm:$0xff] %v1472_v13  ;;  %1985 = vst [vmem:[%s2655_s28 + $0x908] sm:$0xff] %v1473_v14  ;;  %v1477_v26 = vadd.f32 %v2625_v2, %v964_v15  ;;  %v967_v28 = vmul.f32 %v2623_v1, %v454_v11  ;;  %v476_v11 = vld [vmem:[%s2616_s16 + $0x9f0] sm:$0xff] }
 0x109   : > { %v1478_v27 = vadd.f32 %v2625_v2, %v965_v16  ;;  %v968_v29 = vmul.f32 %v2623_v1, %v455_v12  ;;  %1986 = vst [vmem:[%s2655_s28 + $0x910] sm:$0xff] %v1474_v20  ;;  %1987 = vst [vmem:[%s2655_s28 + $0x918] sm:$0xff] %v1475_v21  ;;  %v969_v32 = vmul.f32 %v2623_v1, %v456_v17  ;;  %v477_v16 = vld [vmem:[%s2616_s16 + $0x9f8] sm:$0xff]  ;;  %v478_v21 = vld [vmem:[%s2616_s16 + $0xa00] sm:$0xff] }
 0x10a   : > { %1988 = vst [vmem:[%s2655_s28 + $0x920] sm:$0xff] %v1476_v22  ;;  %v1479_v31 = vadd.f32 %v2625_v2, %v966_v23  ;;  %v970_v33 = vmul.f32 %v2623_v1, %v457_v18  ;;  %v971_v34 = vmul.f32 %v2623_v1, %v458_v19  ;;  %1989 = vst [vmem:[%s2655_s28 + $0x928] sm:$0xff] %v1477_v26  ;;  %v479_v22 = vld [vmem:[%s2616_s16 + $0xa08] sm:$0xff] }
 0x10b   : > { %1990 = vst [vmem:[%s2655_s28 + $0x930] sm:$0xff] %v1478_v27  ;;  %v1480_v37 = vadd.f32 %v2625_v2, %v967_v28  ;;  %v1481_v38 = vadd.f32 %v2625_v2, %v968_v29  ;;  %v972_v39 = vmul.f32 %v2623_v1, %v459_v24  ;;  %v973_v40 = vmul.f32 %v2623_v1, %v460_v25  ;;  %v480_v27 = vld [vmem:[%s2616_s16 + $0xa10] sm:$0xff]  ;;  %v481_v28 = vld [vmem:[%s2616_s16 + $0xa18] sm:$0xff]  ;;  %v482_v29 = vld [vmem:[%s2616_s16 + $0xa20] sm:$0xff] }
 0x10c   : > { %1991 = vst [vmem:[%s2655_s28 + $0x938] sm:$0xff] %v1479_v31  ;;  %v1482_v44 = vadd.f32 %v2625_v2, %v969_v32  ;;  %v1483_v45 = vadd.f32 %v2625_v2, %v970_v33  ;;  %v1484_v46 = vadd.f32 %v2625_v2, %v971_v34  ;;  %v974_v47 = vmul.f32 %v2623_v1, %v461_v30  ;;  %v483_v34 = vld [vmem:[%s2616_s16 + $0xa28] sm:$0xff] }
 0x10d   : > { %1992 = vst [vmem:[%s2655_s28 + $0x940] sm:$0xff] %v1480_v37  ;;  %1993 = vst [vmem:[%s2655_s28 + $0x948] sm:$0xff] %v1481_v38  ;;  %v1485_v50 = vadd.f32 %v2625_v2, %v972_v39  ;;  %v1486_v51 = vadd.f32 %v2625_v2, %v973_v40  ;;  %v975_v52 = vmul.f32 %v2623_v1, %v462_v35  ;;  %v484_v35 = vld [vmem:[%s2616_s16 + $0xa30] sm:$0xff]  ;;  %v485_v40 = vld [vmem:[%s2616_s16 + $0xa38] sm:$0xff] }
 0x10e   : > { %v976_v53 = vmul.f32 %v2623_v1, %v463_v36  ;;  %1994 = vst [vmem:[%s2655_s28 + $0x950] sm:$0xff] %v1482_v44  ;;  %1995 = vst [vmem:[%s2655_s28 + $0x958] sm:$0xff] %v1483_v45  ;;  %v1487_v55 = vadd.f32 %v2625_v2, %v974_v47  ;;  %v977_v56 = vmul.f32 %v2623_v1, %v464_v41  ;;  %v486_v45 = vld [vmem:[%s2616_s16 + $0xa40] sm:$0xff] }
 0x10f   : > { %1996 = vst [vmem:[%s2655_s28 + $0x960] sm:$0xff] %v1484_v46  ;;  %v978_v57 = vmul.f32 %v2623_v1, %v465_v42  ;;  %v979_v58 = vmul.f32 %v2623_v1, %v466_v43  ;;  %1997 = vst [vmem:[%s2655_s28 + $0x968] sm:$0xff] %v1485_v50  ;;  %v1488_v61 = vadd.f32 %v2625_v2, %v975_v52  ;;  %v487_v46 = vld [vmem:[%s2616_s16 + $0xa48] sm:$0xff]  ;;  %v489_v52 = vld [vmem:[%s2616_s16 + $0xa58] sm:$0xff] }
 0x110   : > { %1998 = vst [vmem:[%s2655_s28 + $0x970] sm:$0xff] %v1486_v51  ;;  %v1489_v62 = vadd.f32 %v2625_v2, %v976_v53  ;;  %v980_v63 = vmul.f32 %v2623_v1, %v467_v48  ;;  %v981_v0 = vmul.f32 %v2623_v1, %v468_v49  ;;  %1999 = vst [vmem:[%s2655_s28 + $0x978] sm:$0xff] %v1487_v55  ;;  %v488_v51 = vld [vmem:[%s2616_s16 + $0xa50] sm:$0xff]  ;;  %v490_v53 = vld [vmem:[%s2616_s16 + $0xa60] sm:$0xff] }
 0x111   : > { %v1490_v6 = vadd.f32 %v2625_v2, %v977_v56  ;;  %v1491_v7 = vadd.f32 %v2625_v2, %v978_v57  ;;  %v1492_v8 = vadd.f32 %v2625_v2, %v979_v58  ;;  %v982_v9 = vmul.f32 %v2623_v1, %v469_v54  ;;  %2000 = vst [vmem:[%s2655_s28 + $0x980] sm:$0xff] %v1488_v61  ;;  %v491_v58 = vld [vmem:[%s2616_s16 + $0xa68] sm:$0xff] }
 0x112   : > { %2001 = vst [vmem:[%s2655_s28 + $0x988] sm:$0xff] %v1489_v62  ;;  %v1493_v12 = vadd.f32 %v2625_v2, %v980_v63  ;;  %v1494_v13 = vadd.f32 %v2625_v2, %v981_v0  ;;  %v983_v14 = vmul.f32 %v2623_v1, %v470_v59  ;;  %v984_v15 = vmul.f32 %v2623_v1, %v471_v60  ;;  %v492_v59 = vld [vmem:[%s2616_s16 + $0xa70] sm:$0xff]  ;;  %v493_v0 = vld [vmem:[%s2616_s16 + $0xa78] sm:$0xff] }
 0x113   : > { %2002 = vst [vmem:[%s2655_s28 + $0x990] sm:$0xff] %v1490_v6  ;;  %2003 = vst [vmem:[%s2655_s28 + $0x998] sm:$0xff] %v1491_v7  ;;  %v1495_v17 = vadd.f32 %v2625_v2, %v982_v9  ;;  %v985_v18 = vmul.f32 %v2623_v1, %v472_v3  ;;  %v986_v19 = vmul.f32 %v2623_v1, %v473_v4  ;;  %v494_v7 = vld [vmem:[%s2616_s16 + $0xa80] sm:$0xff] }
 0x114   : > { %2004 = vst [vmem:[%s2655_s28 + $0x9a0] sm:$0xff] %v1492_v8  ;;  %v987_v20 = vmul.f32 %v2623_v1, %v474_v5  ;;  %2005 = vst [vmem:[%s2655_s28 + $0x9a8] sm:$0xff] %v1493_v12  ;;  %v1496_v23 = vadd.f32 %v2625_v2, %v983_v14  ;;  %v1497_v24 = vadd.f32 %v2625_v2, %v984_v15  ;;  %v495_v8 = vld [vmem:[%s2616_s16 + $0xa88] sm:$0xff]  ;;  %v497_v14 = vld [vmem:[%s2616_s16 + $0xa98] sm:$0xff] }
 0x115   : > { %2006 = vst [vmem:[%s2655_s28 + $0x9b0] sm:$0xff] %v1494_v13  ;;  %v988_v25 = vmul.f32 %v2623_v1, %v475_v10  ;;  %v989_v26 = vmul.f32 %v2623_v1, %v476_v11  ;;  %2007 = vst [vmem:[%s2655_s28 + $0x9b8] sm:$0xff] %v1495_v17  ;;  %v1498_v30 = vadd.f32 %v2625_v2, %v985_v18  ;;  %v496_v13 = vld [vmem:[%s2616_s16 + $0xa90] sm:$0xff]  ;;  %v498_v15 = vld [vmem:[%s2616_s16 + $0xaa0] sm:$0xff] }
 0x116   : > { %v1499_v31 = vadd.f32 %v2625_v2, %v986_v19  ;;  %v1500_v32 = vadd.f32 %v2625_v2, %v987_v20  ;;  %v990_v33 = vmul.f32 %v2623_v1, %v477_v16  ;;  %2008 = vst [vmem:[%s2655_s28 + $0x9c0] sm:$0xff] %v1496_v23  ;;  %2009 = vst [vmem:[%s2655_s28 + $0x9c8] sm:$0xff] %v1497_v24  ;;  %v499_v20 = vld [vmem:[%s2616_s16 + $0xaa8] sm:$0xff] }
 0x117   : > { %v1501_v36 = vadd.f32 %v2625_v2, %v988_v25  ;;  %v1502_v37 = vadd.f32 %v2625_v2, %v989_v26  ;;  %v991_v38 = vmul.f32 %v2623_v1, %v478_v21  ;;  %v992_v39 = vmul.f32 %v2623_v1, %v479_v22  ;;  %2010 = vst [vmem:[%s2655_s28 + $0x9d0] sm:$0xff] %v1498_v30  ;;  %v500_v21 = vld [vmem:[%s2616_s16 + $0xab0] sm:$0xff]  ;;  %v501_v26 = vld [vmem:[%s2616_s16 + $0xab8] sm:$0xff] }
 0x118   : > { %2011 = vst [vmem:[%s2655_s28 + $0x9d8] sm:$0xff] %v1499_v31  ;;  %2012 = vst [vmem:[%s2655_s28 + $0x9e0] sm:$0xff] %v1500_v32  ;;  %v1503_v41 = vadd.f32 %v2625_v2, %v990_v33  ;;  %v993_v42 = vmul.f32 %v2623_v1, %v480_v27  ;;  %v994_v43 = vmul.f32 %v2623_v1, %v481_v28  ;;  %v502_v31 = vld [vmem:[%s2616_s16 + $0xac0] sm:$0xff]  ;;  %v503_v32 = vld [vmem:[%s2616_s16 + $0xac8] sm:$0xff] }
 0x119   : > { %v995_v44 = vmul.f32 %v2623_v1, %v482_v29  ;;  %2013 = vst [vmem:[%s2655_s28 + $0x9e8] sm:$0xff] %v1501_v36  ;;  %2014 = vst [vmem:[%s2655_s28 + $0x9f0] sm:$0xff] %v1502_v37  ;;  %v1504_v47 = vadd.f32 %v2625_v2, %v991_v38  ;;  %v1505_v48 = vadd.f32 %v2625_v2, %v992_v39  ;;  %v504_v37 = vld [vmem:[%s2616_s16 + $0xad0] sm:$0xff]  ;;  %v505_v38 = vld [vmem:[%s2616_s16 + $0xad8] sm:$0xff] }
 0x11a   : > { %v996_v49 = vmul.f32 %v2623_v1, %v483_v34  ;;  %v997_v50 = vmul.f32 %v2623_v1, %v484_v35  ;;  %2015 = vst [vmem:[%s2655_s28 + $0x9f8] sm:$0xff] %v1503_v41  ;;  %v1506_v54 = vadd.f32 %v2625_v2, %v993_v42  ;;  %v1507_v55 = vadd.f32 %v2625_v2, %v994_v43  ;;  %v506_v39 = vld [vmem:[%s2616_s16 + $0xae0] sm:$0xff] }
 0x11b   : > { %v1508_v56 = vadd.f32 %v2625_v2, %v995_v44  ;;  %v998_v57 = vmul.f32 %v2623_v1, %v485_v40  ;;  %2016 = vst [vmem:[%s2655_s28 + $0xa00] sm:$0xff] %v1504_v47  ;;  %2017 = vst [vmem:[%s2655_s28 + $0xa08] sm:$0xff] %v1505_v48  ;;  %v999_v62 = vmul.f32 %v2623_v1, %v486_v45  ;;  %v507_v44 = vld [vmem:[%s2616_s16 + $0xae8] sm:$0xff]  ;;  %v508_v45 = vld [vmem:[%s2616_s16 + $0xaf0] sm:$0xff] }
 0x11c   : > { %v1509_v60 = vadd.f32 %v2625_v2, %v996_v49  ;;  %v1510_v61 = vadd.f32 %v2625_v2, %v997_v50  ;;  %v1000_v63 = vmul.f32 %v2623_v1, %v487_v46  ;;  %2018 = vst [vmem:[%s2655_s28 + $0xa10] sm:$0xff] %v1506_v54  ;;  %2019 = vst [vmem:[%s2655_s28 + $0xa18] sm:$0xff] %v1507_v55  ;;  %v509_v50 = vld [vmem:[%s2616_s16 + $0xaf8] sm:$0xff]  ;;  %v510_v55 = vld [vmem:[%s2616_s16 + $0xb00] sm:$0xff] }
 0x11d   : > { %2020 = vst [vmem:[%s2655_s28 + $0xa20] sm:$0xff] %v1508_v56  ;;  %v1511_v3 = vadd.f32 %v2625_v2, %v998_v57  ;;  %v1001_v4 = vmul.f32 %v2623_v1, %v488_v51  ;;  %v1002_v5 = vmul.f32 %v2623_v1, %v489_v52  ;;  %v1003_v6 = vmul.f32 %v2623_v1, %v490_v53  ;;  %v511_v56 = vld [vmem:[%s2616_s16 + $0xb08] sm:$0xff] }
 0x11e   : > { %2021 = vst [vmem:[%s2655_s28 + $0xa28] sm:$0xff] %v1509_v60  ;;  %2022 = vst [vmem:[%s2655_s28 + $0xa30] sm:$0xff] %v1510_v61  ;;  %v1512_v9 = vadd.f32 %v2625_v2, %v999_v62  ;;  %v1513_v10 = vadd.f32 %v2625_v2, %v1000_v63  ;;  %v1004_v11 = vmul.f32 %v2623_v1, %v491_v58  ;;  %v512_v61 = vld [vmem:[%s2616_s16 + $0xb10] sm:$0xff]  ;;  %v513_v62 = vld [vmem:[%s2616_s16 + $0xb18] sm:$0xff] }
 0x11f   : > { %v1005_v12 = vmul.f32 %v2623_v1, %v492_v59  ;;  %2023 = vst [vmem:[%s2655_s28 + $0xa38] sm:$0xff] %v1511_v3  ;;  %v1514_v16 = vadd.f32 %v2625_v2, %v1001_v4  ;;  %v1515_v17 = vadd.f32 %v2625_v2, %v1002_v5  ;;  %v1516_v18 = vadd.f32 %v2625_v2, %v1003_v6  ;;  %v514_v63 = vld [vmem:[%s2616_s16 + $0xb20] sm:$0xff]  ;;  %v515_v6 = vld [vmem:[%s2616_s16 + $0xb28] sm:$0xff] }
 0x120   : > { %v1006_v19 = vmul.f32 %v2623_v1, %v493_v0  ;;  %2024 = vst [vmem:[%s2655_s28 + $0xa40] sm:$0xff] %v1512_v9  ;;  %2025 = vst [vmem:[%s2655_s28 + $0xa48] sm:$0xff] %v1513_v10  ;;  %v1517_v22 = vadd.f32 %v2625_v2, %v1004_v11  ;;  %v1007_v24 = vmul.f32 %v2623_v1, %v494_v7  ;;  %v516_v7 = vld [vmem:[%s2616_s16 + $0xb30] sm:$0xff] }
 0x121   : > { %v1518_v23 = vadd.f32 %v2625_v2, %v1005_v12  ;;  %v1008_v25 = vmul.f32 %v2623_v1, %v495_v8  ;;  %2026 = vst [vmem:[%s2655_s28 + $0xa50] sm:$0xff] %v1514_v16  ;;  %2027 = vst [vmem:[%s2655_s28 + $0xa58] sm:$0xff] %v1515_v17  ;;  %v1009_v28 = vmul.f32 %v2623_v1, %v496_v13  ;;  %v517_v12 = vld [vmem:[%s2616_s16 + $0xb38] sm:$0xff]  ;;  %v518_v17 = vld [vmem:[%s2616_s16 + $0xb40] sm:$0xff] }
 0x122   : > { %2028 = vst [vmem:[%s2655_s28 + $0xa60] sm:$0xff] %v1516_v18  ;;  %v1519_v27 = vadd.f32 %v2625_v2, %v1006_v19  ;;  %v1010_v29 = vmul.f32 %v2623_v1, %v497_v14  ;;  %v1011_v30 = vmul.f32 %v2623_v1, %v498_v15  ;;  %2029 = vst [vmem:[%s2655_s28 + $0xa68] sm:$0xff] %v1517_v22  ;;  %v519_v18 = vld [vmem:[%s2616_s16 + $0xb48] sm:$0xff] }
 0x123   : > { %2030 = vst [vmem:[%s2655_s28 + $0xa70] sm:$0xff] %v1518_v23  ;;  %v1520_v33 = vadd.f32 %v2625_v2, %v1007_v24  ;;  %v1521_v34 = vadd.f32 %v2625_v2, %v1008_v25  ;;  %v1012_v35 = vmul.f32 %v2623_v1, %v499_v20  ;;  %v1013_v36 = vmul.f32 %v2623_v1, %v500_v21  ;;  %v520_v23 = vld [vmem:[%s2616_s16 + $0xb50] sm:$0xff]  ;;  %v521_v24 = vld [vmem:[%s2616_s16 + $0xb58] sm:$0xff]  ;;  %v522_v25 = vld [vmem:[%s2616_s16 + $0xb60] sm:$0xff] }
 0x124   : > { %2031 = vst [vmem:[%s2655_s28 + $0xa78] sm:$0xff] %v1519_v27  ;;  %v1522_v40 = vadd.f32 %v2625_v2, %v1009_v28  ;;  %v1523_v41 = vadd.f32 %v2625_v2, %v1010_v29  ;;  %v1524_v42 = vadd.f32 %v2625_v2, %v1011_v30  ;;  %v1014_v43 = vmul.f32 %v2623_v1, %v501_v26  ;;  %v523_v30 = vld [vmem:[%s2616_s16 + $0xb68] sm:$0xff] }
 0x125   : > { %2032 = vst [vmem:[%s2655_s28 + $0xa80] sm:$0xff] %v1520_v33  ;;  %2033 = vst [vmem:[%s2655_s28 + $0xa88] sm:$0xff] %v1521_v34  ;;  %v1525_v46 = vadd.f32 %v2625_v2, %v1012_v35  ;;  %v1526_v47 = vadd.f32 %v2625_v2, %v1013_v36  ;;  %v1015_v48 = vmul.f32 %v2623_v1, %v502_v31  ;;  %v524_v31 = vld [vmem:[%s2616_s16 + $0xb70] sm:$0xff]  ;;  %v525_v36 = vld [vmem:[%s2616_s16 + $0xb78] sm:$0xff] }
 0x126   : > { %v1016_v49 = vmul.f32 %v2623_v1, %v503_v32  ;;  %2034 = vst [vmem:[%s2655_s28 + $0xa90] sm:$0xff] %v1522_v40  ;;  %2035 = vst [vmem:[%s2655_s28 + $0xa98] sm:$0xff] %v1523_v41  ;;  %v1527_v51 = vadd.f32 %v2625_v2, %v1014_v43  ;;  %v1017_v52 = vmul.f32 %v2623_v1, %v504_v37  ;;  %v526_v41 = vld [vmem:[%s2616_s16 + $0xb80] sm:$0xff] }
 0x127   : > { %2036 = vst [vmem:[%s2655_s28 + $0xaa0] sm:$0xff] %v1524_v42  ;;  %v1018_v53 = vmul.f32 %v2623_v1, %v505_v38  ;;  %v1019_v54 = vmul.f32 %v2623_v1, %v506_v39  ;;  %2037 = vst [vmem:[%s2655_s28 + $0xaa8] sm:$0xff] %v1525_v46  ;;  %v1528_v57 = vadd.f32 %v2625_v2, %v1015_v48  ;;  %v527_v42 = vld [vmem:[%s2616_s16 + $0xb88] sm:$0xff]  ;;  %v529_v48 = vld [vmem:[%s2616_s16 + $0xb98] sm:$0xff] }
 0x128   : > { %2038 = vst [vmem:[%s2655_s28 + $0xab0] sm:$0xff] %v1526_v47  ;;  %v1529_v58 = vadd.f32 %v2625_v2, %v1016_v49  ;;  %v1020_v59 = vmul.f32 %v2623_v1, %v507_v44  ;;  %v1021_v60 = vmul.f32 %v2623_v1, %v508_v45  ;;  %2039 = vst [vmem:[%s2655_s28 + $0xab8] sm:$0xff] %v1527_v51  ;;  %v528_v47 = vld [vmem:[%s2616_s16 + $0xb90] sm:$0xff]  ;;  %v530_v49 = vld [vmem:[%s2616_s16 + $0xba0] sm:$0xff] }
 0x129   : > { %v1530_v0 = vadd.f32 %v2625_v2, %v1017_v52  ;;  %v1531_v3 = vadd.f32 %v2625_v2, %v1018_v53  ;;  %v1532_v4 = vadd.f32 %v2625_v2, %v1019_v54  ;;  %v1022_v5 = vmul.f32 %v2623_v1, %v509_v50  ;;  %2040 = vst [vmem:[%s2655_s28 + $0xac0] sm:$0xff] %v1528_v57  ;;  %v531_v54 = vld [vmem:[%s2616_s16 + $0xba8] sm:$0xff] }
 0x12a   : > { %2041 = vst [vmem:[%s2655_s28 + $0xac8] sm:$0xff] %v1529_v58  ;;  %v1533_v8 = vadd.f32 %v2625_v2, %v1020_v59  ;;  %v1534_v9 = vadd.f32 %v2625_v2, %v1021_v60  ;;  %v1023_v10 = vmul.f32 %v2623_v1, %v510_v55  ;;  %v1024_v11 = vmul.f32 %v2623_v1, %v511_v56  ;;  %v532_v55 = vld [vmem:[%s2616_s16 + $0xbb0] sm:$0xff]  ;;  %v533_v60 = vld [vmem:[%s2616_s16 + $0xbb8] sm:$0xff] }
 0x12b   : > { %2042 = vst [vmem:[%s2655_s28 + $0xad0] sm:$0xff] %v1530_v0  ;;  %2043 = vst [vmem:[%s2655_s28 + $0xad8] sm:$0xff] %v1531_v3  ;;  %v1535_v13 = vadd.f32 %v2625_v2, %v1022_v5  ;;  %v1025_v14 = vmul.f32 %v2623_v1, %v512_v61  ;;  %v1026_v15 = vmul.f32 %v2623_v1, %v513_v62  ;;  %v534_v3 = vld [vmem:[%s2616_s16 + $0xbc0] sm:$0xff] }
 0x12c   : > { %2044 = vst [vmem:[%s2655_s28 + $0xae0] sm:$0xff] %v1532_v4  ;;  %v1027_v16 = vmul.f32 %v2623_v1, %v514_v63  ;;  %2045 = vst [vmem:[%s2655_s28 + $0xae8] sm:$0xff] %v1533_v8  ;;  %v1536_v19 = vadd.f32 %v2625_v2, %v1023_v10  ;;  %v1537_v20 = vadd.f32 %v2625_v2, %v1024_v11  ;;  %v535_v4 = vld [vmem:[%s2616_s16 + $0xbc8] sm:$0xff]  ;;  %v537_v10 = vld [vmem:[%s2616_s16 + $0xbd8] sm:$0xff] }
 0x12d   : > { %2046 = vst [vmem:[%s2655_s28 + $0xaf0] sm:$0xff] %v1534_v9  ;;  %v1028_v21 = vmul.f32 %v2623_v1, %v515_v6  ;;  %v1029_v22 = vmul.f32 %v2623_v1, %v516_v7  ;;  %2047 = vst [vmem:[%s2655_s28 + $0xaf8] sm:$0xff] %v1535_v13  ;;  %v1538_v26 = vadd.f32 %v2625_v2, %v1025_v14  ;;  %v536_v9 = vld [vmem:[%s2616_s16 + $0xbd0] sm:$0xff]  ;;  %v538_v11 = vld [vmem:[%s2616_s16 + $0xbe0] sm:$0xff] }
 0x12e   : > { %v1539_v27 = vadd.f32 %v2625_v2, %v1026_v15  ;;  %v1540_v28 = vadd.f32 %v2625_v2, %v1027_v16  ;;  %v1030_v29 = vmul.f32 %v2623_v1, %v517_v12  ;;  %2048 = vst [vmem:[%s2655_s28 + $0xb00] sm:$0xff] %v1536_v19  ;;  %2049 = vst [vmem:[%s2655_s28 + $0xb08] sm:$0xff] %v1537_v20  ;;  %v539_v16 = vld [vmem:[%s2616_s16 + $0xbe8] sm:$0xff] }
 0x12f   : > { %v1541_v32 = vadd.f32 %v2625_v2, %v1028_v21  ;;  %v1542_v33 = vadd.f32 %v2625_v2, %v1029_v22  ;;  %v1031_v34 = vmul.f32 %v2623_v1, %v518_v17  ;;  %v1032_v35 = vmul.f32 %v2623_v1, %v519_v18  ;;  %2050 = vst [vmem:[%s2655_s28 + $0xb10] sm:$0xff] %v1538_v26  ;;  %v540_v17 = vld [vmem:[%s2616_s16 + $0xbf0] sm:$0xff]  ;;  %v541_v22 = vld [vmem:[%s2616_s16 + $0xbf8] sm:$0xff] }
 0x130   : > { %2051 = vst [vmem:[%s2655_s28 + $0xb18] sm:$0xff] %v1539_v27  ;;  %2052 = vst [vmem:[%s2655_s28 + $0xb20] sm:$0xff] %v1540_v28  ;;  %v1543_v37 = vadd.f32 %v2625_v2, %v1030_v29  ;;  %v1033_v38 = vmul.f32 %v2623_v1, %v520_v23  ;;  %v1034_v39 = vmul.f32 %v2623_v1, %v521_v24  ;;  %v542_v27 = vld [vmem:[%s2616_s16 + $0xc00] sm:$0xff]  ;;  %v543_v28 = vld [vmem:[%s2616_s16 + $0xc08] sm:$0xff] }
 0x131   : > { %v1035_v40 = vmul.f32 %v2623_v1, %v522_v25  ;;  %2053 = vst [vmem:[%s2655_s28 + $0xb28] sm:$0xff] %v1541_v32  ;;  %2054 = vst [vmem:[%s2655_s28 + $0xb30] sm:$0xff] %v1542_v33  ;;  %v1544_v43 = vadd.f32 %v2625_v2, %v1031_v34  ;;  %v1545_v44 = vadd.f32 %v2625_v2, %v1032_v35  ;;  %v544_v33 = vld [vmem:[%s2616_s16 + $0xc10] sm:$0xff]  ;;  %v545_v34 = vld [vmem:[%s2616_s16 + $0xc18] sm:$0xff] }
 0x132   : > { %v1036_v45 = vmul.f32 %v2623_v1, %v523_v30  ;;  %v1037_v46 = vmul.f32 %v2623_v1, %v524_v31  ;;  %2055 = vst [vmem:[%s2655_s28 + $0xb38] sm:$0xff] %v1543_v37  ;;  %v1546_v50 = vadd.f32 %v2625_v2, %v1033_v38  ;;  %v1547_v51 = vadd.f32 %v2625_v2, %v1034_v39  ;;  %v546_v35 = vld [vmem:[%s2616_s16 + $0xc20] sm:$0xff] }
 0x133   : > { %v1548_v52 = vadd.f32 %v2625_v2, %v1035_v40  ;;  %v1038_v53 = vmul.f32 %v2623_v1, %v525_v36  ;;  %2056 = vst [vmem:[%s2655_s28 + $0xb40] sm:$0xff] %v1544_v43  ;;  %2057 = vst [vmem:[%s2655_s28 + $0xb48] sm:$0xff] %v1545_v44  ;;  %v1039_v58 = vmul.f32 %v2623_v1, %v526_v41  ;;  %v547_v40 = vld [vmem:[%s2616_s16 + $0xc28] sm:$0xff]  ;;  %v548_v41 = vld [vmem:[%s2616_s16 + $0xc30] sm:$0xff] }
 0x134   : > { %v1549_v56 = vadd.f32 %v2625_v2, %v1036_v45  ;;  %v1550_v57 = vadd.f32 %v2625_v2, %v1037_v46  ;;  %v1040_v59 = vmul.f32 %v2623_v1, %v527_v42  ;;  %2058 = vst [vmem:[%s2655_s28 + $0xb50] sm:$0xff] %v1546_v50  ;;  %2059 = vst [vmem:[%s2655_s28 + $0xb58] sm:$0xff] %v1547_v51  ;;  %v549_v46 = vld [vmem:[%s2616_s16 + $0xc38] sm:$0xff]  ;;  %v550_v51 = vld [vmem:[%s2616_s16 + $0xc40] sm:$0xff] }
 0x135   : > { %2060 = vst [vmem:[%s2655_s28 + $0xb60] sm:$0xff] %v1548_v52  ;;  %v1551_v61 = vadd.f32 %v2625_v2, %v1038_v53  ;;  %v1041_v62 = vmul.f32 %v2623_v1, %v528_v47  ;;  %v1042_v63 = vmul.f32 %v2623_v1, %v529_v48  ;;  %v1043_v0 = vmul.f32 %v2623_v1, %v530_v49  ;;  %v551_v52 = vld [vmem:[%s2616_s16 + $0xc48] sm:$0xff] }
 0x136   : > { %2061 = vst [vmem:[%s2655_s28 + $0xb68] sm:$0xff] %v1549_v56  ;;  %2062 = vst [vmem:[%s2655_s28 + $0xb70] sm:$0xff] %v1550_v57  ;;  %v1552_v5 = vadd.f32 %v2625_v2, %v1039_v58  ;;  %v1553_v6 = vadd.f32 %v2625_v2, %v1040_v59  ;;  %v1044_v7 = vmul.f32 %v2623_v1, %v531_v54  ;;  %v552_v57 = vld [vmem:[%s2616_s16 + $0xc50] sm:$0xff]  ;;  %v553_v58 = vld [vmem:[%s2616_s16 + $0xc58] sm:$0xff] }
 0x137   : > { %v1045_v8 = vmul.f32 %v2623_v1, %v532_v55  ;;  %2063 = vst [vmem:[%s2655_s28 + $0xb78] sm:$0xff] %v1551_v61  ;;  %v1554_v12 = vadd.f32 %v2625_v2, %v1041_v62  ;;  %v1555_v13 = vadd.f32 %v2625_v2, %v1042_v63  ;;  %v1556_v14 = vadd.f32 %v2625_v2, %v1043_v0  ;;  %v554_v59 = vld [vmem:[%s2616_s16 + $0xc60] sm:$0xff]  ;;  %v555_v0 = vld [vmem:[%s2616_s16 + $0xc68] sm:$0xff] }
 0x138   : > { %v1046_v15 = vmul.f32 %v2623_v1, %v533_v60  ;;  %2064 = vst [vmem:[%s2655_s28 + $0xb80] sm:$0xff] %v1552_v5  ;;  %2065 = vst [vmem:[%s2655_s28 + $0xb88] sm:$0xff] %v1553_v6  ;;  %v1557_v18 = vadd.f32 %v2625_v2, %v1044_v7  ;;  %v1047_v20 = vmul.f32 %v2623_v1, %v534_v3  ;;  %v556_v3 = vld [vmem:[%s2616_s16 + $0xc70] sm:$0xff] }
 0x139   : > { %v1558_v19 = vadd.f32 %v2625_v2, %v1045_v8  ;;  %v1048_v21 = vmul.f32 %v2623_v1, %v535_v4  ;;  %2066 = vst [vmem:[%s2655_s28 + $0xb90] sm:$0xff] %v1554_v12  ;;  %2067 = vst [vmem:[%s2655_s28 + $0xb98] sm:$0xff] %v1555_v13  ;;  %v1049_v24 = vmul.f32 %v2623_v1, %v536_v9  ;;  %v557_v8 = vld [vmem:[%s2616_s16 + $0xc78] sm:$0xff]  ;;  %v558_v13 = vld [vmem:[%s2616_s16 + $0xc80] sm:$0xff] }
 0x13a   : > { %2068 = vst [vmem:[%s2655_s28 + $0xba0] sm:$0xff] %v1556_v14  ;;  %v1559_v23 = vadd.f32 %v2625_v2, %v1046_v15  ;;  %v1050_v25 = vmul.f32 %v2623_v1, %v537_v10  ;;  %v1051_v26 = vmul.f32 %v2623_v1, %v538_v11  ;;  %2069 = vst [vmem:[%s2655_s28 + $0xba8] sm:$0xff] %v1557_v18  ;;  %v559_v14 = vld [vmem:[%s2616_s16 + $0xc88] sm:$0xff] }
 0x13b   : > { %2070 = vst [vmem:[%s2655_s28 + $0xbb0] sm:$0xff] %v1558_v19  ;;  %v1560_v29 = vadd.f32 %v2625_v2, %v1047_v20  ;;  %v1561_v30 = vadd.f32 %v2625_v2, %v1048_v21  ;;  %v1052_v31 = vmul.f32 %v2623_v1, %v539_v16  ;;  %v1053_v32 = vmul.f32 %v2623_v1, %v540_v17  ;;  %v560_v19 = vld [vmem:[%s2616_s16 + $0xc90] sm:$0xff]  ;;  %v561_v20 = vld [vmem:[%s2616_s16 + $0xc98] sm:$0xff]  ;;  %v562_v21 = vld [vmem:[%s2616_s16 + $0xca0] sm:$0xff] }
 0x13c   : > { %2071 = vst [vmem:[%s2655_s28 + $0xbb8] sm:$0xff] %v1559_v23  ;;  %v1562_v36 = vadd.f32 %v2625_v2, %v1049_v24  ;;  %v1563_v37 = vadd.f32 %v2625_v2, %v1050_v25  ;;  %v1564_v38 = vadd.f32 %v2625_v2, %v1051_v26  ;;  %v1054_v39 = vmul.f32 %v2623_v1, %v541_v22  ;;  %v563_v26 = vld [vmem:[%s2616_s16 + $0xca8] sm:$0xff] }
 0x13d   : > { %2072 = vst [vmem:[%s2655_s28 + $0xbc0] sm:$0xff] %v1560_v29  ;;  %2073 = vst [vmem:[%s2655_s28 + $0xbc8] sm:$0xff] %v1561_v30  ;;  %v1565_v42 = vadd.f32 %v2625_v2, %v1052_v31  ;;  %v1566_v43 = vadd.f32 %v2625_v2, %v1053_v32  ;;  %v1055_v44 = vmul.f32 %v2623_v1, %v542_v27  ;;  %v564_v27 = vld [vmem:[%s2616_s16 + $0xcb0] sm:$0xff]  ;;  %v565_v32 = vld [vmem:[%s2616_s16 + $0xcb8] sm:$0xff] }
 0x13e   : > { %v1056_v45 = vmul.f32 %v2623_v1, %v543_v28  ;;  %2074 = vst [vmem:[%s2655_s28 + $0xbd0] sm:$0xff] %v1562_v36  ;;  %2075 = vst [vmem:[%s2655_s28 + $0xbd8] sm:$0xff] %v1563_v37  ;;  %v1567_v47 = vadd.f32 %v2625_v2, %v1054_v39  ;;  %v1057_v48 = vmul.f32 %v2623_v1, %v544_v33  ;;  %v566_v37 = vld [vmem:[%s2616_s16 + $0xcc0] sm:$0xff] }
 0x13f   : > { %2076 = vst [vmem:[%s2655_s28 + $0xbe0] sm:$0xff] %v1564_v38  ;;  %v1058_v49 = vmul.f32 %v2623_v1, %v545_v34  ;;  %v1059_v50 = vmul.f32 %v2623_v1, %v546_v35  ;;  %2077 = vst [vmem:[%s2655_s28 + $0xbe8] sm:$0xff] %v1565_v42  ;;  %v1568_v53 = vadd.f32 %v2625_v2, %v1055_v44  ;;  %v567_v38 = vld [vmem:[%s2616_s16 + $0xcc8] sm:$0xff]  ;;  %v569_v44 = vld [vmem:[%s2616_s16 + $0xcd8] sm:$0xff] }
 0x140   : > { %2078 = vst [vmem:[%s2655_s28 + $0xbf0] sm:$0xff] %v1566_v43  ;;  %v1569_v54 = vadd.f32 %v2625_v2, %v1056_v45  ;;  %v1060_v55 = vmul.f32 %v2623_v1, %v547_v40  ;;  %v1061_v56 = vmul.f32 %v2623_v1, %v548_v41  ;;  %2079 = vst [vmem:[%s2655_s28 + $0xbf8] sm:$0xff] %v1567_v47  ;;  %v568_v43 = vld [vmem:[%s2616_s16 + $0xcd0] sm:$0xff]  ;;  %v570_v45 = vld [vmem:[%s2616_s16 + $0xce0] sm:$0xff] }
 0x141   : > { %v1570_v60 = vadd.f32 %v2625_v2, %v1057_v48  ;;  %v1571_v61 = vadd.f32 %v2625_v2, %v1058_v49  ;;  %v1572_v62 = vadd.f32 %v2625_v2, %v1059_v50  ;;  %v1062_v63 = vmul.f32 %v2623_v1, %v549_v46  ;;  %2080 = vst [vmem:[%s2655_s28 + $0xc00] sm:$0xff] %v1568_v53  ;;  %v571_v50 = vld [vmem:[%s2616_s16 + $0xce8] sm:$0xff] }
 0x142   : > { %2081 = vst [vmem:[%s2655_s28 + $0xc08] sm:$0xff] %v1569_v54  ;;  %v1573_v4 = vadd.f32 %v2625_v2, %v1060_v55  ;;  %v1574_v5 = vadd.f32 %v2625_v2, %v1061_v56  ;;  %v1063_v6 = vmul.f32 %v2623_v1, %v550_v51  ;;  %v1064_v7 = vmul.f32 %v2623_v1, %v551_v52  ;;  %v572_v51 = vld [vmem:[%s2616_s16 + $0xcf0] sm:$0xff]  ;;  %v573_v56 = vld [vmem:[%s2616_s16 + $0xcf8] sm:$0xff] }
 0x143   : > { %2082 = vst [vmem:[%s2655_s28 + $0xc10] sm:$0xff] %v1570_v60  ;;  %2083 = vst [vmem:[%s2655_s28 + $0xc18] sm:$0xff] %v1571_v61  ;;  %v1575_v9 = vadd.f32 %v2625_v2, %v1062_v63  ;;  %v1065_v10 = vmul.f32 %v2623_v1, %v552_v57  ;;  %v1066_v11 = vmul.f32 %v2623_v1, %v553_v58  ;;  %v574_v61 = vld [vmem:[%s2616_s16 + $0xd00] sm:$0xff] }
 0x144   : > { %2084 = vst [vmem:[%s2655_s28 + $0xc20] sm:$0xff] %v1572_v62  ;;  %v1067_v12 = vmul.f32 %v2623_v1, %v554_v59  ;;  %2085 = vst [vmem:[%s2655_s28 + $0xc28] sm:$0xff] %v1573_v4  ;;  %v1576_v15 = vadd.f32 %v2625_v2, %v1063_v6  ;;  %v1577_v16 = vadd.f32 %v2625_v2, %v1064_v7  ;;  %v575_v62 = vld [vmem:[%s2616_s16 + $0xd08] sm:$0xff]  ;;  %v577_v6 = vld [vmem:[%s2616_s16 + $0xd18] sm:$0xff] }
 0x145   : > { %2086 = vst [vmem:[%s2655_s28 + $0xc30] sm:$0xff] %v1574_v5  ;;  %v1068_v17 = vmul.f32 %v2623_v1, %v555_v0  ;;  %v1069_v18 = vmul.f32 %v2623_v1, %v556_v3  ;;  %2087 = vst [vmem:[%s2655_s28 + $0xc38] sm:$0xff] %v1575_v9  ;;  %v1578_v22 = vadd.f32 %v2625_v2, %v1065_v10  ;;  %v576_v5 = vld [vmem:[%s2616_s16 + $0xd10] sm:$0xff]  ;;  %v578_v7 = vld [vmem:[%s2616_s16 + $0xd20] sm:$0xff] }
 0x146   : > { %v1579_v23 = vadd.f32 %v2625_v2, %v1066_v11  ;;  %v1580_v24 = vadd.f32 %v2625_v2, %v1067_v12  ;;  %v1070_v25 = vmul.f32 %v2623_v1, %v557_v8  ;;  %2088 = vst [vmem:[%s2655_s28 + $0xc40] sm:$0xff] %v1576_v15  ;;  %2089 = vst [vmem:[%s2655_s28 + $0xc48] sm:$0xff] %v1577_v16  ;;  %v579_v12 = vld [vmem:[%s2616_s16 + $0xd28] sm:$0xff] }
 0x147   : > { %v1581_v28 = vadd.f32 %v2625_v2, %v1068_v17  ;;  %v1582_v29 = vadd.f32 %v2625_v2, %v1069_v18  ;;  %v1071_v30 = vmul.f32 %v2623_v1, %v558_v13  ;;  %v1072_v31 = vmul.f32 %v2623_v1, %v559_v14  ;;  %2090 = vst [vmem:[%s2655_s28 + $0xc50] sm:$0xff] %v1578_v22  ;;  %v580_v13 = vld [vmem:[%s2616_s16 + $0xd30] sm:$0xff]  ;;  %v581_v18 = vld [vmem:[%s2616_s16 + $0xd38] sm:$0xff] }
 0x148   : > { %2091 = vst [vmem:[%s2655_s28 + $0xc58] sm:$0xff] %v1579_v23  ;;  %2092 = vst [vmem:[%s2655_s28 + $0xc60] sm:$0xff] %v1580_v24  ;;  %v1583_v33 = vadd.f32 %v2625_v2, %v1070_v25  ;;  %v1073_v34 = vmul.f32 %v2623_v1, %v560_v19  ;;  %v1074_v35 = vmul.f32 %v2623_v1, %v561_v20  ;;  %v582_v23 = vld [vmem:[%s2616_s16 + $0xd40] sm:$0xff]  ;;  %v583_v24 = vld [vmem:[%s2616_s16 + $0xd48] sm:$0xff] }
 0x149   : > { %v1075_v36 = vmul.f32 %v2623_v1, %v562_v21  ;;  %2093 = vst [vmem:[%s2655_s28 + $0xc68] sm:$0xff] %v1581_v28  ;;  %2094 = vst [vmem:[%s2655_s28 + $0xc70] sm:$0xff] %v1582_v29  ;;  %v1584_v39 = vadd.f32 %v2625_v2, %v1071_v30  ;;  %v1585_v40 = vadd.f32 %v2625_v2, %v1072_v31  ;;  %v584_v29 = vld [vmem:[%s2616_s16 + $0xd50] sm:$0xff]  ;;  %v585_v30 = vld [vmem:[%s2616_s16 + $0xd58] sm:$0xff] }
 0x14a   : > { %v1076_v41 = vmul.f32 %v2623_v1, %v563_v26  ;;  %v1077_v42 = vmul.f32 %v2623_v1, %v564_v27  ;;  %2095 = vst [vmem:[%s2655_s28 + $0xc78] sm:$0xff] %v1583_v33  ;;  %v1586_v46 = vadd.f32 %v2625_v2, %v1073_v34  ;;  %v1587_v47 = vadd.f32 %v2625_v2, %v1074_v35  ;;  %v586_v31 = vld [vmem:[%s2616_s16 + $0xd60] sm:$0xff] }
 0x14b   : > { %v1588_v48 = vadd.f32 %v2625_v2, %v1075_v36  ;;  %v1078_v49 = vmul.f32 %v2623_v1, %v565_v32  ;;  %2096 = vst [vmem:[%s2655_s28 + $0xc80] sm:$0xff] %v1584_v39  ;;  %2097 = vst [vmem:[%s2655_s28 + $0xc88] sm:$0xff] %v1585_v40  ;;  %v1079_v54 = vmul.f32 %v2623_v1, %v566_v37  ;;  %v587_v36 = vld [vmem:[%s2616_s16 + $0xd68] sm:$0xff]  ;;  %v588_v37 = vld [vmem:[%s2616_s16 + $0xd70] sm:$0xff] }
 0x14c   : > { %v1589_v52 = vadd.f32 %v2625_v2, %v1076_v41  ;;  %v1590_v53 = vadd.f32 %v2625_v2, %v1077_v42  ;;  %v1080_v55 = vmul.f32 %v2623_v1, %v567_v38  ;;  %2098 = vst [vmem:[%s2655_s28 + $0xc90] sm:$0xff] %v1586_v46  ;;  %2099 = vst [vmem:[%s2655_s28 + $0xc98] sm:$0xff] %v1587_v47  ;;  %v589_v42 = vld [vmem:[%s2616_s16 + $0xd78] sm:$0xff]  ;;  %v590_v47 = vld [vmem:[%s2616_s16 + $0xd80] sm:$0xff] }
 0x14d   : > { %2100 = vst [vmem:[%s2655_s28 + $0xca0] sm:$0xff] %v1588_v48  ;;  %v1591_v57 = vadd.f32 %v2625_v2, %v1078_v49  ;;  %v1081_v58 = vmul.f32 %v2623_v1, %v568_v43  ;;  %v1082_v59 = vmul.f32 %v2623_v1, %v569_v44  ;;  %v1083_v60 = vmul.f32 %v2623_v1, %v570_v45  ;;  %v591_v48 = vld [vmem:[%s2616_s16 + $0xd88] sm:$0xff] }
 0x14e   : > { %2101 = vst [vmem:[%s2655_s28 + $0xca8] sm:$0xff] %v1589_v52  ;;  %2102 = vst [vmem:[%s2655_s28 + $0xcb0] sm:$0xff] %v1590_v53  ;;  %v1592_v63 = vadd.f32 %v2625_v2, %v1079_v54  ;;  %v1593_v0 = vadd.f32 %v2625_v2, %v1080_v55  ;;  %v1084_v3 = vmul.f32 %v2623_v1, %v571_v50  ;;  %v592_v53 = vld [vmem:[%s2616_s16 + $0xd90] sm:$0xff]  ;;  %v593_v54 = vld [vmem:[%s2616_s16 + $0xd98] sm:$0xff] }
 0x14f   : > { %v1085_v4 = vmul.f32 %v2623_v1, %v572_v51  ;;  %2103 = vst [vmem:[%s2655_s28 + $0xcb8] sm:$0xff] %v1591_v57  ;;  %v1594_v8 = vadd.f32 %v2625_v2, %v1081_v58  ;;  %v1595_v9 = vadd.f32 %v2625_v2, %v1082_v59  ;;  %v1596_v10 = vadd.f32 %v2625_v2, %v1083_v60  ;;  %v594_v55 = vld [vmem:[%s2616_s16 + $0xda0] sm:$0xff]  ;;  %v595_v60 = vld [vmem:[%s2616_s16 + $0xda8] sm:$0xff] }
 0x150   : > { %v1086_v11 = vmul.f32 %v2623_v1, %v573_v56  ;;  %2104 = vst [vmem:[%s2655_s28 + $0xcc0] sm:$0xff] %v1592_v63  ;;  %2105 = vst [vmem:[%s2655_s28 + $0xcc8] sm:$0xff] %v1593_v0  ;;  %v1597_v14 = vadd.f32 %v2625_v2, %v1084_v3  ;;  %v1087_v16 = vmul.f32 %v2623_v1, %v574_v61  ;;  %v596_v61 = vld [vmem:[%s2616_s16 + $0xdb0] sm:$0xff] }
 0x151   : > { %v1598_v15 = vadd.f32 %v2625_v2, %v1085_v4  ;;  %v1088_v17 = vmul.f32 %v2623_v1, %v575_v62  ;;  %2106 = vst [vmem:[%s2655_s28 + $0xcd0] sm:$0xff] %v1594_v8  ;;  %2107 = vst [vmem:[%s2655_s28 + $0xcd8] sm:$0xff] %v1595_v9  ;;  %v1089_v20 = vmul.f32 %v2623_v1, %v576_v5  ;;  %v597_v4 = vld [vmem:[%s2616_s16 + $0xdb8] sm:$0xff]  ;;  %v598_v9 = vld [vmem:[%s2616_s16 + $0xdc0] sm:$0xff] }
 0x152   : > { %2108 = vst [vmem:[%s2655_s28 + $0xce0] sm:$0xff] %v1596_v10  ;;  %v1599_v19 = vadd.f32 %v2625_v2, %v1086_v11  ;;  %v1090_v21 = vmul.f32 %v2623_v1, %v577_v6  ;;  %v1091_v22 = vmul.f32 %v2623_v1, %v578_v7  ;;  %2109 = vst [vmem:[%s2655_s28 + $0xce8] sm:$0xff] %v1597_v14  ;;  %v599_v10 = vld [vmem:[%s2616_s16 + $0xdc8] sm:$0xff] }
 0x153   : > { %2110 = vst [vmem:[%s2655_s28 + $0xcf0] sm:$0xff] %v1598_v15  ;;  %v1600_v25 = vadd.f32 %v2625_v2, %v1087_v16  ;;  %v1601_v26 = vadd.f32 %v2625_v2, %v1088_v17  ;;  %v1092_v27 = vmul.f32 %v2623_v1, %v579_v12  ;;  %v1093_v28 = vmul.f32 %v2623_v1, %v580_v13  ;;  %v600_v15 = vld [vmem:[%s2616_s16 + $0xdd0] sm:$0xff]  ;;  %v601_v16 = vld [vmem:[%s2616_s16 + $0xdd8] sm:$0xff]  ;;  %v602_v17 = vld [vmem:[%s2616_s16 + $0xde0] sm:$0xff] }
 0x154   : > { %2111 = vst [vmem:[%s2655_s28 + $0xcf8] sm:$0xff] %v1599_v19  ;;  %v1602_v32 = vadd.f32 %v2625_v2, %v1089_v20  ;;  %v1603_v33 = vadd.f32 %v2625_v2, %v1090_v21  ;;  %v1604_v34 = vadd.f32 %v2625_v2, %v1091_v22  ;;  %v1094_v35 = vmul.f32 %v2623_v1, %v581_v18  ;;  %v603_v22 = vld [vmem:[%s2616_s16 + $0xde8] sm:$0xff] }
 0x155   : > { %2112 = vst [vmem:[%s2655_s28 + $0xd00] sm:$0xff] %v1600_v25  ;;  %2113 = vst [vmem:[%s2655_s28 + $0xd08] sm:$0xff] %v1601_v26  ;;  %v1605_v38 = vadd.f32 %v2625_v2, %v1092_v27  ;;  %v1606_v39 = vadd.f32 %v2625_v2, %v1093_v28  ;;  %v1095_v40 = vmul.f32 %v2623_v1, %v582_v23  ;;  %v604_v23 = vld [vmem:[%s2616_s16 + $0xdf0] sm:$0xff]  ;;  %v605_v28 = vld [vmem:[%s2616_s16 + $0xdf8] sm:$0xff] }
 0x156   : > { %v1096_v41 = vmul.f32 %v2623_v1, %v583_v24  ;;  %2114 = vst [vmem:[%s2655_s28 + $0xd10] sm:$0xff] %v1602_v32  ;;  %2115 = vst [vmem:[%s2655_s28 + $0xd18] sm:$0xff] %v1603_v33  ;;  %v1607_v43 = vadd.f32 %v2625_v2, %v1094_v35  ;;  %v1097_v44 = vmul.f32 %v2623_v1, %v584_v29  ;;  %v606_v33 = vld [vmem:[%s2616_s16 + $0xe00] sm:$0xff] }
 0x157   : > { %2116 = vst [vmem:[%s2655_s28 + $0xd20] sm:$0xff] %v1604_v34  ;;  %v1098_v45 = vmul.f32 %v2623_v1, %v585_v30  ;;  %v1099_v46 = vmul.f32 %v2623_v1, %v586_v31  ;;  %2117 = vst [vmem:[%s2655_s28 + $0xd28] sm:$0xff] %v1605_v38  ;;  %v1608_v49 = vadd.f32 %v2625_v2, %v1095_v40  ;;  %v607_v34 = vld [vmem:[%s2616_s16 + $0xe08] sm:$0xff]  ;;  %v609_v40 = vld [vmem:[%s2616_s16 + $0xe18] sm:$0xff] }
 0x158   : > { %2118 = vst [vmem:[%s2655_s28 + $0xd30] sm:$0xff] %v1606_v39  ;;  %v1609_v50 = vadd.f32 %v2625_v2, %v1096_v41  ;;  %v1100_v51 = vmul.f32 %v2623_v1, %v587_v36  ;;  %v1101_v52 = vmul.f32 %v2623_v1, %v588_v37  ;;  %2119 = vst [vmem:[%s2655_s28 + $0xd38] sm:$0xff] %v1607_v43  ;;  %v608_v39 = vld [vmem:[%s2616_s16 + $0xe10] sm:$0xff]  ;;  %v610_v41 = vld [vmem:[%s2616_s16 + $0xe20] sm:$0xff] }
 0x159   : > { %v1610_v56 = vadd.f32 %v2625_v2, %v1097_v44  ;;  %v1611_v57 = vadd.f32 %v2625_v2, %v1098_v45  ;;  %v1612_v58 = vadd.f32 %v2625_v2, %v1099_v46  ;;  %v1102_v59 = vmul.f32 %v2623_v1, %v589_v42  ;;  %2120 = vst [vmem:[%s2655_s28 + $0xd40] sm:$0xff] %v1608_v49  ;;  %v611_v46 = vld [vmem:[%s2616_s16 + $0xe28] sm:$0xff] }
 0x15a   : > { %2121 = vst [vmem:[%s2655_s28 + $0xd48] sm:$0xff] %v1609_v50  ;;  %v1613_v62 = vadd.f32 %v2625_v2, %v1100_v51  ;;  %v1614_v63 = vadd.f32 %v2625_v2, %v1101_v52  ;;  %v1103_v0 = vmul.f32 %v2623_v1, %v590_v47  ;;  %v1104_v3 = vmul.f32 %v2623_v1, %v591_v48  ;;  %v612_v47 = vld [vmem:[%s2616_s16 + $0xe30] sm:$0xff]  ;;  %v613_v52 = vld [vmem:[%s2616_s16 + $0xe38] sm:$0xff] }
 0x15b   : > { %2122 = vst [vmem:[%s2655_s28 + $0xd50] sm:$0xff] %v1610_v56  ;;  %2123 = vst [vmem:[%s2655_s28 + $0xd58] sm:$0xff] %v1611_v57  ;;  %v1615_v5 = vadd.f32 %v2625_v2, %v1102_v59  ;;  %v1105_v6 = vmul.f32 %v2623_v1, %v592_v53  ;;  %v1106_v7 = vmul.f32 %v2623_v1, %v593_v54  ;;  %v614_v57 = vld [vmem:[%s2616_s16 + $0xe40] sm:$0xff] }
 0x15c   : > { %2124 = vst [vmem:[%s2655_s28 + $0xd60] sm:$0xff] %v1612_v58  ;;  %v1107_v8 = vmul.f32 %v2623_v1, %v594_v55  ;;  %2125 = vst [vmem:[%s2655_s28 + $0xd68] sm:$0xff] %v1613_v62  ;;  %v1616_v11 = vadd.f32 %v2625_v2, %v1103_v0  ;;  %v1617_v12 = vadd.f32 %v2625_v2, %v1104_v3  ;;  %v615_v58 = vld [vmem:[%s2616_s16 + $0xe48] sm:$0xff]  ;;  %v617_v0 = vld [vmem:[%s2616_s16 + $0xe58] sm:$0xff] }
 0x15d   : > { %2126 = vst [vmem:[%s2655_s28 + $0xd70] sm:$0xff] %v1614_v63  ;;  %v1108_v13 = vmul.f32 %v2623_v1, %v595_v60  ;;  %v1109_v14 = vmul.f32 %v2623_v1, %v596_v61  ;;  %2127 = vst [vmem:[%s2655_s28 + $0xd78] sm:$0xff] %v1615_v5  ;;  %v1618_v18 = vadd.f32 %v2625_v2, %v1105_v6  ;;  %v616_v63 = vld [vmem:[%s2616_s16 + $0xe50] sm:$0xff]  ;;  %v618_v3 = vld [vmem:[%s2616_s16 + $0xe60] sm:$0xff] }
 0x15e   : > { %v1619_v19 = vadd.f32 %v2625_v2, %v1106_v7  ;;  %v1620_v20 = vadd.f32 %v2625_v2, %v1107_v8  ;;  %v1110_v21 = vmul.f32 %v2623_v1, %v597_v4  ;;  %2128 = vst [vmem:[%s2655_s28 + $0xd80] sm:$0xff] %v1616_v11  ;;  %2129 = vst [vmem:[%s2655_s28 + $0xd88] sm:$0xff] %v1617_v12  ;;  %v619_v8 = vld [vmem:[%s2616_s16 + $0xe68] sm:$0xff] }
 0x15f   : > { %v1621_v24 = vadd.f32 %v2625_v2, %v1108_v13  ;;  %v1622_v25 = vadd.f32 %v2625_v2, %v1109_v14  ;;  %v1111_v26 = vmul.f32 %v2623_v1, %v598_v9  ;;  %v1112_v27 = vmul.f32 %v2623_v1, %v599_v10  ;;  %2130 = vst [vmem:[%s2655_s28 + $0xd90] sm:$0xff] %v1618_v18  ;;  %v620_v9 = vld [vmem:[%s2616_s16 + $0xe70] sm:$0xff]  ;;  %v621_v14 = vld [vmem:[%s2616_s16 + $0xe78] sm:$0xff] }
 0x160   : > { %2131 = vst [vmem:[%s2655_s28 + $0xd98] sm:$0xff] %v1619_v19  ;;  %2132 = vst [vmem:[%s2655_s28 + $0xda0] sm:$0xff] %v1620_v20  ;;  %v1623_v29 = vadd.f32 %v2625_v2, %v1110_v21  ;;  %v1113_v30 = vmul.f32 %v2623_v1, %v600_v15  ;;  %v1114_v31 = vmul.f32 %v2623_v1, %v601_v16  ;;  %v622_v19 = vld [vmem:[%s2616_s16 + $0xe80] sm:$0xff]  ;;  %v623_v20 = vld [vmem:[%s2616_s16 + $0xe88] sm:$0xff] }
 0x161   : > { %v1115_v32 = vmul.f32 %v2623_v1, %v602_v17  ;;  %2133 = vst [vmem:[%s2655_s28 + $0xda8] sm:$0xff] %v1621_v24  ;;  %2134 = vst [vmem:[%s2655_s28 + $0xdb0] sm:$0xff] %v1622_v25  ;;  %v1624_v35 = vadd.f32 %v2625_v2, %v1111_v26  ;;  %v1625_v36 = vadd.f32 %v2625_v2, %v1112_v27  ;;  %v624_v25 = vld [vmem:[%s2616_s16 + $0xe90] sm:$0xff]  ;;  %v625_v26 = vld [vmem:[%s2616_s16 + $0xe98] sm:$0xff] }
 0x162   : > { %v1116_v37 = vmul.f32 %v2623_v1, %v603_v22  ;;  %v1117_v38 = vmul.f32 %v2623_v1, %v604_v23  ;;  %2135 = vst [vmem:[%s2655_s28 + $0xdb8] sm:$0xff] %v1623_v29  ;;  %v1626_v42 = vadd.f32 %v2625_v2, %v1113_v30  ;;  %v1627_v43 = vadd.f32 %v2625_v2, %v1114_v31  ;;  %v626_v27 = vld [vmem:[%s2616_s16 + $0xea0] sm:$0xff] }
 0x163   : > { %v1628_v44 = vadd.f32 %v2625_v2, %v1115_v32  ;;  %v1118_v45 = vmul.f32 %v2623_v1, %v605_v28  ;;  %2136 = vst [vmem:[%s2655_s28 + $0xdc0] sm:$0xff] %v1624_v35  ;;  %2137 = vst [vmem:[%s2655_s28 + $0xdc8] sm:$0xff] %v1625_v36  ;;  %v1119_v50 = vmul.f32 %v2623_v1, %v606_v33  ;;  %v627_v32 = vld [vmem:[%s2616_s16 + $0xea8] sm:$0xff]  ;;  %v628_v33 = vld [vmem:[%s2616_s16 + $0xeb0] sm:$0xff] }
 0x164   : > { %v1629_v48 = vadd.f32 %v2625_v2, %v1116_v37  ;;  %v1630_v49 = vadd.f32 %v2625_v2, %v1117_v38  ;;  %v1120_v51 = vmul.f32 %v2623_v1, %v607_v34  ;;  %2138 = vst [vmem:[%s2655_s28 + $0xdd0] sm:$0xff] %v1626_v42  ;;  %2139 = vst [vmem:[%s2655_s28 + $0xdd8] sm:$0xff] %v1627_v43  ;;  %v629_v38 = vld [vmem:[%s2616_s16 + $0xeb8] sm:$0xff]  ;;  %v630_v43 = vld [vmem:[%s2616_s16 + $0xec0] sm:$0xff] }
 0x165   : > { %2140 = vst [vmem:[%s2655_s28 + $0xde0] sm:$0xff] %v1628_v44  ;;  %v1631_v53 = vadd.f32 %v2625_v2, %v1118_v45  ;;  %v1121_v54 = vmul.f32 %v2623_v1, %v608_v39  ;;  %v1122_v55 = vmul.f32 %v2623_v1, %v609_v40  ;;  %v1123_v56 = vmul.f32 %v2623_v1, %v610_v41  ;;  %v631_v44 = vld [vmem:[%s2616_s16 + $0xec8] sm:$0xff] }
 0x166   : > { %2141 = vst [vmem:[%s2655_s28 + $0xde8] sm:$0xff] %v1629_v48  ;;  %2142 = vst [vmem:[%s2655_s28 + $0xdf0] sm:$0xff] %v1630_v49  ;;  %v1632_v59 = vadd.f32 %v2625_v2, %v1119_v50  ;;  %v1633_v60 = vadd.f32 %v2625_v2, %v1120_v51  ;;  %v1124_v61 = vmul.f32 %v2623_v1, %v611_v46  ;;  %v632_v49 = vld [vmem:[%s2616_s16 + $0xed0] sm:$0xff]  ;;  %v633_v50 = vld [vmem:[%s2616_s16 + $0xed8] sm:$0xff] }
 0x167   : > { %v1125_v62 = vmul.f32 %v2623_v1, %v612_v47  ;;  %2143 = vst [vmem:[%s2655_s28 + $0xdf8] sm:$0xff] %v1631_v53  ;;  %v1634_v4 = vadd.f32 %v2625_v2, %v1121_v54  ;;  %v1635_v5 = vadd.f32 %v2625_v2, %v1122_v55  ;;  %v1636_v6 = vadd.f32 %v2625_v2, %v1123_v56  ;;  %v634_v51 = vld [vmem:[%s2616_s16 + $0xee0] sm:$0xff]  ;;  %v635_v56 = vld [vmem:[%s2616_s16 + $0xee8] sm:$0xff] }
 0x168   : > { %v1126_v7 = vmul.f32 %v2623_v1, %v613_v52  ;;  %2144 = vst [vmem:[%s2655_s28 + $0xe00] sm:$0xff] %v1632_v59  ;;  %2145 = vst [vmem:[%s2655_s28 + $0xe08] sm:$0xff] %v1633_v60  ;;  %v1637_v10 = vadd.f32 %v2625_v2, %v1124_v61  ;;  %v1127_v12 = vmul.f32 %v2623_v1, %v614_v57  ;;  %v636_v57 = vld [vmem:[%s2616_s16 + $0xef0] sm:$0xff] }
 0x169   : > { %v1638_v11 = vadd.f32 %v2625_v2, %v1125_v62  ;;  %v1128_v13 = vmul.f32 %v2623_v1, %v615_v58  ;;  %2146 = vst [vmem:[%s2655_s28 + $0xe10] sm:$0xff] %v1634_v4  ;;  %2147 = vst [vmem:[%s2655_s28 + $0xe18] sm:$0xff] %v1635_v5  ;;  %v1129_v16 = vmul.f32 %v2623_v1, %v616_v63  ;;  %v637_v62 = vld [vmem:[%s2616_s16 + $0xef8] sm:$0xff]  ;;  %v638_v5 = vld [vmem:[%s2616_s16 + $0xf00] sm:$0xff] }
 0x16a   : > { %2148 = vst [vmem:[%s2655_s28 + $0xe20] sm:$0xff] %v1636_v6  ;;  %v1639_v15 = vadd.f32 %v2625_v2, %v1126_v7  ;;  %v1130_v17 = vmul.f32 %v2623_v1, %v617_v0  ;;  %v1131_v18 = vmul.f32 %v2623_v1, %v618_v3  ;;  %2149 = vst [vmem:[%s2655_s28 + $0xe28] sm:$0xff] %v1637_v10  ;;  %v639_v6 = vld [vmem:[%s2616_s16 + $0xf08] sm:$0xff] }
 0x16b   : > { %2150 = vst [vmem:[%s2655_s28 + $0xe30] sm:$0xff] %v1638_v11  ;;  %v1640_v21 = vadd.f32 %v2625_v2, %v1127_v12  ;;  %v1641_v22 = vadd.f32 %v2625_v2, %v1128_v13  ;;  %v1132_v23 = vmul.f32 %v2623_v1, %v619_v8  ;;  %v1133_v24 = vmul.f32 %v2623_v1, %v620_v9  ;;  %v640_v11 = vld [vmem:[%s2616_s16 + $0xf10] sm:$0xff]  ;;  %v641_v12 = vld [vmem:[%s2616_s16 + $0xf18] sm:$0xff]  ;;  %v642_v13 = vld [vmem:[%s2616_s16 + $0xf20] sm:$0xff] }
 0x16c   : > { %2151 = vst [vmem:[%s2655_s28 + $0xe38] sm:$0xff] %v1639_v15  ;;  %v1642_v28 = vadd.f32 %v2625_v2, %v1129_v16  ;;  %v1643_v29 = vadd.f32 %v2625_v2, %v1130_v17  ;;  %v1644_v30 = vadd.f32 %v2625_v2, %v1131_v18  ;;  %v1134_v31 = vmul.f32 %v2623_v1, %v621_v14  ;;  %v643_v18 = vld [vmem:[%s2616_s16 + $0xf28] sm:$0xff] }
 0x16d   : > { %2152 = vst [vmem:[%s2655_s28 + $0xe40] sm:$0xff] %v1640_v21  ;;  %2153 = vst [vmem:[%s2655_s28 + $0xe48] sm:$0xff] %v1641_v22  ;;  %v1645_v34 = vadd.f32 %v2625_v2, %v1132_v23  ;;  %v1646_v35 = vadd.f32 %v2625_v2, %v1133_v24  ;;  %v1135_v36 = vmul.f32 %v2623_v1, %v622_v19  ;;  %v644_v19 = vld [vmem:[%s2616_s16 + $0xf30] sm:$0xff]  ;;  %v645_v24 = vld [vmem:[%s2616_s16 + $0xf38] sm:$0xff] }
 0x16e   : > { %v1136_v37 = vmul.f32 %v2623_v1, %v623_v20  ;;  %2154 = vst [vmem:[%s2655_s28 + $0xe50] sm:$0xff] %v1642_v28  ;;  %2155 = vst [vmem:[%s2655_s28 + $0xe58] sm:$0xff] %v1643_v29  ;;  %v1647_v39 = vadd.f32 %v2625_v2, %v1134_v31  ;;  %v1137_v40 = vmul.f32 %v2623_v1, %v624_v25  ;;  %v646_v29 = vld [vmem:[%s2616_s16 + $0xf40] sm:$0xff] }
 0x16f   : > { %2156 = vst [vmem:[%s2655_s28 + $0xe60] sm:$0xff] %v1644_v30  ;;  %v1138_v41 = vmul.f32 %v2623_v1, %v625_v26  ;;  %v1139_v42 = vmul.f32 %v2623_v1, %v626_v27  ;;  %2157 = vst [vmem:[%s2655_s28 + $0xe68] sm:$0xff] %v1645_v34  ;;  %v1648_v45 = vadd.f32 %v2625_v2, %v1135_v36  ;;  %v647_v30 = vld [vmem:[%s2616_s16 + $0xf48] sm:$0xff]  ;;  %v649_v36 = vld [vmem:[%s2616_s16 + $0xf58] sm:$0xff] }
 0x170   : > { %2158 = vst [vmem:[%s2655_s28 + $0xe70] sm:$0xff] %v1646_v35  ;;  %v1649_v46 = vadd.f32 %v2625_v2, %v1136_v37  ;;  %v1140_v47 = vmul.f32 %v2623_v1, %v627_v32  ;;  %v1141_v48 = vmul.f32 %v2623_v1, %v628_v33  ;;  %2159 = vst [vmem:[%s2655_s28 + $0xe78] sm:$0xff] %v1647_v39  ;;  %v648_v35 = vld [vmem:[%s2616_s16 + $0xf50] sm:$0xff]  ;;  %v650_v37 = vld [vmem:[%s2616_s16 + $0xf60] sm:$0xff] }
 0x171   : > { %v1650_v52 = vadd.f32 %v2625_v2, %v1137_v40  ;;  %v1651_v53 = vadd.f32 %v2625_v2, %v1138_v41  ;;  %v1652_v54 = vadd.f32 %v2625_v2, %v1139_v42  ;;  %v1142_v55 = vmul.f32 %v2623_v1, %v629_v38  ;;  %2160 = vst [vmem:[%s2655_s28 + $0xe80] sm:$0xff] %v1648_v45  ;;  %v651_v42 = vld [vmem:[%s2616_s16 + $0xf68] sm:$0xff] }
 0x172   : > { %2161 = vst [vmem:[%s2655_s28 + $0xe88] sm:$0xff] %v1649_v46  ;;  %v1653_v58 = vadd.f32 %v2625_v2, %v1140_v47  ;;  %v1654_v59 = vadd.f32 %v2625_v2, %v1141_v48  ;;  %v1143_v60 = vmul.f32 %v2623_v1, %v630_v43  ;;  %v1144_v61 = vmul.f32 %v2623_v1, %v631_v44  ;;  %v652_v43 = vld [vmem:[%s2616_s16 + $0xf70] sm:$0xff]  ;;  %v653_v48 = vld [vmem:[%s2616_s16 + $0xf78] sm:$0xff] }
 0x173   : > { %2162 = vst [vmem:[%s2655_s28 + $0xe90] sm:$0xff] %v1650_v52  ;;  %2163 = vst [vmem:[%s2655_s28 + $0xe98] sm:$0xff] %v1651_v53  ;;  %v1655_v63 = vadd.f32 %v2625_v2, %v1142_v55  ;;  %v1145_v0 = vmul.f32 %v2623_v1, %v632_v49  ;;  %v1146_v3 = vmul.f32 %v2623_v1, %v633_v50  ;;  %v654_v53 = vld [vmem:[%s2616_s16 + $0xf80] sm:$0xff] }
 0x174   : > { %2164 = vst [vmem:[%s2655_s28 + $0xea0] sm:$0xff] %v1652_v54  ;;  %v1147_v4 = vmul.f32 %v2623_v1, %v634_v51  ;;  %2165 = vst [vmem:[%s2655_s28 + $0xea8] sm:$0xff] %v1653_v58  ;;  %v1656_v7 = vadd.f32 %v2625_v2, %v1143_v60  ;;  %v1657_v8 = vadd.f32 %v2625_v2, %v1144_v61  ;;  %v655_v54 = vld [vmem:[%s2616_s16 + $0xf88] sm:$0xff]  ;;  %v657_v60 = vld [vmem:[%s2616_s16 + $0xf98] sm:$0xff] }
 0x175   : > { %2166 = vst [vmem:[%s2655_s28 + $0xeb0] sm:$0xff] %v1654_v59  ;;  %v1148_v9 = vmul.f32 %v2623_v1, %v635_v56  ;;  %v1149_v10 = vmul.f32 %v2623_v1, %v636_v57  ;;  %2167 = vst [vmem:[%s2655_s28 + $0xeb8] sm:$0xff] %v1655_v63  ;;  %v1658_v14 = vadd.f32 %v2625_v2, %v1145_v0  ;;  %v656_v59 = vld [vmem:[%s2616_s16 + $0xf90] sm:$0xff]  ;;  %v658_v61 = vld [vmem:[%s2616_s16 + $0xfa0] sm:$0xff] }
 0x176   : > { %v1659_v15 = vadd.f32 %v2625_v2, %v1146_v3  ;;  %v1660_v16 = vadd.f32 %v2625_v2, %v1147_v4  ;;  %v1150_v17 = vmul.f32 %v2623_v1, %v637_v62  ;;  %2168 = vst [vmem:[%s2655_s28 + $0xec0] sm:$0xff] %v1656_v7  ;;  %2169 = vst [vmem:[%s2655_s28 + $0xec8] sm:$0xff] %v1657_v8  ;;  %v659_v4 = vld [vmem:[%s2616_s16 + $0xfa8] sm:$0xff] }
 0x177   : > { %v1661_v20 = vadd.f32 %v2625_v2, %v1148_v9  ;;  %v1662_v21 = vadd.f32 %v2625_v2, %v1149_v10  ;;  %v1151_v22 = vmul.f32 %v2623_v1, %v638_v5  ;;  %v1152_v23 = vmul.f32 %v2623_v1, %v639_v6  ;;  %2170 = vst [vmem:[%s2655_s28 + $0xed0] sm:$0xff] %v1658_v14  ;;  %v660_v5 = vld [vmem:[%s2616_s16 + $0xfb0] sm:$0xff]  ;;  %v661_v10 = vld [vmem:[%s2616_s16 + $0xfb8] sm:$0xff] }
 0x178   : > { %2171 = vst [vmem:[%s2655_s28 + $0xed8] sm:$0xff] %v1659_v15  ;;  %2172 = vst [vmem:[%s2655_s28 + $0xee0] sm:$0xff] %v1660_v16  ;;  %v1663_v25 = vadd.f32 %v2625_v2, %v1150_v17  ;;  %v1153_v26 = vmul.f32 %v2623_v1, %v640_v11  ;;  %v1154_v27 = vmul.f32 %v2623_v1, %v641_v12  ;;  %v662_v15 = vld [vmem:[%s2616_s16 + $0xfc0] sm:$0xff]  ;;  %v663_v16 = vld [vmem:[%s2616_s16 + $0xfc8] sm:$0xff] }
 0x179   : > { %v1155_v28 = vmul.f32 %v2623_v1, %v642_v13  ;;  %2173 = vst [vmem:[%s2655_s28 + $0xee8] sm:$0xff] %v1661_v20  ;;  %2174 = vst [vmem:[%s2655_s28 + $0xef0] sm:$0xff] %v1662_v21  ;;  %v1664_v31 = vadd.f32 %v2625_v2, %v1151_v22  ;;  %v1665_v32 = vadd.f32 %v2625_v2, %v1152_v23  ;;  %v664_v21 = vld [vmem:[%s2616_s16 + $0xfd0] sm:$0xff]  ;;  %v665_v22 = vld [vmem:[%s2616_s16 + $0xfd8] sm:$0xff] }
 0x17a   : > { %v1156_v33 = vmul.f32 %v2623_v1, %v643_v18  ;;  %v1157_v34 = vmul.f32 %v2623_v1, %v644_v19  ;;  %2175 = vst [vmem:[%s2655_s28 + $0xef8] sm:$0xff] %v1663_v25  ;;  %v1666_v38 = vadd.f32 %v2625_v2, %v1153_v26  ;;  %v1667_v39 = vadd.f32 %v2625_v2, %v1154_v27  ;;  %v666_v23 = vld [vmem:[%s2616_s16 + $0xfe0] sm:$0xff] }
 0x17b   : > { %v1668_v40 = vadd.f32 %v2625_v2, %v1155_v28  ;;  %v1158_v41 = vmul.f32 %v2623_v1, %v645_v24  ;;  %2176 = vst [vmem:[%s2655_s28 + $0xf00] sm:$0xff] %v1664_v31  ;;  %2177 = vst [vmem:[%s2655_s28 + $0xf08] sm:$0xff] %v1665_v32  ;;  %v1159_v46 = vmul.f32 %v2623_v1, %v646_v29  ;;  %v667_v28 = vld [vmem:[%s2616_s16 + $0xfe8] sm:$0xff]  ;;  %v668_v29 = vld [vmem:[%s2616_s16 + $0xff0] sm:$0xff] }
 0x17c   : > { %v1669_v44 = vadd.f32 %v2625_v2, %v1156_v33  ;;  %v1670_v45 = vadd.f32 %v2625_v2, %v1157_v34  ;;  %v1160_v47 = vmul.f32 %v2623_v1, %v647_v30  ;;  %2178 = vst [vmem:[%s2655_s28 + $0xf10] sm:$0xff] %v1666_v38  ;;  %2179 = vst [vmem:[%s2655_s28 + $0xf18] sm:$0xff] %v1667_v39  ;;  %v669_v34 = vld [vmem:[%s2616_s16 + $0xff8] sm:$0xff] }
 0x17d   : > { %2180 = vst [vmem:[%s2655_s28 + $0xf20] sm:$0xff] %v1668_v40  ;;  %v1671_v49 = vadd.f32 %v2625_v2, %v1158_v41  ;;  %v1161_v50 = vmul.f32 %v2623_v1, %v648_v35  ;;  %v1162_v51 = vmul.f32 %v2623_v1, %v649_v36  ;;  %v1163_v52 = vmul.f32 %v2623_v1, %v650_v37 }
 0x17e   : > { %2181 = vst [vmem:[%s2655_s28 + $0xf28] sm:$0xff] %v1669_v44  ;;  %2182 = vst [vmem:[%s2655_s28 + $0xf30] sm:$0xff] %v1670_v45  ;;  %v1672_v55 = vadd.f32 %v2625_v2, %v1159_v46  ;;  %v1673_v56 = vadd.f32 %v2625_v2, %v1160_v47  ;;  %v1164_v57 = vmul.f32 %v2623_v1, %v651_v42 }
 0x17f   : > { %v1165_v58 = vmul.f32 %v2623_v1, %v652_v43  ;;  %2183 = vst [vmem:[%s2655_s28 + $0xf38] sm:$0xff] %v1671_v49  ;;  %v1674_v62 = vadd.f32 %v2625_v2, %v1161_v50  ;;  %v1675_v63 = vadd.f32 %v2625_v2, %v1162_v51  ;;  %v1676_v0 = vadd.f32 %v2625_v2, %v1163_v52 }
 0x180   : > { %v1166_v3 = vmul.f32 %v2623_v1, %v653_v48  ;;  %2184 = vst [vmem:[%s2655_s28 + $0xf40] sm:$0xff] %v1672_v55  ;;  %2185 = vst [vmem:[%s2655_s28 + $0xf48] sm:$0xff] %v1673_v56  ;;  %v1677_v6 = vadd.f32 %v2625_v2, %v1164_v57  ;;  %v1167_v8 = vmul.f32 %v2623_v1, %v654_v53 }
 0x181   : > { %v1678_v7 = vadd.f32 %v2625_v2, %v1165_v58  ;;  %v1168_v9 = vmul.f32 %v2623_v1, %v655_v54  ;;  %2186 = vst [vmem:[%s2655_s28 + $0xf50] sm:$0xff] %v1674_v62  ;;  %2187 = vst [vmem:[%s2655_s28 + $0xf58] sm:$0xff] %v1675_v63  ;;  %v1169_v12 = vmul.f32 %v2623_v1, %v656_v59 }
 0x182   : > { %2188 = vst [vmem:[%s2655_s28 + $0xf60] sm:$0xff] %v1676_v0  ;;  %v1679_v11 = vadd.f32 %v2625_v2, %v1166_v3  ;;  %v1170_v13 = vmul.f32 %v2623_v1, %v657_v60  ;;  %v1171_v14 = vmul.f32 %v2623_v1, %v658_v61  ;;  %2189 = vst [vmem:[%s2655_s28 + $0xf68] sm:$0xff] %v1677_v6 }
 0x183   : > { %2190 = vst [vmem:[%s2655_s28 + $0xf70] sm:$0xff] %v1678_v7  ;;  %v1680_v17 = vadd.f32 %v2625_v2, %v1167_v8  ;;  %v1681_v18 = vadd.f32 %v2625_v2, %v1168_v9  ;;  %v1172_v19 = vmul.f32 %v2623_v1, %v659_v4  ;;  %v1173_v20 = vmul.f32 %v2623_v1, %v660_v5 }
 0x184   : > { %2191 = vst [vmem:[%s2655_s28 + $0xf78] sm:$0xff] %v1679_v11  ;;  %v1682_v24 = vadd.f32 %v2625_v2, %v1169_v12  ;;  %v1683_v25 = vadd.f32 %v2625_v2, %v1170_v13  ;;  %v1684_v26 = vadd.f32 %v2625_v2, %v1171_v14  ;;  %v1174_v27 = vmul.f32 %v2623_v1, %v661_v10 }
 0x185   : > { %2192 = vst [vmem:[%s2655_s28 + $0xf80] sm:$0xff] %v1680_v17  ;;  %2193 = vst [vmem:[%s2655_s28 + $0xf88] sm:$0xff] %v1681_v18  ;;  %v1685_v30 = vadd.f32 %v2625_v2, %v1172_v19  ;;  %v1686_v31 = vadd.f32 %v2625_v2, %v1173_v20  ;;  %v1175_v32 = vmul.f32 %v2623_v1, %v662_v15 }
 0x186   : > { %v1176_v33 = vmul.f32 %v2623_v1, %v663_v16  ;;  %2194 = vst [vmem:[%s2655_s28 + $0xf90] sm:$0xff] %v1682_v24  ;;  %2195 = vst [vmem:[%s2655_s28 + $0xf98] sm:$0xff] %v1683_v25  ;;  %v1687_v35 = vadd.f32 %v2625_v2, %v1174_v27  ;;  %v1177_v36 = vmul.f32 %v2623_v1, %v664_v21 }
 0x187   : > { %2196 = vst [vmem:[%s2655_s28 + $0xfa0] sm:$0xff] %v1684_v26  ;;  %v1178_v37 = vmul.f32 %v2623_v1, %v665_v22  ;;  %v1179_v38 = vmul.f32 %v2623_v1, %v666_v23  ;;  %2197 = vst [vmem:[%s2655_s28 + $0xfa8] sm:$0xff] %v1685_v30  ;;  %v1688_v39 = vadd.f32 %v2625_v2, %v1175_v32  ;;  %2215 = sbr.rel (!%p2556_p12) target bundleno = 426 (0x1aa), region = 32 }
 0x188   : > { %2198 = vst [vmem:[%s2655_s28 + $0xfb0] sm:$0xff] %v1686_v31  ;;  %v1689_v40 = vadd.f32 %v2625_v2, %v1176_v33  ;;  %v1180_v41 = vmul.f32 %v2623_v1, %v667_v28  ;;  %v1181_v42 = vmul.f32 %v2623_v1, %v668_v29  ;;  %2199 = vst [vmem:[%s2655_s28 + $0xfb8] sm:$0xff] %v1687_v35 }
 0x189   : > { %v1690_v43 = vadd.f32 %v2625_v2, %v1177_v36  ;;  %v1691_v44 = vadd.f32 %v2625_v2, %v1178_v37  ;;  %v1692_v45 = vadd.f32 %v2625_v2, %v1179_v38  ;;  %v1182_v46 = vmul.f32 %v2623_v1, %v669_v34  ;;  %2200 = vst [vmem:[%s2655_s28 + $0xfc0] sm:$0xff] %v1688_v39 }
 0x18a   : > { %2201 = vst [vmem:[%s2655_s28 + $0xfc8] sm:$0xff] %v1689_v40  ;;  %v1693_v47 = vadd.f32 %v2625_v2, %v1180_v41  ;;  %v1694_v48 = vadd.f32 %v2625_v2, %v1181_v42 }
 0x18b   : > { %2202 = vst [vmem:[%s2655_s28 + $0xfd0] sm:$0xff] %v1690_v43  ;;  %2203 = vst [vmem:[%s2655_s28 + $0xfd8] sm:$0xff] %v1691_v44  ;;  %v1695_v49 = vadd.f32 %v2625_v2, %v1182_v46 }
 0x18c   : > { %2204 = vst [vmem:[%s2655_s28 + $0xfe0] sm:$0xff] %v1692_v45  ;;  %2205 = vst [vmem:[%s2655_s28 + $0xfe8] sm:$0xff] %v1693_v47 }
 0x18d   : > { %2206 = vst [vmem:[%s2655_s28 + $0xff0] sm:$0xff] %v1694_v48  ;;  %2207 = vst [vmem:[%s2655_s28 + $0xff8] sm:$0xff] %v1695_v49 }
 0x18e   : > { %s4754_s17 = smov (!%p2218_p9, %s2217_s17), 512 }
 0x18f   : > { %s4682_s18 = sshll.u32 %s4754_s17, 7 }
 0x190   : > { %s2222_s23 = ssub.s32 65536, %s4682_s18 }
 0x191   : > { %2223 = vsyncadd %s2209_s14, %s2222_s23  ;;  %p2318_p13 = scmp.ne.s32.totalorder %s4682_s18, 0  ;;  %s2325_s29 = sshll.u32 %s2533_s0, 16 }
 0x192   : > { %s4692_s3 = scalar_lea.hbm %s4742_s2, %s2325_s29  ;;  %s2228_s4 = sshll.u32 %s2655_s28, 4  ;;  %s4695_s4 = int_to_ptr.vmem [resolvable:$true] %s2228_s4 }
 0x193   : > { %s2408_s5 = scalar_lea.vmem %s4695_s4, %s4682_s18  ;;  %s2482_s6 = smov [#allocation7]  }
 0x194   : > { %p2409_p12 = scmp.ne.s32.totalorder %s4695_s4, %s2408_s5  ;;  %s2412_s8 = sshll.u32 %s2482_s6, 4  ;;  %s2413_s8 = int_to_ptr.vmem [resolvable:$false] %s2412_s8 }
 0x195   : > { %s2414_s0 = scalar_lea.vmem %s2413_s8, 131072  ;;  %p2415_p1 = scmp.lt.s32.totalorder %s4695_s4, %s2413_s8 }
 0x196   : > { %p2410_p2 = pnand %p2409_p12, %p2318_p13  ;;  %p2416_p3 = scmp.lt.s32.totalorder %s2414_s0, %s2408_s5 }
 0x198   : > { %p2411_p0 = pneg %p2410_p2  ;;  %p2417_p4 = por %p2416_p3, %p2415_p1 }
 0x19a   : > { %p2418_p6 = pnand %p2417_p4, %p2411_p0 }
 0x19c   : > { %2421 = shalt.err (!%p2418_p6)
}
 0x19d   : > { %s2422_s10 = scalar_lea.hbm %s4692_s3, %s4682_s18  ;;  %s2426_s16 = scalar_lea.hbm %s4742_s2, 131200 }
 0x19e   : > { %p2423_p7 = scmp.ne.s32.totalorder %s4692_s3, %s2422_s10  ;;  %p2427_p10 = scmp.lt.u32.totalorder %s4692_s3, %s4742_s2 }
 0x19f   : > { %p2428_p11 = scmp.lt.u32.totalorder %s2426_s16, %s2422_s10  ;;  %p2430_p12 = scmp.lt.u32.totalorder %s2422_s10, %s4692_s3 }
 0x1a0   : > { %p2424_p8 = pnand %p2423_p7, %p2318_p13 }
 0x1a1   : > { %p2429_p9 = por %p2428_p11, %p2427_p10 }
 0x1a2   : > { %p2425_p5 = pneg %p2424_p8 }
 0x1a3   : > { %p2431_p2 = por %p2430_p12, %p2429_p9 }
 0x1a5   : > { %p2432_p0 = pnand %p2431_p2, %p2425_p5 }
 0x1a7   : > { %2435 = shalt.err (!%p2432_p0)
}
 0x1a8   : > { %s2483_s28 = smov 128   ;;  %s2484_s15 = smov 8  }
 0x1a9   : > { %2234 = dma.vmem_to_hbm [thread:$0]  (%p2318_p13), %s4695_s4, %s4682_s18, %s4692_s3, %s2209_s14, %s2483_s28, %s2483_s28, %s2484_s15  }
 0x1aa PF: > { %p2332_p1 = scmp.ge.s32.totalorder %s2476_s22, 2  ;;  %s2243_s17 = sand.u32 1, %s2464_s19  }
 0x1ab   : > { %p4746_p3 = scmp.ne.s32.totalorder %s4745_s30, 0  ;;  %s2244_s23 = scalar_lea.sflag [#allocation6], %s2243_s17 }
 0x1ad   : > { %p2329_p4 = pnand %p2332_p1, %p4746_p3 }
 0x1af   : > { %2459 = dma.done.wait (!%p2329_p4), %s2244_s23, 65536  }
 0x1b0   : > { %2461 = vsyncadd (!%p2329_p4), %s2244_s23, 4294901760  ;;  %p19_p6 = scmp.ge.s32.totalorder %s2537_s24, 5   ;;  %s4747_s19 = smov %s2468_s20 }
 0x1b1   : > { %s4748_s20 = smov %s2472_s21  ;;  %s4749_s21 = smov %s2549_s27 }
 0x1b2   : > { %s4750_s22 = smov %s2537_s24  ;;  %21 = sbr.rel (!%p19_p6) target bundleno = 17 (0x11), region = 69 }
 0x1b9   :  { %2249 = vsyncpa [#allocation5], 1 }
 0x1ba   :  { %2251 = vsyncpa [#allocation5 + $0x1], 1 }
 0x1bb   :  { %2252 = vsyncpa [#allocation6], 1 }
 0x1bc   :  { %2254 = vsyncpa [#allocation6 + $0x1], 1 }

</bundles_post_ra>
